<compile_context>
chip_gen: v6e
topology: v6e:2x2x1
jax: 0.10.0
libtpu: 0.0.40
codegen_flags: <defaults>
</compile_context>

<pallas_src>
import functools

import jax
import jax.numpy as jnp
from jax import lax
from jax.experimental import pallas as pl
from jax.experimental.pallas import tpu as pltpu


# =============================================================================
# Fused per-layer kernel: GConv(src|dst) + static context + ODRNCell.
# grid = (B, T); T is "arbitrary", hidden state resident in its output block.
# =============================================================================
def _odcrnn_layer_kernel(flow_ref, od_ref, graph_ref, ne_ref, h0_ref,
                         wg_ref, bgc_ref, wxfh_ref, wxne_ref, whzr_ref,
                         whc_ref, bg_ref, *out_refs, K, write_fh):
    if write_fh:
        fh_ref, state_ref = out_refs
    else:
        (state_ref,) = out_refs

    t = pl.program_id(1)
    f32 = jnp.float32
    bf16 = jnp.bfloat16
    eps = 1e-6

    def mm(a, b):
        # bf16 MXU operands, f32 accumulation.
        return jnp.dot(a.astype(bf16), b.astype(bf16), preferred_element_type=f32)

    def mm_t(a, b):
        # a^T @ b without materializing the transpose (contract a's axis 0).
        return lax.dot_general(a.astype(bf16), b.astype(bf16),
                               (((0,), (0,)), ((), ())),
                               preferred_element_type=f32)

    # -------- GConv: src & dst fused via block-diagonal per-order weights ----
    g = graph_ref[...]                        # (N, N) bf16 static graph
    x0 = flow_ref[0, t]                       # (N, 2*Din)  [src | dst]
    x1 = mm(g, x0)
    x2 = mm(g, x1)
    fh = (mm(x0, wg_ref[0]) + mm(x1, wg_ref[1]) + mm(x2, wg_ref[2])
          + bgc_ref[...])                     # (N, 2*Dout) [src | dst]
    if write_fh:
        fh_ref[0, t] = fh.astype(fh_ref.dtype)

    # -------- hidden state: resident across the T grid axis ------------------
    @pl.when(t == 0)
    def _():
        state_ref[...] = h0_ref[...]

    h = state_ref[0]                          # (N, H) f32
    ne = ne_ref[...]                          # (N, Demb) f32

    # -------- dynamic OD transition normalizers (no explicit transpose) ------
    A = od_ref[0, 0]                          # (N, N) bf16
    ones = jnp.ones((A.shape[0], 1), bf16)
    row_sum = jnp.dot(A, ones, preferred_element_type=f32)          # (N, 1)
    col_sum = lax.dot_general(A, ones, (((0,), (0,)), ((), ())),
                              preferred_element_type=f32)           # (N, 1)
    inv_row = pl.reciprocal(row_sum + eps, approx=True)   # p_fwd = diag(inv_row) A
    inv_col = pl.reciprocal(col_sum + eps, approx=True)   # p_bwd = diag(inv_col) A^T

    def fwd_hop(v):
        return mm(A, v) * inv_row

    def bwd_hop(v):
        return mm_t(A, v) * inv_col

    # -------- diffusion + per-term / per-gate matmul accumulation ------------
    # term index layout: 0 = identity, 1..K forward hops, K+1..2K backward.
    def x_contrib(vf, vn, k):                 # contribution of (fh, ne) term k
        return [mm(vf, wxfh_ref[3 * k + gi]) + mm(vn, wxne_ref[3 * k + gi])
                for gi in range(3)]

    def h_contrib(vh, k):                     # contribution of h term k (z, r)
        return [mm(vh, whzr_ref[2 * k + gi]) for gi in range(2)]

    gx = x_contrib(fh, ne, 0)
    gh = h_contrib(h, 0)
    acc_z = gx[0] + gh[0]
    acc_r = gx[1] + gh[1]
    acc_c = gx[2]

    vf, vn, vh = fh, ne, h                    # forward diffusion
    for k in range(1, K + 1):
        vf, vn, vh = fwd_hop(vf), fwd_hop(vn), fwd_hop(vh)
        gx = x_contrib(vf, vn, k)
        gh = h_contrib(vh, k)
        acc_z += gx[0] + gh[0]
        acc_r += gx[1] + gh[1]
        acc_c += gx[2]

    vf, vn, vh = fh, ne, h                    # backward diffusion
    for k in range(1, K + 1):
        vf, vn, vh = bwd_hop(vf), bwd_hop(vn), bwd_hop(vh)
        gx = x_contrib(vf, vn, K + k)
        gh = h_contrib(vh, K + k)
        acc_z += gx[0] + gh[0]
        acc_r += gx[1] + gh[1]
        acc_c += gx[2]

    z = jax.nn.sigmoid(acc_z + bg_ref[0])
    r = jax.nn.sigmoid(acc_r + bg_ref[1])

    rh = r * h                                # candidate-gate diffusion of r*h
    acc_c += mm(rh, whc_ref[0])
    vr = rh
    for k in range(1, K + 1):
        vr = fwd_hop(vr)
        acc_c += mm(vr, whc_ref[k])
    vr = rh
    for k in range(1, K + 1):
        vr = bwd_hop(vr)
        acc_c += mm(vr, whc_ref[K + k])
    hc = jnp.tanh(acc_c + bg_ref[2])

    state_ref[0] = (z * h + (1.0 - z) * hc).astype(state_ref.dtype)


def odcrnn_layer(flow, od_bf16, graph_bf16, ne, h0,
                 w_src, b_src, w_dst, b_dst, wx, wh, b_cell, K, *,
                 write_fh=True):
    """One ODDCRNN layer over the full sequence.

    flow:       (B, T, N, 2*Din) f32   [src feats | dst feats]
    od_bf16:    (B, T, N, N)     bf16  dynamic OD graph
    graph_bf16: (N, N)           bf16  static graph for the GConvs
    ne:         (N, Demb)        f32   static context (MLP of node embeddings)
    h0:         (B, N, H)        f32   initial hidden state for this layer
    Returns (fh (B, T, N, 2*Dout) or None, state (B, N, H)).
    """
    B, T, N, two_din = flow.shape
    Din = two_din // 2
    Dout = w_src.shape[-1]
    Dfh = 2 * Dout
    H = h0.shape[-1]
    nt = 1 + 2 * K
    Demb = ne.shape[-1]
    bf16 = jnp.bfloat16

    # ---- host-side weight folding (keeps the kernel lane-concat free) -------
    # Both GConvs share the graph diffusion -> block-diagonal weight per order.
    wg = jnp.zeros((3, two_din, Dfh), jnp.float32)
    for o in range(3):
        wg = wg.at[o, :Din, :Dout].set(w_src[o])
        wg = wg.at[o, Din:, Dout:].set(w_dst[o])
    wg = wg.astype(bf16)
    bgc = jnp.concatenate([b_src, b_dst], axis=-1)                 # (1, 2*Dout)

    # Cell weights split per diffusion term and per gate; kernel accumulates
    # tiny matmuls instead of concatenating diffusion terms along lanes.
    # wx: (3 gates, nt terms, Dcell, H) with Dcell = 2*Dout + Demb.
    wx_fh = jnp.transpose(wx[:, :, :Dfh, :], (1, 0, 2, 3)).reshape(
        nt * 3, Dfh, H).astype(bf16)
    wx_ne = jnp.transpose(wx[:, :, Dfh:, :], (1, 0, 2, 3)).reshape(
        nt * 3, Demb, H).astype(bf16)
    wh_zr = jnp.transpose(wh[:2], (1, 0, 2, 3)).reshape(nt * 2, H, H).astype(bf16)
    wh_c = wh[2].astype(bf16)                                      # (nt, H, H)
    bg = b_cell                                                    # (3, 1, H)

    out_shape = []
    out_specs = []
    if write_fh:
        out_shape.append(jax.ShapeDtypeStruct((B, T, N, Dfh), jnp.float32))
        out_specs.append(pl.BlockSpec((1, T, N, Dfh), lambda b, t: (b, 0, 0, 0)))
    out_shape.append(jax.ShapeDtypeStruct((B, N, H), jnp.float32))
    out_specs.append(pl.BlockSpec((1, N, H), lambda b, t: (b, 0, 0)))

    kernel = functools.partial(_odcrnn_layer_kernel, K=K, write_fh=write_fh)
    results = pl.pallas_call(
        kernel,
        out_shape=tuple(out_shape),
        grid=(B, T),
        in_specs=[
            # flow: whole T block per batch -> one fat DMA per b
            pl.BlockSpec((1, T, N, two_din), lambda b, t: (b, 0, 0, 0)),
            # dynamic OD graph: per timestep (keeps VMEM modest at large N)
            pl.BlockSpec((1, 1, N, N), lambda b, t: (b, t, 0, 0)),
            # static graph / static context / weights: resident in VMEM
            pl.BlockSpec((N, N), lambda b, t: (0, 0)),
            pl.BlockSpec((N, Demb), lambda b, t: (0, 0)),
            pl.BlockSpec((1, N, H), lambda b, t: (b, 0, 0)),
            pl.BlockSpec((3, two_din, Dfh), lambda b, t: (0, 0, 0)),
            pl.BlockSpec((1, Dfh), lambda b, t: (0, 0)),
            pl.BlockSpec((nt * 3, Dfh, H), lambda b, t: (0, 0, 0)),
            pl.BlockSpec((nt * 3, Demb, H), lambda b, t: (0, 0, 0)),
            pl.BlockSpec((nt * 2, H, H), lambda b, t: (0, 0, 0)),
            pl.BlockSpec((nt, H, H), lambda b, t: (0, 0, 0)),
            pl.BlockSpec((3, 1, H), lambda b, t: (0, 0, 0)),
        ],
        out_specs=tuple(out_specs),
        compiler_params=pltpu.CompilerParams(
            dimension_semantics=("parallel", "arbitrary"),
            vmem_limit_bytes=32 * 1024 * 1024),
    )(flow, od_bf16, graph_bf16, ne, h0, wg, bgc, wx_fh, wx_ne, wh_zr, wh_c, bg)

    if write_fh:
        fh, state = results
        return fh, state
    (state,) = results
    return None, state


# =============================================================================
# Static context learner: tiny MLP over node embeddings -> plain jnp
# (constant over batch and time; not worth a separate pallas_call).
# =============================================================================
def static_context(node_emb, mlp_params):
    y = node_emb
    n = len(mlp_params)
    for j, (w, b) in enumerate(mlp_params):
        y = jnp.dot(y, w) + b
        if j < n - 1:
            y = jnp.maximum(y, 0.0)
    return y


# =============================================================================
# ODDCRNN forward (layer loop is host-side glue; heavy compute in the kernel)
# =============================================================================
def oddcrnn_forward(params, od_flow, init_state, graph, crowd_flow,
                    node_embeddings, K):
    # layer-0 dynamic input: [src | dst] features
    flow = crowd_flow[..., :2]
    # The dynamic OD graph dominates HBM traffic: stream it as bf16 (the MXU
    # consumes bf16 operands anyway); accumulation stays f32 in the kernel.
    od_bf16 = od_flow.astype(jnp.bfloat16)
    graph_bf16 = graph.astype(jnp.bfloat16)

    n_layers = len(params['layers'])
    state = None
    # TODO(synk): consecutive layers could be fused into one kernel (layer i+1
    # consumes layer i's fh at the same timestep), halving od_flow HBM reads;
    # kept as one kernel per layer here for clarity/robustness.
    for li, lp in enumerate(params['layers']):
        ne = static_context(node_embeddings, lp['mlp'])          # (N, Demb)
        w_src, b_src = lp['gconv_src']
        w_dst, b_dst = lp['gconv_dst']
        last = li == n_layers - 1
        fh, state = odcrnn_layer(flow, od_bf16, graph_bf16, ne, init_state[li],
                                 w_src, b_src, w_dst, b_dst,
                                 lp['cell_wx'], lp['cell_wh'], lp['cell_b'], K,
                                 write_fh=not last)
        if not last:
            flow = fh
    return state  # output_hidden[-1]: (B, N, hidden_dim)


# =============================================================================
# Pure-JAX reference (mirrors the PyTorch structure) for the correctness check.
# =============================================================================
def ref_gconv(x, g, w, b):
    x1 = jnp.einsum('nm,bmd->bnd', g, x)
    x2 = jnp.einsum('nm,bmd->bnd', g, x1)
    return (jnp.einsum('bnd,de->bne', x, w[0])
            + jnp.einsum('bnd,de->bne', x1, w[1])
            + jnp.einsum('bnd,de->bne', x2, w[2]) + b)


def ref_cell(od, x, h, wx, wh, b, K):
    eps = 1e-6
    p_fwd = od / (jnp.sum(od, axis=2, keepdims=True) + eps)
    odt = jnp.swapaxes(od, 1, 2)
    p_bwd = odt / (jnp.sum(odt, axis=2, keepdims=True) + eps)

    def diffuse_terms(v):
        terms = [v]
        vk = v
        for _ in range(K):
            vk = jnp.einsum('bnm,bmd->bnd', p_fwd, vk)
            terms.append(vk)
        vk = v
        for _ in range(K):
            vk = jnp.einsum('bnm,bmd->bnd', p_bwd, vk)
            terms.append(vk)
        return terms

    def apply_weights(terms, w):
        return sum(jnp.einsum('bnd,dh->bnh', t, w[k]) for k, t in enumerate(terms))

    x_terms = diffuse_terms(x)
    h_terms = diffuse_terms(h)
    z = jax.nn.sigmoid(apply_weights(x_terms, wx[0]) + apply_weights(h_terms, wh[0]) + b[0])
    r = jax.nn.sigmoid(apply_weights(x_terms, wx[1]) + apply_weights(h_terms, wh[1]) + b[1])
    rh_terms = diffuse_terms(r * h)
    hc = jnp.tanh(apply_weights(x_terms, wx[2]) + apply_weights(rh_terms, wh[2]) + b[2])
    return z * h + (1.0 - z) * hc


def ref_forward(params, od_flow, init_state, graph, crowd_flow,
                node_embeddings, K):
    B, T, N, _ = od_flow.shape
    cur_src = crowd_flow[..., 0:1]
    cur_dst = crowd_flow[..., 1:2]
    ne_b = jnp.broadcast_to(node_embeddings[None], (B,) + node_embeddings.shape)
    state = None
    for li, lp in enumerate(params['layers']):
        ne = ne_b
        n_mlp = len(lp['mlp'])
        for j, (w, bb) in enumerate(lp['mlp']):
            ne = jnp.einsum('bnd,de->bne', ne, w) + bb
            if j < n_mlp - 1:
                ne = jnp.maximum(ne, 0.0)
        state = init_state[li]
        srcs, dsts = [], []
        for t in range(T):
            fh_src = ref_gconv(cur_src[:, t], graph, lp['gconv_src'][0], lp['gconv_src'][1])
            fh_dst = ref_gconv(cur_dst[:, t], graph, lp['gconv_dst'][0], lp['gconv_dst'][1])
            srcs.append(fh_src)
            dsts.append(fh_dst)
            cell_in = jnp.concatenate([fh_src, fh_dst, ne], axis=-1)
            state = ref_cell(od_flow[:, t], cell_in, state,
                             lp['cell_wx'], lp['cell_wh'], lp['cell_b'], K)
        cur_src = jnp.stack(srcs, axis=1)
        cur_dst = jnp.stack(dsts, axis=1)
    return state


# =============================================================================
# Deterministic parameter init (shapes implied by ODDCRNN.__init__)
# =============================================================================
def init_params(key, num_layers, hidden_dim, static_feat_hiddens,
                dynamic_feat_hiddens, K):
    nt = 1 + 2 * K
    node_emb_dim = static_feat_hiddens[-1]
    layers = []
    for i in range(num_layers):
        din = dynamic_feat_hiddens[i][0]
        dout = dynamic_feat_hiddens[i][-1]
        key, k0, k1, k2, k3 = jax.random.split(key, 5)
        gsw = jax.random.normal(k0, (3, din, dout), jnp.float32) * 0.1
        gdw = jax.random.normal(k1, (3, din, dout), jnp.float32) * 0.1
        gsb = jnp.zeros((1, dout), jnp.float32)
        gdb = jnp.zeros((1, dout), jnp.float32)
        mlp = []
        for j in range(len(static_feat_hiddens) - 1):
            key, kk = jax.random.split(key)
            w = jax.random.normal(
                kk, (static_feat_hiddens[j], static_feat_hiddens[j + 1]), jnp.float32) * 0.1
            bb = jnp.zeros((1, static_feat_hiddens[j + 1]), jnp.float32)
            mlp.append((w, bb))
        cell_din = 2 * dout + node_emb_dim
        wx = jax.random.normal(k2, (3, nt, cell_din, hidden_dim), jnp.float32) * 0.1
        wh = jax.random.normal(k3, (3, nt, hidden_dim, hidden_dim), jnp.float32) * 0.1
        cb = jnp.zeros((3, 1, hidden_dim), jnp.float32)
        layers.append(dict(gconv_src=(gsw, gsb), gconv_dst=(gdw, gdb), mlp=mlp,
                           cell_wx=wx, cell_wh=wh, cell_b=cb))
    return dict(layers=layers)


if __name__ == "__main__":
    B, T, N = 2, 4, 16
    hidden_dim = 32
    num_layers = 2
    static_feat_hiddens = [8, 16, 8]
    dynamic_feat_hiddens = [[1, 8], [8, 8]]
    max_diffusion_step = 2

    key = jax.random.PRNGKey(0)
    k1, k2, k3, k4, k5, kp = jax.random.split(key, 6)
    od_flow = jax.nn.relu(jax.random.normal(k1, (B, T, N, N), jnp.float32))
    init_state = jax.random.normal(k2, (num_layers, B, N, hidden_dim), jnp.float32) * 0.1
    graph = jax.nn.softmax(jax.random.normal(k3, (N, N), jnp.float32), axis=-1)
    crowd_flow = jax.random.normal(k4, (B, T, N, 2), jnp.float32)
    node_embeddings = jax.random.normal(k5, (N, static_feat_hiddens[0]), jnp.float32)

    params = init_params(kp, num_layers, hidden_dim, static_feat_hiddens,
                         dynamic_feat_hiddens, max_diffusion_step)

    fwd = jax.jit(oddcrnn_forward, static_argnums=(6,))
    out = fwd(params, od_flow, init_state, graph, crowd_flow,
              node_embeddings, max_diffusion_step)
    out = jax.block_until_ready(out)
    assert out.shape == (B, N, hidden_dim), out.shape

    ref = ref_forward(params, od_flow, init_state, graph, crowd_flow,
                      node_embeddings, max_diffusion_step)
    ref = jax.block_until_ready(ref)
    max_err = float(jnp.max(jnp.abs(out - ref)))
    assert jnp.allclose(out, ref, rtol=5e-2, atol=5e-2), max_err

    print("KERNEL_OK")
</pallas_src>

<mosaic_0001>
module attributes {stable_mosaic.version = 11 : i64} {
  func.func @_odcrnn_layer_kernel(%arg0: i32, %arg1: i32, %arg2: memref<1x4x16x2xf32, #tpu.memory_space<vmem>>, %arg3: memref<1x1x16x16xbf16, #tpu.memory_space<vmem>>, %arg4: memref<16x16xbf16, #tpu.memory_space<vmem>>, %arg5: memref<16x8xf32, #tpu.memory_space<vmem>>, %arg6: memref<1x16x32xf32, #tpu.memory_space<vmem>>, %arg7: memref<3x2x16xbf16, #tpu.memory_space<vmem>>, %arg8: memref<1x16xf32, #tpu.memory_space<vmem>>, %arg9: memref<15x16x32xbf16, #tpu.memory_space<vmem>>, %arg10: memref<15x8x32xbf16, #tpu.memory_space<vmem>>, %arg11: memref<10x32x32xbf16, #tpu.memory_space<vmem>>, %arg12: memref<5x32x32xbf16, #tpu.memory_space<vmem>>, %arg13: memref<3x1x32xf32, #tpu.memory_space<vmem>>, %arg14: memref<1x4x16x16xf32, #tpu.memory_space<vmem>>, %arg15: memref<1x16x32xf32, #tpu.memory_space<vmem>>) attributes {dimension_semantics = [#tpu.dimension_semantics<parallel>, #tpu.dimension_semantics<arbitrary>], iteration_bounds = array<i64: 2, 4>, scalar_prefetch = 0 : i64, scratch_operands = 0 : i64, tpu.core_type = #tpu.core_type<tc>, window_params = [{transform_indices = @transform_0, window_bounds = array<i64: 1, 4, 16, 2>}, {transform_indices = @transform_1, window_bounds = array<i64: 1, 1, 16, 16>}, {pipeline_mode = #tpu.pipeline_mode<synchronous>, transform_indices = @transform_2, window_bounds = array<i64: 16, 16>}, {pipeline_mode = #tpu.pipeline_mode<synchronous>, transform_indices = @transform_3, window_bounds = array<i64: 16, 8>}, {transform_indices = @transform_4, window_bounds = array<i64: 1, 16, 32>}, {pipeline_mode = #tpu.pipeline_mode<synchronous>, transform_indices = @transform_5, window_bounds = array<i64: 3, 2, 16>}, {pipeline_mode = #tpu.pipeline_mode<synchronous>, transform_indices = @transform_6, window_bounds = array<i64: 1, 16>}, {pipeline_mode = #tpu.pipeline_mode<synchronous>, transform_indices = @transform_7, window_bounds = array<i64: 15, 16, 32>}, {pipeline_mode = #tpu.pipeline_mode<synchronous>, transform_indices = @transform_8, window_bounds = array<i64: 15, 8, 32>}, {pipeline_mode = #tpu.pipeline_mode<synchronous>, transform_indices = @transform_9, window_bounds = array<i64: 10, 32, 32>}, {pipeline_mode = #tpu.pipeline_mode<synchronous>, transform_indices = @transform_10, window_bounds = array<i64: 5, 32, 32>}, {pipeline_mode = #tpu.pipeline_mode<synchronous>, transform_indices = @transform_11, window_bounds = array<i64: 3, 1, 32>}, {transform_indices = @transform_12, window_bounds = array<i64: 1, 4, 16, 16>}, {transform_indices = @transform_13, window_bounds = array<i64: 1, 16, 32>}]} {
    %c0 = arith.constant 0 : index
    %c0_0 = arith.constant 0 : index
    %0 = vector.load %arg4[%c0, %c0_0] : memref<16x16xbf16, #tpu.memory_space<vmem>>, vector<16x16xbf16>
    %c0_1 = arith.constant 0 : index
    %1 = arith.index_cast %arg1 : i32 to index
    %c0_2 = arith.constant 0 : index
    %c0_3 = arith.constant 0 : index
    %2 = vector.load %arg2[%c0_1, %1, %c0_2, %c0_3] : memref<1x4x16x2xf32, #tpu.memory_space<vmem>>, vector<1x1x16x2xf32>
    %3 = vector.shape_cast %2 : vector<1x1x16x2xf32> to vector<16x2xf32>
    %4 = arith.truncf %3 : vector<16x2xf32> to vector<16x2xbf16>
    %cst = arith.constant dense<0.000000e+00> : vector<16x2xf32>
    %5 = tpu.matmul %0, %4, %cst {dimension_numbers = #tpu.dot_dimension_numbers<[1], [0], [0], [1], [0, 0, 1, 1], [], []>} : vector<16x16xbf16>, vector<16x2xbf16>, vector<16x2xf32> -> vector<16x2xf32>
    %6 = arith.truncf %5 : vector<16x2xf32> to vector<16x2xbf16>
    %cst_4 = arith.constant dense<0.000000e+00> : vector<16x2xf32>
    %7 = tpu.matmul %0, %6, %cst_4 {dimension_numbers = #tpu.dot_dimension_numbers<[1], [0], [0], [1], [0, 0, 1, 1], [], []>} : vector<16x16xbf16>, vector<16x2xbf16>, vector<16x2xf32> -> vector<16x2xf32>
    %c0_5 = arith.constant 0 : index
    %c0_6 = arith.constant 0 : index
    %c0_7 = arith.constant 0 : index
    %8 = vector.load %arg7[%c0_5, %c0_6, %c0_7] : memref<3x2x16xbf16, #tpu.memory_space<vmem>>, vector<1x2x16xbf16>
    %9 = vector.shape_cast %8 : vector<1x2x16xbf16> to vector<2x16xbf16>
    %10 = arith.truncf %3 : vector<16x2xf32> to vector<16x2xbf16>
    %cst_8 = arith.constant dense<0.000000e+00> : vector<16x16xf32>
    %11 = tpu.matmul %10, %9, %cst_8 {dimension_numbers = #tpu.dot_dimension_numbers<[1], [0], [0], [1], [0, 0, 1, 1], [], []>} : vector<16x2xbf16>, vector<2x16xbf16>, vector<16x16xf32> -> vector<16x16xf32>
    %c1 = arith.constant 1 : index
    %c0_9 = arith.constant 0 : index
    %c0_10 = arith.constant 0 : index
    %12 = vector.load %arg7[%c1, %c0_9, %c0_10] : memref<3x2x16xbf16, #tpu.memory_space<vmem>>, vector<1x2x16xbf16>
    %13 = vector.shape_cast %12 : vector<1x2x16xbf16> to vector<2x16xbf16>
    %14 = arith.truncf %5 : vector<16x2xf32> to vector<16x2xbf16>
    %cst_11 = arith.constant dense<0.000000e+00> : vector<16x16xf32>
    %15 = tpu.matmul %14, %13, %cst_11 {dimension_numbers = #tpu.dot_dimension_numbers<[1], [0], [0], [1], [0, 0, 1, 1], [], []>} : vector<16x2xbf16>, vector<2x16xbf16>, vector<16x16xf32> -> vector<16x16xf32>
    %16 = arith.addf %11, %15 : vector<16x16xf32>
    %c2 = arith.constant 2 : index
    %c0_12 = arith.constant 0 : index
    %c0_13 = arith.constant 0 : index
    %17 = vector.load %arg7[%c2, %c0_12, %c0_13] : memref<3x2x16xbf16, #tpu.memory_space<vmem>>, vector<1x2x16xbf16>
    %18 = vector.shape_cast %17 : vector<1x2x16xbf16> to vector<2x16xbf16>
    %19 = arith.truncf %7 : vector<16x2xf32> to vector<16x2xbf16>
    %cst_14 = arith.constant dense<0.000000e+00> : vector<16x16xf32>
    %20 = tpu.matmul %19, %18, %cst_14 {dimension_numbers = #tpu.dot_dimension_numbers<[1], [0], [0], [1], [0, 0, 1, 1], [], []>} : vector<16x2xbf16>, vector<2x16xbf16>, vector<16x16xf32> -> vector<16x16xf32>
    %21 = arith.addf %16, %20 : vector<16x16xf32>
    %c0_15 = arith.constant 0 : index
    %c0_16 = arith.constant 0 : index
    %22 = vector.load %arg8[%c0_15, %c0_16] : memref<1x16xf32, #tpu.memory_space<vmem>>, vector<1x16xf32>
    %23 = vector.broadcast %22 : vector<1x16xf32> to vector<16x16xf32>
    %24 = arith.addf %21, %23 : vector<16x16xf32>
    %c0_17 = arith.constant 0 : index
    %25 = arith.index_cast %arg1 : i32 to index
    %c0_18 = arith.constant 0 : index
    %c0_19 = arith.constant 0 : index
    %26 = vector.load %arg14[%c0_17, %25, %c0_18, %c0_19] : memref<1x4x16x16xf32, #tpu.memory_space<vmem>>, vector<1x1x16x16xf32>
    %27 = vector.shape_cast %26 : vector<1x1x16x16xf32> to vector<16x16xf32>
    %28 = vector.shape_cast %24 : vector<16x16xf32> to vector<1x1x16x16xf32>
    tpu.vector_store %arg14[%c0_17, %25, %c0_18, %c0_19], %28 {strides = array<i32>} : memref<1x4x16x16xf32, #tpu.memory_space<vmem>>, vector<1x1x16x16xf32>,
    %c0_i32 = arith.constant 0 : i32
    %29 = arith.cmpi eq, %arg1, %c0_i32 : i32
    %30 = arith.extui %29 : i1 to i32
    %c0_i32_20 = arith.constant 0 : i32
    %31 = arith.cmpi ne, %30, %c0_i32_20 : i32
    scf.if %31 {
      %c0_234 = arith.constant 0 : index
      %c0_235 = arith.constant 0 : index
      %c0_236 = arith.constant 0 : index
      %364 = vector.load %arg6[%c0_234, %c0_235, %c0_236] : memref<1x16x32xf32, #tpu.memory_space<vmem>>, vector<1x16x32xf32>
      %c0_237 = arith.constant 0 : index
      %c0_238 = arith.constant 0 : index
      %c0_239 = arith.constant 0 : index
      %365 = vector.load %arg15[%c0_237, %c0_238, %c0_239] : memref<1x16x32xf32, #tpu.memory_space<vmem>>, vector<1x16x32xf32>
      tpu.vector_store %arg15[%c0_237, %c0_238, %c0_239], %364 {strides = array<i32>} : memref<1x16x32xf32, #tpu.memory_space<vmem>>, vector<1x16x32xf32>,
    } else {
    }
    %c0_21 = arith.constant 0 : index
    %c0_22 = arith.constant 0 : index
    %c0_23 = arith.constant 0 : index
    %32 = vector.load %arg15[%c0_21, %c0_22, %c0_23] : memref<1x16x32xf32, #tpu.memory_space<vmem>>, vector<1x16x32xf32>
    %33 = vector.shape_cast %32 : vector<1x16x32xf32> to vector<16x32xf32>
    %c0_24 = arith.constant 0 : index
    %c0_25 = arith.constant 0 : index
    %34 = vector.load %arg5[%c0_24, %c0_25] : memref<16x8xf32, #tpu.memory_space<vmem>>, vector<16x8xf32>
    %c0_26 = arith.constant 0 : index
    %c0_27 = arith.constant 0 : index
    %c0_28 = arith.constant 0 : index
    %c0_29 = arith.constant 0 : index
    %35 = vector.load %arg3[%c0_26, %c0_27, %c0_28, %c0_29] : memref<1x1x16x16xbf16, #tpu.memory_space<vmem>>, vector<1x1x16x16xbf16>
    %36 = vector.shape_cast %35 : vector<1x1x16x16xbf16> to vector<16x16xbf16>
    %cst_30 = arith.constant 1.000000e+00 : bf16
    %37 = vector.broadcast %cst_30 : bf16 to vector<16x1xbf16>
    %cst_31 = arith.constant dense<0.000000e+00> : vector<16x1xf32>
    %38 = tpu.matmul %36, %37, %cst_31 {dimension_numbers = #tpu.dot_dimension_numbers<[1], [0], [0], [1], [0, 0, 1, 1], [], []>} : vector<16x16xbf16>, vector<16x1xbf16>, vector<16x1xf32> -> vector<16x1xf32>
    %cst_32 = arith.constant dense<0.000000e+00> : vector<16x1xf32>
    %39 = tpu.matmul %36, %37, %cst_32 {dimension_numbers = #tpu.dot_dimension_numbers<[0], [0], [1], [1], [0, 1, 1, 1], [], []>} : vector<16x16xbf16>, vector<16x1xbf16>, vector<16x1xf32> -> vector<16x1xf32>
    %cst_33 = arith.constant 9.99999997E-7 : f32
    %40 = vector.broadcast %cst_33 : f32 to vector<16x1xf32>
    %41 = arith.addf %38, %40 : vector<16x1xf32>
    %42 = tpu.reciprocal %41 {approx = true} : vector<16x1xf32> -> vector<16x1xf32>
    %cst_34 = arith.constant 9.99999997E-7 : f32
    %43 = vector.broadcast %cst_34 : f32 to vector<16x1xf32>
    %44 = arith.addf %39, %43 : vector<16x1xf32>
    %45 = tpu.reciprocal %44 {approx = true} : vector<16x1xf32> -> vector<16x1xf32>
    %c0_35 = arith.constant 0 : index
    %c0_36 = arith.constant 0 : index
    %c0_37 = arith.constant 0 : index
    %46 = vector.load %arg9[%c0_35, %c0_36, %c0_37] : memref<15x16x32xbf16, #tpu.memory_space<vmem>>, vector<1x16x32xbf16>
    %47 = vector.shape_cast %46 : vector<1x16x32xbf16> to vector<16x32xbf16>
    %48 = arith.truncf %24 : vector<16x16xf32> to vector<16x16xbf16>
    %cst_38 = arith.constant dense<0.000000e+00> : vector<16x32xf32>
    %49 = tpu.matmul %48, %47, %cst_38 {dimension_numbers = #tpu.dot_dimension_numbers<[1], [0], [0], [1], [0, 0, 1, 1], [], []>} : vector<16x16xbf16>, vector<16x32xbf16>, vector<16x32xf32> -> vector<16x32xf32>
    %c0_39 = arith.constant 0 : index
    %c0_40 = arith.constant 0 : index
    %c0_41 = arith.constant 0 : index
    %50 = vector.load %arg10[%c0_39, %c0_40, %c0_41] : memref<15x8x32xbf16, #tpu.memory_space<vmem>>, vector<1x8x32xbf16>
    %51 = vector.shape_cast %50 : vector<1x8x32xbf16> to vector<8x32xbf16>
    %52 = arith.truncf %34 : vector<16x8xf32> to vector<16x8xbf16>
    %cst_42 = arith.constant dense<0.000000e+00> : vector<16x32xf32>
    %53 = tpu.matmul %52, %51, %cst_42 {dimension_numbers = #tpu.dot_dimension_numbers<[1], [0], [0], [1], [0, 0, 1, 1], [], []>} : vector<16x8xbf16>, vector<8x32xbf16>, vector<16x32xf32> -> vector<16x32xf32>
    %54 = arith.addf %49, %53 : vector<16x32xf32>
    %c1_43 = arith.constant 1 : index
    %c0_44 = arith.constant 0 : index
    %c0_45 = arith.constant 0 : index
    %55 = vector.load %arg9[%c1_43, %c0_44, %c0_45] : memref<15x16x32xbf16, #tpu.memory_space<vmem>>, vector<1x16x32xbf16>
    %56 = vector.shape_cast %55 : vector<1x16x32xbf16> to vector<16x32xbf16>
    %57 = arith.truncf %24 : vector<16x16xf32> to vector<16x16xbf16>
    %cst_46 = arith.constant dense<0.000000e+00> : vector<16x32xf32>
    %58 = tpu.matmul %57, %56, %cst_46 {dimension_numbers = #tpu.dot_dimension_numbers<[1], [0], [0], [1], [0, 0, 1, 1], [], []>} : vector<16x16xbf16>, vector<16x32xbf16>, vector<16x32xf32> -> vector<16x32xf32>
    %c1_47 = arith.constant 1 : index
    %c0_48 = arith.constant 0 : index
    %c0_49 = arith.constant 0 : index
    %59 = vector.load %arg10[%c1_47, %c0_48, %c0_49] : memref<15x8x32xbf16, #tpu.memory_space<vmem>>, vector<1x8x32xbf16>
    %60 = vector.shape_cast %59 : vector<1x8x32xbf16> to vector<8x32xbf16>
    %61 = arith.truncf %34 : vector<16x8xf32> to vector<16x8xbf16>
    %cst_50 = arith.constant dense<0.000000e+00> : vector<16x32xf32>
    %62 = tpu.matmul %61, %60, %cst_50 {dimension_numbers = #tpu.dot_dimension_numbers<[1], [0], [0], [1], [0, 0, 1, 1], [], []>} : vector<16x8xbf16>, vector<8x32xbf16>, vector<16x32xf32> -> vector<16x32xf32>
    %63 = arith.addf %58, %62 : vector<16x32xf32>
    %c2_51 = arith.constant 2 : index
    %c0_52 = arith.constant 0 : index
    %c0_53 = arith.constant 0 : index
    %64 = vector.load %arg9[%c2_51, %c0_52, %c0_53] : memref<15x16x32xbf16, #tpu.memory_space<vmem>>, vector<1x16x32xbf16>
    %65 = vector.shape_cast %64 : vector<1x16x32xbf16> to vector<16x32xbf16>
    %66 = arith.truncf %24 : vector<16x16xf32> to vector<16x16xbf16>
    %cst_54 = arith.constant dense<0.000000e+00> : vector<16x32xf32>
    %67 = tpu.matmul %66, %65, %cst_54 {dimension_numbers = #tpu.dot_dimension_numbers<[1], [0], [0], [1], [0, 0, 1, 1], [], []>} : vector<16x16xbf16>, vector<16x32xbf16>, vector<16x32xf32> -> vector<16x32xf32>
    %c2_55 = arith.constant 2 : index
    %c0_56 = arith.constant 0 : index
    %c0_57 = arith.constant 0 : index
    %68 = vector.load %arg10[%c2_55, %c0_56, %c0_57] : memref<15x8x32xbf16, #tpu.memory_space<vmem>>, vector<1x8x32xbf16>
    %69 = vector.shape_cast %68 : vector<1x8x32xbf16> to vector<8x32xbf16>
    %70 = arith.truncf %34 : vector<16x8xf32> to vector<16x8xbf16>
    %cst_58 = arith.constant dense<0.000000e+00> : vector<16x32xf32>
    %71 = tpu.matmul %70, %69, %cst_58 {dimension_numbers = #tpu.dot_dimension_numbers<[1], [0], [0], [1], [0, 0, 1, 1], [], []>} : vector<16x8xbf16>, vector<8x32xbf16>, vector<16x32xf32> -> vector<16x32xf32>
    %72 = arith.addf %67, %71 : vector<16x32xf32>
    %c0_59 = arith.constant 0 : index
    %c0_60 = arith.constant 0 : index
    %c0_61 = arith.constant 0 : index
    %73 = vector.load %arg11[%c0_59, %c0_60, %c0_61] : memref<10x32x32xbf16, #tpu.memory_space<vmem>>, vector<1x32x32xbf16>
    %74 = vector.shape_cast %73 : vector<1x32x32xbf16> to vector<32x32xbf16>
    %75 = arith.truncf %33 : vector<16x32xf32> to vector<16x32xbf16>
    %cst_62 = arith.constant dense<0.000000e+00> : vector<16x32xf32>
    %76 = tpu.matmul %75, %74, %cst_62 {dimension_numbers = #tpu.dot_dimension_numbers<[1], [0], [0], [1], [0, 0, 1, 1], [], []>} : vector<16x32xbf16>, vector<32x32xbf16>, vector<16x32xf32> -> vector<16x32xf32>
    %c1_63 = arith.constant 1 : index
    %c0_64 = arith.constant 0 : index
    %c0_65 = arith.constant 0 : index
    %77 = vector.load %arg11[%c1_63, %c0_64, %c0_65] : memref<10x32x32xbf16, #tpu.memory_space<vmem>>, vector<1x32x32xbf16>
    %78 = vector.shape_cast %77 : vector<1x32x32xbf16> to vector<32x32xbf16>
    %79 = arith.truncf %33 : vector<16x32xf32> to vector<16x32xbf16>
    %cst_66 = arith.constant dense<0.000000e+00> : vector<16x32xf32>
    %80 = tpu.matmul %79, %78, %cst_66 {dimension_numbers = #tpu.dot_dimension_numbers<[1], [0], [0], [1], [0, 0, 1, 1], [], []>} : vector<16x32xbf16>, vector<32x32xbf16>, vector<16x32xf32> -> vector<16x32xf32>
    %81 = arith.addf %54, %76 : vector<16x32xf32>
    %82 = arith.addf %63, %80 : vector<16x32xf32>
    %83 = arith.truncf %24 : vector<16x16xf32> to vector<16x16xbf16>
    %cst_67 = arith.constant dense<0.000000e+00> : vector<16x16xf32>
    %84 = tpu.matmul %36, %83, %cst_67 {dimension_numbers = #tpu.dot_dimension_numbers<[1], [0], [0], [1], [0, 0, 1, 1], [], []>} : vector<16x16xbf16>, vector<16x16xbf16>, vector<16x16xf32> -> vector<16x16xf32>
    %85 = vector.broadcast %42 : vector<16x1xf32> to vector<16x16xf32>
    %86 = arith.mulf %84, %85 : vector<16x16xf32>
    %87 = arith.truncf %34 : vector<16x8xf32> to vector<16x8xbf16>
    %cst_68 = arith.constant dense<0.000000e+00> : vector<16x8xf32>
    %88 = tpu.matmul %36, %87, %cst_68 {dimension_numbers = #tpu.dot_dimension_numbers<[1], [0], [0], [1], [0, 0, 1, 1], [], []>} : vector<16x16xbf16>, vector<16x8xbf16>, vector<16x8xf32> -> vector<16x8xf32>
    %89 = vector.broadcast %42 : vector<16x1xf32> to vector<16x8xf32>
    %90 = arith.mulf %88, %89 : vector<16x8xf32>
    %91 = arith.truncf %33 : vector<16x32xf32> to vector<16x32xbf16>
    %cst_69 = arith.constant dense<0.000000e+00> : vector<16x32xf32>
    %92 = tpu.matmul %36, %91, %cst_69 {dimension_numbers = #tpu.dot_dimension_numbers<[1], [0], [0], [1], [0, 0, 1, 1], [], []>} : vector<16x16xbf16>, vector<16x32xbf16>, vector<16x32xf32> -> vector<16x32xf32>
    %93 = vector.broadcast %42 : vector<16x1xf32> to vector<16x32xf32>
    %94 = arith.mulf %92, %93 : vector<16x32xf32>
    %c3 = arith.constant 3 : index
    %c0_70 = arith.constant 0 : index
    %c0_71 = arith.constant 0 : index
    %95 = vector.load %arg9[%c3, %c0_70, %c0_71] : memref<15x16x32xbf16, #tpu.memory_space<vmem>>, vector<1x16x32xbf16>
    %96 = vector.shape_cast %95 : vector<1x16x32xbf16> to vector<16x32xbf16>
    %97 = arith.truncf %86 : vector<16x16xf32> to vector<16x16xbf16>
    %cst_72 = arith.constant dense<0.000000e+00> : vector<16x32xf32>
    %98 = tpu.matmul %97, %96, %cst_72 {dimension_numbers = #tpu.dot_dimension_numbers<[1], [0], [0], [1], [0, 0, 1, 1], [], []>} : vector<16x16xbf16>, vector<16x32xbf16>, vector<16x32xf32> -> vector<16x32xf32>
    %c3_73 = arith.constant 3 : index
    %c0_74 = arith.constant 0 : index
    %c0_75 = arith.constant 0 : index
    %99 = vector.load %arg10[%c3_73, %c0_74, %c0_75] : memref<15x8x32xbf16, #tpu.memory_space<vmem>>, vector<1x8x32xbf16>
    %100 = vector.shape_cast %99 : vector<1x8x32xbf16> to vector<8x32xbf16>
    %101 = arith.truncf %90 : vector<16x8xf32> to vector<16x8xbf16>
    %cst_76 = arith.constant dense<0.000000e+00> : vector<16x32xf32>
    %102 = tpu.matmul %101, %100, %cst_76 {dimension_numbers = #tpu.dot_dimension_numbers<[1], [0], [0], [1], [0, 0, 1, 1], [], []>} : vector<16x8xbf16>, vector<8x32xbf16>, vector<16x32xf32> -> vector<16x32xf32>
    %103 = arith.addf %98, %102 : vector<16x32xf32>
    %c4 = arith.constant 4 : index
    %c0_77 = arith.constant 0 : index
    %c0_78 = arith.constant 0 : index
    %104 = vector.load %arg9[%c4, %c0_77, %c0_78] : memref<15x16x32xbf16, #tpu.memory_space<vmem>>, vector<1x16x32xbf16>
    %105 = vector.shape_cast %104 : vector<1x16x32xbf16> to vector<16x32xbf16>
    %106 = arith.truncf %86 : vector<16x16xf32> to vector<16x16xbf16>
    %cst_79 = arith.constant dense<0.000000e+00> : vector<16x32xf32>
    %107 = tpu.matmul %106, %105, %cst_79 {dimension_numbers = #tpu.dot_dimension_numbers<[1], [0], [0], [1], [0, 0, 1, 1], [], []>} : vector<16x16xbf16>, vector<16x32xbf16>, vector<16x32xf32> -> vector<16x32xf32>
    %c4_80 = arith.constant 4 : index
    %c0_81 = arith.constant 0 : index
    %c0_82 = arith.constant 0 : index
    %108 = vector.load %arg10[%c4_80, %c0_81, %c0_82] : memref<15x8x32xbf16, #tpu.memory_space<vmem>>, vector<1x8x32xbf16>
    %109 = vector.shape_cast %108 : vector<1x8x32xbf16> to vector<8x32xbf16>
    %110 = arith.truncf %90 : vector<16x8xf32> to vector<16x8xbf16>
    %cst_83 = arith.constant dense<0.000000e+00> : vector<16x32xf32>
    %111 = tpu.matmul %110, %109, %cst_83 {dimension_numbers = #tpu.dot_dimension_numbers<[1], [0], [0], [1], [0, 0, 1, 1], [], []>} : vector<16x8xbf16>, vector<8x32xbf16>, vector<16x32xf32> -> vector<16x32xf32>
    %112 = arith.addf %107, %111 : vector<16x32xf32>
    %c5 = arith.constant 5 : index
    %c0_84 = arith.constant 0 : index
    %c0_85 = arith.constant 0 : index
    %113 = vector.load %arg9[%c5, %c0_84, %c0_85] : memref<15x16x32xbf16, #tpu.memory_space<vmem>>, vector<1x16x32xbf16>
    %114 = vector.shape_cast %113 : vector<1x16x32xbf16> to vector<16x32xbf16>
    %115 = arith.truncf %86 : vector<16x16xf32> to vector<16x16xbf16>
    %cst_86 = arith.constant dense<0.000000e+00> : vector<16x32xf32>
    %116 = tpu.matmul %115, %114, %cst_86 {dimension_numbers = #tpu.dot_dimension_numbers<[1], [0], [0], [1], [0, 0, 1, 1], [], []>} : vector<16x16xbf16>, vector<16x32xbf16>, vector<16x32xf32> -> vector<16x32xf32>
    %c5_87 = arith.constant 5 : index
    %c0_88 = arith.constant 0 : index
    %c0_89 = arith.constant 0 : index
    %117 = vector.load %arg10[%c5_87, %c0_88, %c0_89] : memref<15x8x32xbf16, #tpu.memory_space<vmem>>, vector<1x8x32xbf16>
    %118 = vector.shape_cast %117 : vector<1x8x32xbf16> to vector<8x32xbf16>
    %119 = arith.truncf %90 : vector<16x8xf32> to vector<16x8xbf16>
    %cst_90 = arith.constant dense<0.000000e+00> : vector<16x32xf32>
    %120 = tpu.matmul %119, %118, %cst_90 {dimension_numbers = #tpu.dot_dimension_numbers<[1], [0], [0], [1], [0, 0, 1, 1], [], []>} : vector<16x8xbf16>, vector<8x32xbf16>, vector<16x32xf32> -> vector<16x32xf32>
    %121 = arith.addf %116, %120 : vector<16x32xf32>
    %c2_91 = arith.constant 2 : index
    %c0_92 = arith.constant 0 : index
    %c0_93 = arith.constant 0 : index
    %122 = vector.load %arg11[%c2_91, %c0_92, %c0_93] : memref<10x32x32xbf16, #tpu.memory_space<vmem>>, vector<1x32x32xbf16>
    %123 = vector.shape_cast %122 : vector<1x32x32xbf16> to vector<32x32xbf16>
    %124 = arith.truncf %94 : vector<16x32xf32> to vector<16x32xbf16>
    %cst_94 = arith.constant dense<0.000000e+00> : vector<16x32xf32>
    %125 = tpu.matmul %124, %123, %cst_94 {dimension_numbers = #tpu.dot_dimension_numbers<[1], [0], [0], [1], [0, 0, 1, 1], [], []>} : vector<16x32xbf16>, vector<32x32xbf16>, vector<16x32xf32> -> vector<16x32xf32>
    %c3_95 = arith.constant 3 : index
    %c0_96 = arith.constant 0 : index
    %c0_97 = arith.constant 0 : index
    %126 = vector.load %arg11[%c3_95, %c0_96, %c0_97] : memref<10x32x32xbf16, #tpu.memory_space<vmem>>, vector<1x32x32xbf16>
    %127 = vector.shape_cast %126 : vector<1x32x32xbf16> to vector<32x32xbf16>
    %128 = arith.truncf %94 : vector<16x32xf32> to vector<16x32xbf16>
    %cst_98 = arith.constant dense<0.000000e+00> : vector<16x32xf32>
    %129 = tpu.matmul %128, %127, %cst_98 {dimension_numbers = #tpu.dot_dimension_numbers<[1], [0], [0], [1], [0, 0, 1, 1], [], []>} : vector<16x32xbf16>, vector<32x32xbf16>, vector<16x32xf32> -> vector<16x32xf32>
    %130 = arith.addf %103, %125 : vector<16x32xf32>
    %131 = arith.addf %81, %130 : vector<16x32xf32>
    %132 = arith.addf %112, %129 : vector<16x32xf32>
    %133 = arith.addf %82, %132 : vector<16x32xf32>
    %134 = arith.addf %72, %121 : vector<16x32xf32>
    %135 = arith.truncf %86 : vector<16x16xf32> to vector<16x16xbf16>
    %cst_99 = arith.constant dense<0.000000e+00> : vector<16x16xf32>
    %136 = tpu.matmul %36, %135, %cst_99 {dimension_numbers = #tpu.dot_dimension_numbers<[1], [0], [0], [1], [0, 0, 1, 1], [], []>} : vector<16x16xbf16>, vector<16x16xbf16>, vector<16x16xf32> -> vector<16x16xf32>
    %137 = vector.broadcast %42 : vector<16x1xf32> to vector<16x16xf32>
    %138 = arith.mulf %136, %137 : vector<16x16xf32>
    %139 = arith.truncf %90 : vector<16x8xf32> to vector<16x8xbf16>
    %cst_100 = arith.constant dense<0.000000e+00> : vector<16x8xf32>
    %140 = tpu.matmul %36, %139, %cst_100 {dimension_numbers = #tpu.dot_dimension_numbers<[1], [0], [0], [1], [0, 0, 1, 1], [], []>} : vector<16x16xbf16>, vector<16x8xbf16>, vector<16x8xf32> -> vector<16x8xf32>
    %141 = vector.broadcast %42 : vector<16x1xf32> to vector<16x8xf32>
    %142 = arith.mulf %140, %141 : vector<16x8xf32>
    %143 = arith.truncf %94 : vector<16x32xf32> to vector<16x32xbf16>
    %cst_101 = arith.constant dense<0.000000e+00> : vector<16x32xf32>
    %144 = tpu.matmul %36, %143, %cst_101 {dimension_numbers = #tpu.dot_dimension_numbers<[1], [0], [0], [1], [0, 0, 1, 1], [], []>} : vector<16x16xbf16>, vector<16x32xbf16>, vector<16x32xf32> -> vector<16x32xf32>
    %145 = vector.broadcast %42 : vector<16x1xf32> to vector<16x32xf32>
    %146 = arith.mulf %144, %145 : vector<16x32xf32>
    %c6 = arith.constant 6 : index
    %c0_102 = arith.constant 0 : index
    %c0_103 = arith.constant 0 : index
    %147 = vector.load %arg9[%c6, %c0_102, %c0_103] : memref<15x16x32xbf16, #tpu.memory_space<vmem>>, vector<1x16x32xbf16>
    %148 = vector.shape_cast %147 : vector<1x16x32xbf16> to vector<16x32xbf16>
    %149 = arith.truncf %138 : vector<16x16xf32> to vector<16x16xbf16>
    %cst_104 = arith.constant dense<0.000000e+00> : vector<16x32xf32>
    %150 = tpu.matmul %149, %148, %cst_104 {dimension_numbers = #tpu.dot_dimension_numbers<[1], [0], [0], [1], [0, 0, 1, 1], [], []>} : vector<16x16xbf16>, vector<16x32xbf16>, vector<16x32xf32> -> vector<16x32xf32>
    %c6_105 = arith.constant 6 : index
    %c0_106 = arith.constant 0 : index
    %c0_107 = arith.constant 0 : index
    %151 = vector.load %arg10[%c6_105, %c0_106, %c0_107] : memref<15x8x32xbf16, #tpu.memory_space<vmem>>, vector<1x8x32xbf16>
    %152 = vector.shape_cast %151 : vector<1x8x32xbf16> to vector<8x32xbf16>
    %153 = arith.truncf %142 : vector<16x8xf32> to vector<16x8xbf16>
    %cst_108 = arith.constant dense<0.000000e+00> : vector<16x32xf32>
    %154 = tpu.matmul %153, %152, %cst_108 {dimension_numbers = #tpu.dot_dimension_numbers<[1], [0], [0], [1], [0, 0, 1, 1], [], []>} : vector<16x8xbf16>, vector<8x32xbf16>, vector<16x32xf32> -> vector<16x32xf32>
    %155 = arith.addf %150, %154 : vector<16x32xf32>
    %c7 = arith.constant 7 : index
    %c0_109 = arith.constant 0 : index
    %c0_110 = arith.constant 0 : index
    %156 = vector.load %arg9[%c7, %c0_109, %c0_110] : memref<15x16x32xbf16, #tpu.memory_space<vmem>>, vector<1x16x32xbf16>
    %157 = vector.shape_cast %156 : vector<1x16x32xbf16> to vector<16x32xbf16>
    %158 = arith.truncf %138 : vector<16x16xf32> to vector<16x16xbf16>
    %cst_111 = arith.constant dense<0.000000e+00> : vector<16x32xf32>
    %159 = tpu.matmul %158, %157, %cst_111 {dimension_numbers = #tpu.dot_dimension_numbers<[1], [0], [0], [1], [0, 0, 1, 1], [], []>} : vector<16x16xbf16>, vector<16x32xbf16>, vector<16x32xf32> -> vector<16x32xf32>
    %c7_112 = arith.constant 7 : index
    %c0_113 = arith.constant 0 : index
    %c0_114 = arith.constant 0 : index
    %160 = vector.load %arg10[%c7_112, %c0_113, %c0_114] : memref<15x8x32xbf16, #tpu.memory_space<vmem>>, vector<1x8x32xbf16>
    %161 = vector.shape_cast %160 : vector<1x8x32xbf16> to vector<8x32xbf16>
    %162 = arith.truncf %142 : vector<16x8xf32> to vector<16x8xbf16>
    %cst_115 = arith.constant dense<0.000000e+00> : vector<16x32xf32>
    %163 = tpu.matmul %162, %161, %cst_115 {dimension_numbers = #tpu.dot_dimension_numbers<[1], [0], [0], [1], [0, 0, 1, 1], [], []>} : vector<16x8xbf16>, vector<8x32xbf16>, vector<16x32xf32> -> vector<16x32xf32>
    %164 = arith.addf %159, %163 : vector<16x32xf32>
    %c8 = arith.constant 8 : index
    %c0_116 = arith.constant 0 : index
    %c0_117 = arith.constant 0 : index
    %165 = vector.load %arg9[%c8, %c0_116, %c0_117] : memref<15x16x32xbf16, #tpu.memory_space<vmem>>, vector<1x16x32xbf16>
    %166 = vector.shape_cast %165 : vector<1x16x32xbf16> to vector<16x32xbf16>
    %167 = arith.truncf %138 : vector<16x16xf32> to vector<16x16xbf16>
    %cst_118 = arith.constant dense<0.000000e+00> : vector<16x32xf32>
    %168 = tpu.matmul %167, %166, %cst_118 {dimension_numbers = #tpu.dot_dimension_numbers<[1], [0], [0], [1], [0, 0, 1, 1], [], []>} : vector<16x16xbf16>, vector<16x32xbf16>, vector<16x32xf32> -> vector<16x32xf32>
    %c8_119 = arith.constant 8 : index
    %c0_120 = arith.constant 0 : index
    %c0_121 = arith.constant 0 : index
    %169 = vector.load %arg10[%c8_119, %c0_120, %c0_121] : memref<15x8x32xbf16, #tpu.memory_space<vmem>>, vector<1x8x32xbf16>
    %170 = vector.shape_cast %169 : vector<1x8x32xbf16> to vector<8x32xbf16>
    %171 = arith.truncf %142 : vector<16x8xf32> to vector<16x8xbf16>
    %cst_122 = arith.constant dense<0.000000e+00> : vector<16x32xf32>
    %172 = tpu.matmul %171, %170, %cst_122 {dimension_numbers = #tpu.dot_dimension_numbers<[1], [0], [0], [1], [0, 0, 1, 1], [], []>} : vector<16x8xbf16>, vector<8x32xbf16>, vector<16x32xf32> -> vector<16x32xf32>
    %173 = arith.addf %168, %172 : vector<16x32xf32>
    %c4_123 = arith.constant 4 : index
    %c0_124 = arith.constant 0 : index
    %c0_125 = arith.constant 0 : index
    %174 = vector.load %arg11[%c4_123, %c0_124, %c0_125] : memref<10x32x32xbf16, #tpu.memory_space<vmem>>, vector<1x32x32xbf16>
    %175 = vector.shape_cast %174 : vector<1x32x32xbf16> to vector<32x32xbf16>
    %176 = arith.truncf %146 : vector<16x32xf32> to vector<16x32xbf16>
    %cst_126 = arith.constant dense<0.000000e+00> : vector<16x32xf32>
    %177 = tpu.matmul %176, %175, %cst_126 {dimension_numbers = #tpu.dot_dimension_numbers<[1], [0], [0], [1], [0, 0, 1, 1], [], []>} : vector<16x32xbf16>, vector<32x32xbf16>, vector<16x32xf32> -> vector<16x32xf32>
    %c5_127 = arith.constant 5 : index
    %c0_128 = arith.constant 0 : index
    %c0_129 = arith.constant 0 : index
    %178 = vector.load %arg11[%c5_127, %c0_128, %c0_129] : memref<10x32x32xbf16, #tpu.memory_space<vmem>>, vector<1x32x32xbf16>
    %179 = vector.shape_cast %178 : vector<1x32x32xbf16> to vector<32x32xbf16>
    %180 = arith.truncf %146 : vector<16x32xf32> to vector<16x32xbf16>
    %cst_130 = arith.constant dense<0.000000e+00> : vector<16x32xf32>
    %181 = tpu.matmul %180, %179, %cst_130 {dimension_numbers = #tpu.dot_dimension_numbers<[1], [0], [0], [1], [0, 0, 1, 1], [], []>} : vector<16x32xbf16>, vector<32x32xbf16>, vector<16x32xf32> -> vector<16x32xf32>
    %182 = arith.addf %155, %177 : vector<16x32xf32>
    %183 = arith.addf %131, %182 : vector<16x32xf32>
    %184 = arith.addf %164, %181 : vector<16x32xf32>
    %185 = arith.addf %133, %184 : vector<16x32xf32>
    %186 = arith.addf %134, %173 : vector<16x32xf32>
    %187 = arith.truncf %24 : vector<16x16xf32> to vector<16x16xbf16>
    %cst_131 = arith.constant dense<0.000000e+00> : vector<16x16xf32>
    %188 = tpu.matmul %36, %187, %cst_131 {dimension_numbers = #tpu.dot_dimension_numbers<[0], [0], [1], [1], [0, 1, 1, 1], [], []>} : vector<16x16xbf16>, vector<16x16xbf16>, vector<16x16xf32> -> vector<16x16xf32>
    %189 = vector.broadcast %45 : vector<16x1xf32> to vector<16x16xf32>
    %190 = arith.mulf %188, %189 : vector<16x16xf32>
    %191 = arith.truncf %34 : vector<16x8xf32> to vector<16x8xbf16>
    %cst_132 = arith.constant dense<0.000000e+00> : vector<16x8xf32>
    %192 = tpu.matmul %36, %191, %cst_132 {dimension_numbers = #tpu.dot_dimension_numbers<[0], [0], [1], [1], [0, 1, 1, 1], [], []>} : vector<16x16xbf16>, vector<16x8xbf16>, vector<16x8xf32> -> vector<16x8xf32>
    %193 = vector.broadcast %45 : vector<16x1xf32> to vector<16x8xf32>
    %194 = arith.mulf %192, %193 : vector<16x8xf32>
    %195 = arith.truncf %33 : vector<16x32xf32> to vector<16x32xbf16>
    %cst_133 = arith.constant dense<0.000000e+00> : vector<16x32xf32>
    %196 = tpu.matmul %36, %195, %cst_133 {dimension_numbers = #tpu.dot_dimension_numbers<[0], [0], [1], [1], [0, 1, 1, 1], [], []>} : vector<16x16xbf16>, vector<16x32xbf16>, vector<16x32xf32> -> vector<16x32xf32>
    %197 = vector.broadcast %45 : vector<16x1xf32> to vector<16x32xf32>
    %198 = arith.mulf %196, %197 : vector<16x32xf32>
    %c9 = arith.constant 9 : index
    %c0_134 = arith.constant 0 : index
    %c0_135 = arith.constant 0 : index
    %199 = vector.load %arg9[%c9, %c0_134, %c0_135] : memref<15x16x32xbf16, #tpu.memory_space<vmem>>, vector<1x16x32xbf16>
    %200 = vector.shape_cast %199 : vector<1x16x32xbf16> to vector<16x32xbf16>
    %201 = arith.truncf %190 : vector<16x16xf32> to vector<16x16xbf16>
    %cst_136 = arith.constant dense<0.000000e+00> : vector<16x32xf32>
    %202 = tpu.matmul %201, %200, %cst_136 {dimension_numbers = #tpu.dot_dimension_numbers<[1], [0], [0], [1], [0, 0, 1, 1], [], []>} : vector<16x16xbf16>, vector<16x32xbf16>, vector<16x32xf32> -> vector<16x32xf32>
    %c9_137 = arith.constant 9 : index
    %c0_138 = arith.constant 0 : index
    %c0_139 = arith.constant 0 : index
    %203 = vector.load %arg10[%c9_137, %c0_138, %c0_139] : memref<15x8x32xbf16, #tpu.memory_space<vmem>>, vector<1x8x32xbf16>
    %204 = vector.shape_cast %203 : vector<1x8x32xbf16> to vector<8x32xbf16>
    %205 = arith.truncf %194 : vector<16x8xf32> to vector<16x8xbf16>
    %cst_140 = arith.constant dense<0.000000e+00> : vector<16x32xf32>
    %206 = tpu.matmul %205, %204, %cst_140 {dimension_numbers = #tpu.dot_dimension_numbers<[1], [0], [0], [1], [0, 0, 1, 1], [], []>} : vector<16x8xbf16>, vector<8x32xbf16>, vector<16x32xf32> -> vector<16x32xf32>
    %207 = arith.addf %202, %206 : vector<16x32xf32>
    %c10 = arith.constant 10 : index
    %c0_141 = arith.constant 0 : index
    %c0_142 = arith.constant 0 : index
    %208 = vector.load %arg9[%c10, %c0_141, %c0_142] : memref<15x16x32xbf16, #tpu.memory_space<vmem>>, vector<1x16x32xbf16>
    %209 = vector.shape_cast %208 : vector<1x16x32xbf16> to vector<16x32xbf16>
    %210 = arith.truncf %190 : vector<16x16xf32> to vector<16x16xbf16>
    %cst_143 = arith.constant dense<0.000000e+00> : vector<16x32xf32>
    %211 = tpu.matmul %210, %209, %cst_143 {dimension_numbers = #tpu.dot_dimension_numbers<[1], [0], [0], [1], [0, 0, 1, 1], [], []>} : vector<16x16xbf16>, vector<16x32xbf16>, vector<16x32xf32> -> vector<16x32xf32>
    %c10_144 = arith.constant 10 : index
    %c0_145 = arith.constant 0 : index
    %c0_146 = arith.constant 0 : index
    %212 = vector.load %arg10[%c10_144, %c0_145, %c0_146] : memref<15x8x32xbf16, #tpu.memory_space<vmem>>, vector<1x8x32xbf16>
    %213 = vector.shape_cast %212 : vector<1x8x32xbf16> to vector<8x32xbf16>
    %214 = arith.truncf %194 : vector<16x8xf32> to vector<16x8xbf16>
    %cst_147 = arith.constant dense<0.000000e+00> : vector<16x32xf32>
    %215 = tpu.matmul %214, %213, %cst_147 {dimension_numbers = #tpu.dot_dimension_numbers<[1], [0], [0], [1], [0, 0, 1, 1], [], []>} : vector<16x8xbf16>, vector<8x32xbf16>, vector<16x32xf32> -> vector<16x32xf32>
    %216 = arith.addf %211, %215 : vector<16x32xf32>
    %c11 = arith.constant 11 : index
    %c0_148 = arith.constant 0 : index
    %c0_149 = arith.constant 0 : index
    %217 = vector.load %arg9[%c11, %c0_148, %c0_149] : memref<15x16x32xbf16, #tpu.memory_space<vmem>>, vector<1x16x32xbf16>
    %218 = vector.shape_cast %217 : vector<1x16x32xbf16> to vector<16x32xbf16>
    %219 = arith.truncf %190 : vector<16x16xf32> to vector<16x16xbf16>
    %cst_150 = arith.constant dense<0.000000e+00> : vector<16x32xf32>
    %220 = tpu.matmul %219, %218, %cst_150 {dimension_numbers = #tpu.dot_dimension_numbers<[1], [0], [0], [1], [0, 0, 1, 1], [], []>} : vector<16x16xbf16>, vector<16x32xbf16>, vector<16x32xf32> -> vector<16x32xf32>
    %c11_151 = arith.constant 11 : index
    %c0_152 = arith.constant 0 : index
    %c0_153 = arith.constant 0 : index
    %221 = vector.load %arg10[%c11_151, %c0_152, %c0_153] : memref<15x8x32xbf16, #tpu.memory_space<vmem>>, vector<1x8x32xbf16>
    %222 = vector.shape_cast %221 : vector<1x8x32xbf16> to vector<8x32xbf16>
    %223 = arith.truncf %194 : vector<16x8xf32> to vector<16x8xbf16>
    %cst_154 = arith.constant dense<0.000000e+00> : vector<16x32xf32>
    %224 = tpu.matmul %223, %222, %cst_154 {dimension_numbers = #tpu.dot_dimension_numbers<[1], [0], [0], [1], [0, 0, 1, 1], [], []>} : vector<16x8xbf16>, vector<8x32xbf16>, vector<16x32xf32> -> vector<16x32xf32>
    %225 = arith.addf %220, %224 : vector<16x32xf32>
    %c6_155 = arith.constant 6 : index
    %c0_156 = arith.constant 0 : index
    %c0_157 = arith.constant 0 : index
    %226 = vector.load %arg11[%c6_155, %c0_156, %c0_157] : memref<10x32x32xbf16, #tpu.memory_space<vmem>>, vector<1x32x32xbf16>
    %227 = vector.shape_cast %226 : vector<1x32x32xbf16> to vector<32x32xbf16>
    %228 = arith.truncf %198 : vector<16x32xf32> to vector<16x32xbf16>
    %cst_158 = arith.constant dense<0.000000e+00> : vector<16x32xf32>
    %229 = tpu.matmul %228, %227, %cst_158 {dimension_numbers = #tpu.dot_dimension_numbers<[1], [0], [0], [1], [0, 0, 1, 1], [], []>} : vector<16x32xbf16>, vector<32x32xbf16>, vector<16x32xf32> -> vector<16x32xf32>
    %c7_159 = arith.constant 7 : index
    %c0_160 = arith.constant 0 : index
    %c0_161 = arith.constant 0 : index
    %230 = vector.load %arg11[%c7_159, %c0_160, %c0_161] : memref<10x32x32xbf16, #tpu.memory_space<vmem>>, vector<1x32x32xbf16>
    %231 = vector.shape_cast %230 : vector<1x32x32xbf16> to vector<32x32xbf16>
    %232 = arith.truncf %198 : vector<16x32xf32> to vector<16x32xbf16>
    %cst_162 = arith.constant dense<0.000000e+00> : vector<16x32xf32>
    %233 = tpu.matmul %232, %231, %cst_162 {dimension_numbers = #tpu.dot_dimension_numbers<[1], [0], [0], [1], [0, 0, 1, 1], [], []>} : vector<16x32xbf16>, vector<32x32xbf16>, vector<16x32xf32> -> vector<16x32xf32>
    %234 = arith.addf %207, %229 : vector<16x32xf32>
    %235 = arith.addf %183, %234 : vector<16x32xf32>
    %236 = arith.addf %216, %233 : vector<16x32xf32>
    %237 = arith.addf %185, %236 : vector<16x32xf32>
    %238 = arith.addf %186, %225 : vector<16x32xf32>
    %239 = arith.truncf %190 : vector<16x16xf32> to vector<16x16xbf16>
    %cst_163 = arith.constant dense<0.000000e+00> : vector<16x16xf32>
    %240 = tpu.matmul %36, %239, %cst_163 {dimension_numbers = #tpu.dot_dimension_numbers<[0], [0], [1], [1], [0, 1, 1, 1], [], []>} : vector<16x16xbf16>, vector<16x16xbf16>, vector<16x16xf32> -> vector<16x16xf32>
    %241 = vector.broadcast %45 : vector<16x1xf32> to vector<16x16xf32>
    %242 = arith.mulf %240, %241 : vector<16x16xf32>
    %243 = arith.truncf %194 : vector<16x8xf32> to vector<16x8xbf16>
    %cst_164 = arith.constant dense<0.000000e+00> : vector<16x8xf32>
    %244 = tpu.matmul %36, %243, %cst_164 {dimension_numbers = #tpu.dot_dimension_numbers<[0], [0], [1], [1], [0, 1, 1, 1], [], []>} : vector<16x16xbf16>, vector<16x8xbf16>, vector<16x8xf32> -> vector<16x8xf32>
    %245 = vector.broadcast %45 : vector<16x1xf32> to vector<16x8xf32>
    %246 = arith.mulf %244, %245 : vector<16x8xf32>
    %247 = arith.truncf %198 : vector<16x32xf32> to vector<16x32xbf16>
    %cst_165 = arith.constant dense<0.000000e+00> : vector<16x32xf32>
    %248 = tpu.matmul %36, %247, %cst_165 {dimension_numbers = #tpu.dot_dimension_numbers<[0], [0], [1], [1], [0, 1, 1, 1], [], []>} : vector<16x16xbf16>, vector<16x32xbf16>, vector<16x32xf32> -> vector<16x32xf32>
    %249 = vector.broadcast %45 : vector<16x1xf32> to vector<16x32xf32>
    %250 = arith.mulf %248, %249 : vector<16x32xf32>
    %c12 = arith.constant 12 : index
    %c0_166 = arith.constant 0 : index
    %c0_167 = arith.constant 0 : index
    %251 = vector.load %arg9[%c12, %c0_166, %c0_167] : memref<15x16x32xbf16, #tpu.memory_space<vmem>>, vector<1x16x32xbf16>
    %252 = vector.shape_cast %251 : vector<1x16x32xbf16> to vector<16x32xbf16>
    %253 = arith.truncf %242 : vector<16x16xf32> to vector<16x16xbf16>
    %cst_168 = arith.constant dense<0.000000e+00> : vector<16x32xf32>
    %254 = tpu.matmul %253, %252, %cst_168 {dimension_numbers = #tpu.dot_dimension_numbers<[1], [0], [0], [1], [0, 0, 1, 1], [], []>} : vector<16x16xbf16>, vector<16x32xbf16>, vector<16x32xf32> -> vector<16x32xf32>
    %c12_169 = arith.constant 12 : index
    %c0_170 = arith.constant 0 : index
    %c0_171 = arith.constant 0 : index
    %255 = vector.load %arg10[%c12_169, %c0_170, %c0_171] : memref<15x8x32xbf16, #tpu.memory_space<vmem>>, vector<1x8x32xbf16>
    %256 = vector.shape_cast %255 : vector<1x8x32xbf16> to vector<8x32xbf16>
    %257 = arith.truncf %246 : vector<16x8xf32> to vector<16x8xbf16>
    %cst_172 = arith.constant dense<0.000000e+00> : vector<16x32xf32>
    %258 = tpu.matmul %257, %256, %cst_172 {dimension_numbers = #tpu.dot_dimension_numbers<[1], [0], [0], [1], [0, 0, 1, 1], [], []>} : vector<16x8xbf16>, vector<8x32xbf16>, vector<16x32xf32> -> vector<16x32xf32>
    %259 = arith.addf %254, %258 : vector<16x32xf32>
    %c13 = arith.constant 13 : index
    %c0_173 = arith.constant 0 : index
    %c0_174 = arith.constant 0 : index
    %260 = vector.load %arg9[%c13, %c0_173, %c0_174] : memref<15x16x32xbf16, #tpu.memory_space<vmem>>, vector<1x16x32xbf16>
    %261 = vector.shape_cast %260 : vector<1x16x32xbf16> to vector<16x32xbf16>
    %262 = arith.truncf %242 : vector<16x16xf32> to vector<16x16xbf16>
    %cst_175 = arith.constant dense<0.000000e+00> : vector<16x32xf32>
    %263 = tpu.matmul %262, %261, %cst_175 {dimension_numbers = #tpu.dot_dimension_numbers<[1], [0], [0], [1], [0, 0, 1, 1], [], []>} : vector<16x16xbf16>, vector<16x32xbf16>, vector<16x32xf32> -> vector<16x32xf32>
    %c13_176 = arith.constant 13 : index
    %c0_177 = arith.constant 0 : index
    %c0_178 = arith.constant 0 : index
    %264 = vector.load %arg10[%c13_176, %c0_177, %c0_178] : memref<15x8x32xbf16, #tpu.memory_space<vmem>>, vector<1x8x32xbf16>
    %265 = vector.shape_cast %264 : vector<1x8x32xbf16> to vector<8x32xbf16>
    %266 = arith.truncf %246 : vector<16x8xf32> to vector<16x8xbf16>
    %cst_179 = arith.constant dense<0.000000e+00> : vector<16x32xf32>
    %267 = tpu.matmul %266, %265, %cst_179 {dimension_numbers = #tpu.dot_dimension_numbers<[1], [0], [0], [1], [0, 0, 1, 1], [], []>} : vector<16x8xbf16>, vector<8x32xbf16>, vector<16x32xf32> -> vector<16x32xf32>
    %268 = arith.addf %263, %267 : vector<16x32xf32>
    %c14 = arith.constant 14 : index
    %c0_180 = arith.constant 0 : index
    %c0_181 = arith.constant 0 : index
    %269 = vector.load %arg9[%c14, %c0_180, %c0_181] : memref<15x16x32xbf16, #tpu.memory_space<vmem>>, vector<1x16x32xbf16>
    %270 = vector.shape_cast %269 : vector<1x16x32xbf16> to vector<16x32xbf16>
    %271 = arith.truncf %242 : vector<16x16xf32> to vector<16x16xbf16>
    %cst_182 = arith.constant dense<0.000000e+00> : vector<16x32xf32>
    %272 = tpu.matmul %271, %270, %cst_182 {dimension_numbers = #tpu.dot_dimension_numbers<[1], [0], [0], [1], [0, 0, 1, 1], [], []>} : vector<16x16xbf16>, vector<16x32xbf16>, vector<16x32xf32> -> vector<16x32xf32>
    %c14_183 = arith.constant 14 : index
    %c0_184 = arith.constant 0 : index
    %c0_185 = arith.constant 0 : index
    %273 = vector.load %arg10[%c14_183, %c0_184, %c0_185] : memref<15x8x32xbf16, #tpu.memory_space<vmem>>, vector<1x8x32xbf16>
    %274 = vector.shape_cast %273 : vector<1x8x32xbf16> to vector<8x32xbf16>
    %275 = arith.truncf %246 : vector<16x8xf32> to vector<16x8xbf16>
    %cst_186 = arith.constant dense<0.000000e+00> : vector<16x32xf32>
    %276 = tpu.matmul %275, %274, %cst_186 {dimension_numbers = #tpu.dot_dimension_numbers<[1], [0], [0], [1], [0, 0, 1, 1], [], []>} : vector<16x8xbf16>, vector<8x32xbf16>, vector<16x32xf32> -> vector<16x32xf32>
    %277 = arith.addf %272, %276 : vector<16x32xf32>
    %c8_187 = arith.constant 8 : index
    %c0_188 = arith.constant 0 : index
    %c0_189 = arith.constant 0 : index
    %278 = vector.load %arg11[%c8_187, %c0_188, %c0_189] : memref<10x32x32xbf16, #tpu.memory_space<vmem>>, vector<1x32x32xbf16>
    %279 = vector.shape_cast %278 : vector<1x32x32xbf16> to vector<32x32xbf16>
    %280 = arith.truncf %250 : vector<16x32xf32> to vector<16x32xbf16>
    %cst_190 = arith.constant dense<0.000000e+00> : vector<16x32xf32>
    %281 = tpu.matmul %280, %279, %cst_190 {dimension_numbers = #tpu.dot_dimension_numbers<[1], [0], [0], [1], [0, 0, 1, 1], [], []>} : vector<16x32xbf16>, vector<32x32xbf16>, vector<16x32xf32> -> vector<16x32xf32>
    %c9_191 = arith.constant 9 : index
    %c0_192 = arith.constant 0 : index
    %c0_193 = arith.constant 0 : index
    %282 = vector.load %arg11[%c9_191, %c0_192, %c0_193] : memref<10x32x32xbf16, #tpu.memory_space<vmem>>, vector<1x32x32xbf16>
    %283 = vector.shape_cast %282 : vector<1x32x32xbf16> to vector<32x32xbf16>
    %284 = arith.truncf %250 : vector<16x32xf32> to vector<16x32xbf16>
    %cst_194 = arith.constant dense<0.000000e+00> : vector<16x32xf32>
    %285 = tpu.matmul %284, %283, %cst_194 {dimension_numbers = #tpu.dot_dimension_numbers<[1], [0], [0], [1], [0, 0, 1, 1], [], []>} : vector<16x32xbf16>, vector<32x32xbf16>, vector<16x32xf32> -> vector<16x32xf32>
    %286 = arith.addf %259, %281 : vector<16x32xf32>
    %287 = arith.addf %235, %286 : vector<16x32xf32>
    %288 = arith.addf %268, %285 : vector<16x32xf32>
    %289 = arith.addf %237, %288 : vector<16x32xf32>
    %290 = arith.addf %238, %277 : vector<16x32xf32>
    %c0_195 = arith.constant 0 : index
    %c0_196 = arith.constant 0 : index
    %c0_197 = arith.constant 0 : index
    %291 = vector.load %arg13[%c0_195, %c0_196, %c0_197] : memref<3x1x32xf32, #tpu.memory_space<vmem>>, vector<1x1x32xf32>
    %292 = vector.shape_cast %291 : vector<1x1x32xf32> to vector<1x32xf32>
    %293 = vector.broadcast %292 : vector<1x32xf32> to vector<16x32xf32>
    %294 = arith.addf %287, %293 : vector<16x32xf32>
    %295 = arith.negf %294 : vector<16x32xf32>
    %296 = math.exp %295 : vector<16x32xf32>
    %cst_198 = arith.constant 1.000000e+00 : f32
    %297 = vector.broadcast %cst_198 : f32 to vector<16x32xf32>
    %298 = arith.addf %297, %296 : vector<16x32xf32>
    %299 = arith.divf %297, %298 : vector<16x32xf32>
    %c1_199 = arith.constant 1 : index
    %c0_200 = arith.constant 0 : index
    %c0_201 = arith.constant 0 : index
    %300 = vector.load %arg13[%c1_199, %c0_200, %c0_201] : memref<3x1x32xf32, #tpu.memory_space<vmem>>, vector<1x1x32xf32>
    %301 = vector.shape_cast %300 : vector<1x1x32xf32> to vector<1x32xf32>
    %302 = vector.broadcast %301 : vector<1x32xf32> to vector<16x32xf32>
    %303 = arith.addf %289, %302 : vector<16x32xf32>
    %304 = arith.negf %303 : vector<16x32xf32>
    %305 = math.exp %304 : vector<16x32xf32>
    %cst_202 = arith.constant 1.000000e+00 : f32
    %306 = vector.broadcast %cst_202 : f32 to vector<16x32xf32>
    %307 = arith.addf %306, %305 : vector<16x32xf32>
    %308 = arith.divf %306, %307 : vector<16x32xf32>
    %309 = arith.mulf %308, %33 : vector<16x32xf32>
    %c0_203 = arith.constant 0 : index
    %c0_204 = arith.constant 0 : index
    %c0_205 = arith.constant 0 : index
    %310 = vector.load %arg12[%c0_203, %c0_204, %c0_205] : memref<5x32x32xbf16, #tpu.memory_space<vmem>>, vector<1x32x32xbf16>
    %311 = vector.shape_cast %310 : vector<1x32x32xbf16> to vector<32x32xbf16>
    %312 = arith.truncf %309 : vector<16x32xf32> to vector<16x32xbf16>
    %cst_206 = arith.constant dense<0.000000e+00> : vector<16x32xf32>
    %313 = tpu.matmul %312, %311, %cst_206 {dimension_numbers = #tpu.dot_dimension_numbers<[1], [0], [0], [1], [0, 0, 1, 1], [], []>} : vector<16x32xbf16>, vector<32x32xbf16>, vector<16x32xf32> -> vector<16x32xf32>
    %314 = arith.addf %290, %313 : vector<16x32xf32>
    %315 = arith.truncf %309 : vector<16x32xf32> to vector<16x32xbf16>
    %cst_207 = arith.constant dense<0.000000e+00> : vector<16x32xf32>
    %316 = tpu.matmul %36, %315, %cst_207 {dimension_numbers = #tpu.dot_dimension_numbers<[1], [0], [0], [1], [0, 0, 1, 1], [], []>} : vector<16x16xbf16>, vector<16x32xbf16>, vector<16x32xf32> -> vector<16x32xf32>
    %317 = vector.broadcast %42 : vector<16x1xf32> to vector<16x32xf32>
    %318 = arith.mulf %316, %317 : vector<16x32xf32>
    %c1_208 = arith.constant 1 : index
    %c0_209 = arith.constant 0 : index
    %c0_210 = arith.constant 0 : index
    %319 = vector.load %arg12[%c1_208, %c0_209, %c0_210] : memref<5x32x32xbf16, #tpu.memory_space<vmem>>, vector<1x32x32xbf16>
    %320 = vector.shape_cast %319 : vector<1x32x32xbf16> to vector<32x32xbf16>
    %321 = arith.truncf %318 : vector<16x32xf32> to vector<16x32xbf16>
    %cst_211 = arith.constant dense<0.000000e+00> : vector<16x32xf32>
    %322 = tpu.matmul %321, %320, %cst_211 {dimension_numbers = #tpu.dot_dimension_numbers<[1], [0], [0], [1], [0, 0, 1, 1], [], []>} : vector<16x32xbf16>, vector<32x32xbf16>, vector<16x32xf32> -> vector<16x32xf32>
    %323 = arith.addf %314, %322 : vector<16x32xf32>
    %324 = arith.truncf %318 : vector<16x32xf32> to vector<16x32xbf16>
    %cst_212 = arith.constant dense<0.000000e+00> : vector<16x32xf32>
    %325 = tpu.matmul %36, %324, %cst_212 {dimension_numbers = #tpu.dot_dimension_numbers<[1], [0], [0], [1], [0, 0, 1, 1], [], []>} : vector<16x16xbf16>, vector<16x32xbf16>, vector<16x32xf32> -> vector<16x32xf32>
    %326 = vector.broadcast %42 : vector<16x1xf32> to vector<16x32xf32>
    %327 = arith.mulf %325, %326 : vector<16x32xf32>
    %c2_213 = arith.constant 2 : index
    %c0_214 = arith.constant 0 : index
    %c0_215 = arith.constant 0 : index
    %328 = vector.load %arg12[%c2_213, %c0_214, %c0_215] : memref<5x32x32xbf16, #tpu.memory_space<vmem>>, vector<1x32x32xbf16>
    %329 = vector.shape_cast %328 : vector<1x32x32xbf16> to vector<32x32xbf16>
    %330 = arith.truncf %327 : vector<16x32xf32> to vector<16x32xbf16>
    %cst_216 = arith.constant dense<0.000000e+00> : vector<16x32xf32>
    %331 = tpu.matmul %330, %329, %cst_216 {dimension_numbers = #tpu.dot_dimension_numbers<[1], [0], [0], [1], [0, 0, 1, 1], [], []>} : vector<16x32xbf16>, vector<32x32xbf16>, vector<16x32xf32> -> vector<16x32xf32>
    %332 = arith.addf %323, %331 : vector<16x32xf32>
    %333 = arith.truncf %309 : vector<16x32xf32> to vector<16x32xbf16>
    %cst_217 = arith.constant dense<0.000000e+00> : vector<16x32xf32>
    %334 = tpu.matmul %36, %333, %cst_217 {dimension_numbers = #tpu.dot_dimension_numbers<[0], [0], [1], [1], [0, 1, 1, 1], [], []>} : vector<16x16xbf16>, vector<16x32xbf16>, vector<16x32xf32> -> vector<16x32xf32>
    %335 = vector.broadcast %45 : vector<16x1xf32> to vector<16x32xf32>
    %336 = arith.mulf %334, %335 : vector<16x32xf32>
    %c3_218 = arith.constant 3 : index
    %c0_219 = arith.constant 0 : index
    %c0_220 = arith.constant 0 : index
    %337 = vector.load %arg12[%c3_218, %c0_219, %c0_220] : memref<5x32x32xbf16, #tpu.memory_space<vmem>>, vector<1x32x32xbf16>
    %338 = vector.shape_cast %337 : vector<1x32x32xbf16> to vector<32x32xbf16>
    %339 = arith.truncf %336 : vector<16x32xf32> to vector<16x32xbf16>
    %cst_221 = arith.constant dense<0.000000e+00> : vector<16x32xf32>
    %340 = tpu.matmul %339, %338, %cst_221 {dimension_numbers = #tpu.dot_dimension_numbers<[1], [0], [0], [1], [0, 0, 1, 1], [], []>} : vector<16x32xbf16>, vector<32x32xbf16>, vector<16x32xf32> -> vector<16x32xf32>
    %341 = arith.addf %332, %340 : vector<16x32xf32>
    %342 = arith.truncf %336 : vector<16x32xf32> to vector<16x32xbf16>
    %cst_222 = arith.constant dense<0.000000e+00> : vector<16x32xf32>
    %343 = tpu.matmul %36, %342, %cst_222 {dimension_numbers = #tpu.dot_dimension_numbers<[0], [0], [1], [1], [0, 1, 1, 1], [], []>} : vector<16x16xbf16>, vector<16x32xbf16>, vector<16x32xf32> -> vector<16x32xf32>
    %344 = vector.broadcast %45 : vector<16x1xf32> to vector<16x32xf32>
    %345 = arith.mulf %343, %344 : vector<16x32xf32>
    %c4_223 = arith.constant 4 : index
    %c0_224 = arith.constant 0 : index
    %c0_225 = arith.constant 0 : index
    %346 = vector.load %arg12[%c4_223, %c0_224, %c0_225] : memref<5x32x32xbf16, #tpu.memory_space<vmem>>, vector<1x32x32xbf16>
    %347 = vector.shape_cast %346 : vector<1x32x32xbf16> to vector<32x32xbf16>
    %348 = arith.truncf %345 : vector<16x32xf32> to vector<16x32xbf16>
    %cst_226 = arith.constant dense<0.000000e+00> : vector<16x32xf32>
    %349 = tpu.matmul %348, %347, %cst_226 {dimension_numbers = #tpu.dot_dimension_numbers<[1], [0], [0], [1], [0, 0, 1, 1], [], []>} : vector<16x32xbf16>, vector<32x32xbf16>, vector<16x32xf32> -> vector<16x32xf32>
    %350 = arith.addf %341, %349 : vector<16x32xf32>
    %c2_227 = arith.constant 2 : index
    %c0_228 = arith.constant 0 : index
    %c0_229 = arith.constant 0 : index
    %351 = vector.load %arg13[%c2_227, %c0_228, %c0_229] : memref<3x1x32xf32, #tpu.memory_space<vmem>>, vector<1x1x32xf32>
    %352 = vector.shape_cast %351 : vector<1x1x32xf32> to vector<1x32xf32>
    %353 = vector.broadcast %352 : vector<1x32xf32> to vector<16x32xf32>
    %354 = arith.addf %350, %353 : vector<16x32xf32>
    %355 = math.tanh %354 : vector<16x32xf32>
    %356 = arith.mulf %299, %33 : vector<16x32xf32>
    %cst_230 = arith.constant 1.000000e+00 : f32
    %357 = vector.broadcast %cst_230 : f32 to vector<16x32xf32>
    %358 = arith.subf %357, %299 : vector<16x32xf32>
    %359 = arith.mulf %358, %355 : vector<16x32xf32>
    %360 = arith.addf %356, %359 : vector<16x32xf32>
    %c0_231 = arith.constant 0 : index
    %c0_232 = arith.constant 0 : index
    %c0_233 = arith.constant 0 : index
    %361 = vector.load %arg15[%c0_231, %c0_232, %c0_233] : memref<1x16x32xf32, #tpu.memory_space<vmem>>, vector<1x16x32xf32>
    %362 = vector.shape_cast %361 : vector<1x16x32xf32> to vector<16x32xf32>
    %363 = vector.shape_cast %360 : vector<16x32xf32> to vector<1x16x32xf32>
    tpu.vector_store %arg15[%c0_231, %c0_232, %c0_233], %363 {strides = array<i32>} : memref<1x16x32xf32, #tpu.memory_space<vmem>>, vector<1x16x32xf32>,
    return
  }
  func.func @transform_0(%arg0: i32, %arg1: i32) -> (i32, i32, i32, i32) {
    %c0_i32 = arith.constant 0 : i32
    %c0_i32_0 = arith.constant 0 : i32
    %c0_i32_1 = arith.constant 0 : i32
    %c0_i32_2 = arith.constant 0 : i32
    return %arg0, %c0_i32, %c0_i32_0, %c0_i32_1 : i32, i32, i32, i32
  }
  func.func @transform_1(%arg0: i32, %arg1: i32) -> (i32, i32, i32, i32) {
    %c0_i32 = arith.constant 0 : i32
    %c0_i32_0 = arith.constant 0 : i32
    %c0_i32_1 = arith.constant 0 : i32
    return %arg0, %arg1, %c0_i32, %c0_i32_0 : i32, i32, i32, i32
  }
  func.func @transform_2(%arg0: i32, %arg1: i32) -> (i32, i32) {
    %c0_i32 = arith.constant 0 : i32
    %c0_i32_0 = arith.constant 0 : i32
    %c0_i32_1 = arith.constant 0 : i32
    return %c0_i32, %c0_i32_0 : i32, i32
  }
  func.func @transform_3(%arg0: i32, %arg1: i32) -> (i32, i32) {
    %c0_i32 = arith.constant 0 : i32
    %c0_i32_0 = arith.constant 0 : i32
    %c0_i32_1 = arith.constant 0 : i32
    return %c0_i32, %c0_i32_0 : i32, i32
  }
  func.func @transform_4(%arg0: i32, %arg1: i32) -> (i32, i32, i32) {
    %c0_i32 = arith.constant 0 : i32
    %c0_i32_0 = arith.constant 0 : i32
    %c0_i32_1 = arith.constant 0 : i32
    return %arg0, %c0_i32, %c0_i32_0 : i32, i32, i32
  }
  func.func @transform_5(%arg0: i32, %arg1: i32) -> (i32, i32, i32) {
    %c0_i32 = arith.constant 0 : i32
    %c0_i32_0 = arith.constant 0 : i32
    %c0_i32_1 = arith.constant 0 : i32
    %c0_i32_2 = arith.constant 0 : i32
    return %c0_i32, %c0_i32_0, %c0_i32_1 : i32, i32, i32
  }
  func.func @transform_6(%arg0: i32, %arg1: i32) -> (i32, i32) {
    %c0_i32 = arith.constant 0 : i32
    %c0_i32_0 = arith.constant 0 : i32
    %c0_i32_1 = arith.constant 0 : i32
    return %c0_i32, %c0_i32_0 : i32, i32
  }
  func.func @transform_7(%arg0: i32, %arg1: i32) -> (i32, i32, i32) {
    %c0_i32 = arith.constant 0 : i32
    %c0_i32_0 = arith.constant 0 : i32
    %c0_i32_1 = arith.constant 0 : i32
    %c0_i32_2 = arith.constant 0 : i32
    return %c0_i32, %c0_i32_0, %c0_i32_1 : i32, i32, i32
  }
  func.func @transform_8(%arg0: i32, %arg1: i32) -> (i32, i32, i32) {
    %c0_i32 = arith.constant 0 : i32
    %c0_i32_0 = arith.constant 0 : i32
    %c0_i32_1 = arith.constant 0 : i32
    %c0_i32_2 = arith.constant 0 : i32
    return %c0_i32, %c0_i32_0, %c0_i32_1 : i32, i32, i32
  }
  func.func @transform_9(%arg0: i32, %arg1: i32) -> (i32, i32, i32) {
    %c0_i32 = arith.constant 0 : i32
    %c0_i32_0 = arith.constant 0 : i32
    %c0_i32_1 = arith.constant 0 : i32
    %c0_i32_2 = arith.constant 0 : i32
    return %c0_i32, %c0_i32_0, %c0_i32_1 : i32, i32, i32
  }
  func.func @transform_10(%arg0: i32, %arg1: i32) -> (i32, i32, i32) {
    %c0_i32 = arith.constant 0 : i32
    %c0_i32_0 = arith.constant 0 : i32
    %c0_i32_1 = arith.constant 0 : i32
    %c0_i32_2 = arith.constant 0 : i32
    return %c0_i32, %c0_i32_0, %c0_i32_1 : i32, i32, i32
  }
  func.func @transform_11(%arg0: i32, %arg1: i32) -> (i32, i32, i32) {
    %c0_i32 = arith.constant 0 : i32
    %c0_i32_0 = arith.constant 0 : i32
    %c0_i32_1 = arith.constant 0 : i32
    %c0_i32_2 = arith.constant 0 : i32
    return %c0_i32, %c0_i32_0, %c0_i32_1 : i32, i32, i32
  }
  func.func @transform_12(%arg0: i32, %arg1: i32) -> (i32, i32, i32, i32) {
    %c0_i32 = arith.constant 0 : i32
    %c0_i32_0 = arith.constant 0 : i32
    %c0_i32_1 = arith.constant 0 : i32
    %c0_i32_2 = arith.constant 0 : i32
    return %arg0, %c0_i32, %c0_i32_0, %c0_i32_1 : i32, i32, i32, i32
  }
  func.func @transform_13(%arg0: i32, %arg1: i32) -> (i32, i32, i32) {
    %c0_i32 = arith.constant 0 : i32
    %c0_i32_0 = arith.constant 0 : i32
    %c0_i32_1 = arith.constant 0 : i32
    return %arg0, %c0_i32, %c0_i32_0 : i32, i32, i32
  }
}

module attributes {stable_mosaic.version = 11 : i64} {
  func.func @_odcrnn_layer_kernel(%arg0: i32, %arg1: i32, %arg2: memref<1x4x16x16xf32, #tpu.memory_space<vmem>>, %arg3: memref<1x1x16x16xbf16, #tpu.memory_space<vmem>>, %arg4: memref<16x16xbf16, #tpu.memory_space<vmem>>, %arg5: memref<16x8xf32, #tpu.memory_space<vmem>>, %arg6: memref<1x16x32xf32, #tpu.memory_space<vmem>>, %arg7: memref<3x16x16xbf16, #tpu.memory_space<vmem>>, %arg8: memref<1x16xf32, #tpu.memory_space<vmem>>, %arg9: memref<15x16x32xbf16, #tpu.memory_space<vmem>>, %arg10: memref<15x8x32xbf16, #tpu.memory_space<vmem>>, %arg11: memref<10x32x32xbf16, #tpu.memory_space<vmem>>, %arg12: memref<5x32x32xbf16, #tpu.memory_space<vmem>>, %arg13: memref<3x1x32xf32, #tpu.memory_space<vmem>>, %arg14: memref<1x16x32xf32, #tpu.memory_space<vmem>>) attributes {dimension_semantics = [#tpu.dimension_semantics<parallel>, #tpu.dimension_semantics<arbitrary>], iteration_bounds = array<i64: 2, 4>, scalar_prefetch = 0 : i64, scratch_operands = 0 : i64, tpu.core_type = #tpu.core_type<tc>, window_params = [{transform_indices = @transform_0, window_bounds = array<i64: 1, 4, 16, 16>}, {transform_indices = @transform_1, window_bounds = array<i64: 1, 1, 16, 16>}, {pipeline_mode = #tpu.pipeline_mode<synchronous>, transform_indices = @transform_2, window_bounds = array<i64: 16, 16>}, {pipeline_mode = #tpu.pipeline_mode<synchronous>, transform_indices = @transform_3, window_bounds = array<i64: 16, 8>}, {transform_indices = @transform_4, window_bounds = array<i64: 1, 16, 32>}, {pipeline_mode = #tpu.pipeline_mode<synchronous>, transform_indices = @transform_5, window_bounds = array<i64: 3, 16, 16>}, {pipeline_mode = #tpu.pipeline_mode<synchronous>, transform_indices = @transform_6, window_bounds = array<i64: 1, 16>}, {pipeline_mode = #tpu.pipeline_mode<synchronous>, transform_indices = @transform_7, window_bounds = array<i64: 15, 16, 32>}, {pipeline_mode = #tpu.pipeline_mode<synchronous>, transform_indices = @transform_8, window_bounds = array<i64: 15, 8, 32>}, {pipeline_mode = #tpu.pipeline_mode<synchronous>, transform_indices = @transform_9, window_bounds = array<i64: 10, 32, 32>}, {pipeline_mode = #tpu.pipeline_mode<synchronous>, transform_indices = @transform_10, window_bounds = array<i64: 5, 32, 32>}, {pipeline_mode = #tpu.pipeline_mode<synchronous>, transform_indices = @transform_11, window_bounds = array<i64: 3, 1, 32>}, {transform_indices = @transform_12, window_bounds = array<i64: 1, 16, 32>}]} {
    %c0 = arith.constant 0 : index
    %c0_0 = arith.constant 0 : index
    %0 = vector.load %arg4[%c0, %c0_0] : memref<16x16xbf16, #tpu.memory_space<vmem>>, vector<16x16xbf16>
    %c0_1 = arith.constant 0 : index
    %1 = arith.index_cast %arg1 : i32 to index
    %c0_2 = arith.constant 0 : index
    %c0_3 = arith.constant 0 : index
    %2 = vector.load %arg2[%c0_1, %1, %c0_2, %c0_3] : memref<1x4x16x16xf32, #tpu.memory_space<vmem>>, vector<1x1x16x16xf32>
    %3 = vector.shape_cast %2 : vector<1x1x16x16xf32> to vector<16x16xf32>
    %4 = arith.truncf %3 : vector<16x16xf32> to vector<16x16xbf16>
    %cst = arith.constant dense<0.000000e+00> : vector<16x16xf32>
    %5 = tpu.matmul %0, %4, %cst {dimension_numbers = #tpu.dot_dimension_numbers<[1], [0], [0], [1], [0, 0, 1, 1], [], []>} : vector<16x16xbf16>, vector<16x16xbf16>, vector<16x16xf32> -> vector<16x16xf32>
    %6 = arith.truncf %5 : vector<16x16xf32> to vector<16x16xbf16>
    %cst_4 = arith.constant dense<0.000000e+00> : vector<16x16xf32>
    %7 = tpu.matmul %0, %6, %cst_4 {dimension_numbers = #tpu.dot_dimension_numbers<[1], [0], [0], [1], [0, 0, 1, 1], [], []>} : vector<16x16xbf16>, vector<16x16xbf16>, vector<16x16xf32> -> vector<16x16xf32>
    %c0_5 = arith.constant 0 : index
    %c0_6 = arith.constant 0 : index
    %c0_7 = arith.constant 0 : index
    %8 = vector.load %arg7[%c0_5, %c0_6, %c0_7] : memref<3x16x16xbf16, #tpu.memory_space<vmem>>, vector<1x16x16xbf16>
    %9 = vector.shape_cast %8 : vector<1x16x16xbf16> to vector<16x16xbf16>
    %10 = arith.truncf %3 : vector<16x16xf32> to vector<16x16xbf16>
    %cst_8 = arith.constant dense<0.000000e+00> : vector<16x16xf32>
    %11 = tpu.matmul %10, %9, %cst_8 {dimension_numbers = #tpu.dot_dimension_numbers<[1], [0], [0], [1], [0, 0, 1, 1], [], []>} : vector<16x16xbf16>, vector<16x16xbf16>, vector<16x16xf32> -> vector<16x16xf32>
    %c1 = arith.constant 1 : index
    %c0_9 = arith.constant 0 : index
    %c0_10 = arith.constant 0 : index
    %12 = vector.load %arg7[%c1, %c0_9, %c0_10] : memref<3x16x16xbf16, #tpu.memory_space<vmem>>, vector<1x16x16xbf16>
    %13 = vector.shape_cast %12 : vector<1x16x16xbf16> to vector<16x16xbf16>
    %14 = arith.truncf %5 : vector<16x16xf32> to vector<16x16xbf16>
    %cst_11 = arith.constant dense<0.000000e+00> : vector<16x16xf32>
    %15 = tpu.matmul %14, %13, %cst_11 {dimension_numbers = #tpu.dot_dimension_numbers<[1], [0], [0], [1], [0, 0, 1, 1], [], []>} : vector<16x16xbf16>, vector<16x16xbf16>, vector<16x16xf32> -> vector<16x16xf32>
    %16 = arith.addf %11, %15 : vector<16x16xf32>
    %c2 = arith.constant 2 : index
    %c0_12 = arith.constant 0 : index
    %c0_13 = arith.constant 0 : index
    %17 = vector.load %arg7[%c2, %c0_12, %c0_13] : memref<3x16x16xbf16, #tpu.memory_space<vmem>>, vector<1x16x16xbf16>
    %18 = vector.shape_cast %17 : vector<1x16x16xbf16> to vector<16x16xbf16>
    %19 = arith.truncf %7 : vector<16x16xf32> to vector<16x16xbf16>
    %cst_14 = arith.constant dense<0.000000e+00> : vector<16x16xf32>
    %20 = tpu.matmul %19, %18, %cst_14 {dimension_numbers = #tpu.dot_dimension_numbers<[1], [0], [0], [1], [0, 0, 1, 1], [], []>} : vector<16x16xbf16>, vector<16x16xbf16>, vector<16x16xf32> -> vector<16x16xf32>
    %21 = arith.addf %16, %20 : vector<16x16xf32>
    %c0_15 = arith.constant 0 : index
    %c0_16 = arith.constant 0 : index
    %22 = vector.load %arg8[%c0_15, %c0_16] : memref<1x16xf32, #tpu.memory_space<vmem>>, vector<1x16xf32>
    %23 = vector.broadcast %22 : vector<1x16xf32> to vector<16x16xf32>
    %24 = arith.addf %21, %23 : vector<16x16xf32>
    %c0_i32 = arith.constant 0 : i32
    %25 = arith.cmpi eq, %arg1, %c0_i32 : i32
    %26 = arith.extui %25 : i1 to i32
    %c0_i32_17 = arith.constant 0 : i32
    %27 = arith.cmpi ne, %26, %c0_i32_17 : i32
    scf.if %27 {
      %c0_231 = arith.constant 0 : index
      %c0_232 = arith.constant 0 : index
      %c0_233 = arith.constant 0 : index
      %360 = vector.load %arg6[%c0_231, %c0_232, %c0_233] : memref<1x16x32xf32, #tpu.memory_space<vmem>>, vector<1x16x32xf32>
      %c0_234 = arith.constant 0 : index
      %c0_235 = arith.constant 0 : index
      %c0_236 = arith.constant 0 : index
      %361 = vector.load %arg14[%c0_234, %c0_235, %c0_236] : memref<1x16x32xf32, #tpu.memory_space<vmem>>, vector<1x16x32xf32>
      tpu.vector_store %arg14[%c0_234, %c0_235, %c0_236], %360 {strides = array<i32>} : memref<1x16x32xf32, #tpu.memory_space<vmem>>, vector<1x16x32xf32>,
    } else {
    }
    %c0_18 = arith.constant 0 : index
    %c0_19 = arith.constant 0 : index
    %c0_20 = arith.constant 0 : index
    %28 = vector.load %arg14[%c0_18, %c0_19, %c0_20] : memref<1x16x32xf32, #tpu.memory_space<vmem>>, vector<1x16x32xf32>
    %29 = vector.shape_cast %28 : vector<1x16x32xf32> to vector<16x32xf32>
    %c0_21 = arith.constant 0 : index
    %c0_22 = arith.constant 0 : index
    %30 = vector.load %arg5[%c0_21, %c0_22] : memref<16x8xf32, #tpu.memory_space<vmem>>, vector<16x8xf32>
    %c0_23 = arith.constant 0 : index
    %c0_24 = arith.constant 0 : index
    %c0_25 = arith.constant 0 : index
    %c0_26 = arith.constant 0 : index
    %31 = vector.load %arg3[%c0_23, %c0_24, %c0_25, %c0_26] : memref<1x1x16x16xbf16, #tpu.memory_space<vmem>>, vector<1x1x16x16xbf16>
    %32 = vector.shape_cast %31 : vector<1x1x16x16xbf16> to vector<16x16xbf16>
    %cst_27 = arith.constant 1.000000e+00 : bf16
    %33 = vector.broadcast %cst_27 : bf16 to vector<16x1xbf16>
    %cst_28 = arith.constant dense<0.000000e+00> : vector<16x1xf32>
    %34 = tpu.matmul %32, %33, %cst_28 {dimension_numbers = #tpu.dot_dimension_numbers<[1], [0], [0], [1], [0, 0, 1, 1], [], []>} : vector<16x16xbf16>, vector<16x1xbf16>, vector<16x1xf32> -> vector<16x1xf32>
    %cst_29 = arith.constant dense<0.000000e+00> : vector<16x1xf32>
    %35 = tpu.matmul %32, %33, %cst_29 {dimension_numbers = #tpu.dot_dimension_numbers<[0], [0], [1], [1], [0, 1, 1, 1], [], []>} : vector<16x16xbf16>, vector<16x1xbf16>, vector<16x1xf32> -> vector<16x1xf32>
    %cst_30 = arith.constant 9.99999997E-7 : f32
    %36 = vector.broadcast %cst_30 : f32 to vector<16x1xf32>
    %37 = arith.addf %34, %36 : vector<16x1xf32>
    %38 = tpu.reciprocal %37 {approx = true} : vector<16x1xf32> -> vector<16x1xf32>
    %cst_31 = arith.constant 9.99999997E-7 : f32
    %39 = vector.broadcast %cst_31 : f32 to vector<16x1xf32>
    %40 = arith.addf %35, %39 : vector<16x1xf32>
    %41 = tpu.reciprocal %40 {approx = true} : vector<16x1xf32> -> vector<16x1xf32>
    %c0_32 = arith.constant 0 : index
    %c0_33 = arith.constant 0 : index
    %c0_34 = arith.constant 0 : index
    %42 = vector.load %arg9[%c0_32, %c0_33, %c0_34] : memref<15x16x32xbf16, #tpu.memory_space<vmem>>, vector<1x16x32xbf16>
    %43 = vector.shape_cast %42 : vector<1x16x32xbf16> to vector<16x32xbf16>
    %44 = arith.truncf %24 : vector<16x16xf32> to vector<16x16xbf16>
    %cst_35 = arith.constant dense<0.000000e+00> : vector<16x32xf32>
    %45 = tpu.matmul %44, %43, %cst_35 {dimension_numbers = #tpu.dot_dimension_numbers<[1], [0], [0], [1], [0, 0, 1, 1], [], []>} : vector<16x16xbf16>, vector<16x32xbf16>, vector<16x32xf32> -> vector<16x32xf32>
    %c0_36 = arith.constant 0 : index
    %c0_37 = arith.constant 0 : index
    %c0_38 = arith.constant 0 : index
    %46 = vector.load %arg10[%c0_36, %c0_37, %c0_38] : memref<15x8x32xbf16, #tpu.memory_space<vmem>>, vector<1x8x32xbf16>
    %47 = vector.shape_cast %46 : vector<1x8x32xbf16> to vector<8x32xbf16>
    %48 = arith.truncf %30 : vector<16x8xf32> to vector<16x8xbf16>
    %cst_39 = arith.constant dense<0.000000e+00> : vector<16x32xf32>
    %49 = tpu.matmul %48, %47, %cst_39 {dimension_numbers = #tpu.dot_dimension_numbers<[1], [0], [0], [1], [0, 0, 1, 1], [], []>} : vector<16x8xbf16>, vector<8x32xbf16>, vector<16x32xf32> -> vector<16x32xf32>
    %50 = arith.addf %45, %49 : vector<16x32xf32>
    %c1_40 = arith.constant 1 : index
    %c0_41 = arith.constant 0 : index
    %c0_42 = arith.constant 0 : index
    %51 = vector.load %arg9[%c1_40, %c0_41, %c0_42] : memref<15x16x32xbf16, #tpu.memory_space<vmem>>, vector<1x16x32xbf16>
    %52 = vector.shape_cast %51 : vector<1x16x32xbf16> to vector<16x32xbf16>
    %53 = arith.truncf %24 : vector<16x16xf32> to vector<16x16xbf16>
    %cst_43 = arith.constant dense<0.000000e+00> : vector<16x32xf32>
    %54 = tpu.matmul %53, %52, %cst_43 {dimension_numbers = #tpu.dot_dimension_numbers<[1], [0], [0], [1], [0, 0, 1, 1], [], []>} : vector<16x16xbf16>, vector<16x32xbf16>, vector<16x32xf32> -> vector<16x32xf32>
    %c1_44 = arith.constant 1 : index
    %c0_45 = arith.constant 0 : index
    %c0_46 = arith.constant 0 : index
    %55 = vector.load %arg10[%c1_44, %c0_45, %c0_46] : memref<15x8x32xbf16, #tpu.memory_space<vmem>>, vector<1x8x32xbf16>
    %56 = vector.shape_cast %55 : vector<1x8x32xbf16> to vector<8x32xbf16>
    %57 = arith.truncf %30 : vector<16x8xf32> to vector<16x8xbf16>
    %cst_47 = arith.constant dense<0.000000e+00> : vector<16x32xf32>
    %58 = tpu.matmul %57, %56, %cst_47 {dimension_numbers = #tpu.dot_dimension_numbers<[1], [0], [0], [1], [0, 0, 1, 1], [], []>} : vector<16x8xbf16>, vector<8x32xbf16>, vector<16x32xf32> -> vector<16x32xf32>
    %59 = arith.addf %54, %58 : vector<16x32xf32>
    %c2_48 = arith.constant 2 : index
    %c0_49 = arith.constant 0 : index
    %c0_50 = arith.constant 0 : index
    %60 = vector.load %arg9[%c2_48, %c0_49, %c0_50] : memref<15x16x32xbf16, #tpu.memory_space<vmem>>, vector<1x16x32xbf16>
    %61 = vector.shape_cast %60 : vector<1x16x32xbf16> to vector<16x32xbf16>
    %62 = arith.truncf %24 : vector<16x16xf32> to vector<16x16xbf16>
    %cst_51 = arith.constant dense<0.000000e+00> : vector<16x32xf32>
    %63 = tpu.matmul %62, %61, %cst_51 {dimension_numbers = #tpu.dot_dimension_numbers<[1], [0], [0], [1], [0, 0, 1, 1], [], []>} : vector<16x16xbf16>, vector<16x32xbf16>, vector<16x32xf32> -> vector<16x32xf32>
    %c2_52 = arith.constant 2 : index
    %c0_53 = arith.constant 0 : index
    %c0_54 = arith.constant 0 : index
    %64 = vector.load %arg10[%c2_52, %c0_53, %c0_54] : memref<15x8x32xbf16, #tpu.memory_space<vmem>>, vector<1x8x32xbf16>
    %65 = vector.shape_cast %64 : vector<1x8x32xbf16> to vector<8x32xbf16>
    %66 = arith.truncf %30 : vector<16x8xf32> to vector<16x8xbf16>
    %cst_55 = arith.constant dense<0.000000e+00> : vector<16x32xf32>
    %67 = tpu.matmul %66, %65, %cst_55 {dimension_numbers = #tpu.dot_dimension_numbers<[1], [0], [0], [1], [0, 0, 1, 1], [], []>} : vector<16x8xbf16>, vector<8x32xbf16>, vector<16x32xf32> -> vector<16x32xf32>
    %68 = arith.addf %63, %67 : vector<16x32xf32>
    %c0_56 = arith.constant 0 : index
    %c0_57 = arith.constant 0 : index
    %c0_58 = arith.constant 0 : index
    %69 = vector.load %arg11[%c0_56, %c0_57, %c0_58] : memref<10x32x32xbf16, #tpu.memory_space<vmem>>, vector<1x32x32xbf16>
    %70 = vector.shape_cast %69 : vector<1x32x32xbf16> to vector<32x32xbf16>
    %71 = arith.truncf %29 : vector<16x32xf32> to vector<16x32xbf16>
    %cst_59 = arith.constant dense<0.000000e+00> : vector<16x32xf32>
    %72 = tpu.matmul %71, %70, %cst_59 {dimension_numbers = #tpu.dot_dimension_numbers<[1], [0], [0], [1], [0, 0, 1, 1], [], []>} : vector<16x32xbf16>, vector<32x32xbf16>, vector<16x32xf32> -> vector<16x32xf32>
    %c1_60 = arith.constant 1 : index
    %c0_61 = arith.constant 0 : index
    %c0_62 = arith.constant 0 : index
    %73 = vector.load %arg11[%c1_60, %c0_61, %c0_62] : memref<10x32x32xbf16, #tpu.memory_space<vmem>>, vector<1x32x32xbf16>
    %74 = vector.shape_cast %73 : vector<1x32x32xbf16> to vector<32x32xbf16>
    %75 = arith.truncf %29 : vector<16x32xf32> to vector<16x32xbf16>
    %cst_63 = arith.constant dense<0.000000e+00> : vector<16x32xf32>
    %76 = tpu.matmul %75, %74, %cst_63 {dimension_numbers = #tpu.dot_dimension_numbers<[1], [0], [0], [1], [0, 0, 1, 1], [], []>} : vector<16x32xbf16>, vector<32x32xbf16>, vector<16x32xf32> -> vector<16x32xf32>
    %77 = arith.addf %50, %72 : vector<16x32xf32>
    %78 = arith.addf %59, %76 : vector<16x32xf32>
    %79 = arith.truncf %24 : vector<16x16xf32> to vector<16x16xbf16>
    %cst_64 = arith.constant dense<0.000000e+00> : vector<16x16xf32>
    %80 = tpu.matmul %32, %79, %cst_64 {dimension_numbers = #tpu.dot_dimension_numbers<[1], [0], [0], [1], [0, 0, 1, 1], [], []>} : vector<16x16xbf16>, vector<16x16xbf16>, vector<16x16xf32> -> vector<16x16xf32>
    %81 = vector.broadcast %38 : vector<16x1xf32> to vector<16x16xf32>
    %82 = arith.mulf %80, %81 : vector<16x16xf32>
    %83 = arith.truncf %30 : vector<16x8xf32> to vector<16x8xbf16>
    %cst_65 = arith.constant dense<0.000000e+00> : vector<16x8xf32>
    %84 = tpu.matmul %32, %83, %cst_65 {dimension_numbers = #tpu.dot_dimension_numbers<[1], [0], [0], [1], [0, 0, 1, 1], [], []>} : vector<16x16xbf16>, vector<16x8xbf16>, vector<16x8xf32> -> vector<16x8xf32>
    %85 = vector.broadcast %38 : vector<16x1xf32> to vector<16x8xf32>
    %86 = arith.mulf %84, %85 : vector<16x8xf32>
    %87 = arith.truncf %29 : vector<16x32xf32> to vector<16x32xbf16>
    %cst_66 = arith.constant dense<0.000000e+00> : vector<16x32xf32>
    %88 = tpu.matmul %32, %87, %cst_66 {dimension_numbers = #tpu.dot_dimension_numbers<[1], [0], [0], [1], [0, 0, 1, 1], [], []>} : vector<16x16xbf16>, vector<16x32xbf16>, vector<16x32xf32> -> vector<16x32xf32>
    %89 = vector.broadcast %38 : vector<16x1xf32> to vector<16x32xf32>
    %90 = arith.mulf %88, %89 : vector<16x32xf32>
    %c3 = arith.constant 3 : index
    %c0_67 = arith.constant 0 : index
    %c0_68 = arith.constant 0 : index
    %91 = vector.load %arg9[%c3, %c0_67, %c0_68] : memref<15x16x32xbf16, #tpu.memory_space<vmem>>, vector<1x16x32xbf16>
    %92 = vector.shape_cast %91 : vector<1x16x32xbf16> to vector<16x32xbf16>
    %93 = arith.truncf %82 : vector<16x16xf32> to vector<16x16xbf16>
    %cst_69 = arith.constant dense<0.000000e+00> : vector<16x32xf32>
    %94 = tpu.matmul %93, %92, %cst_69 {dimension_numbers = #tpu.dot_dimension_numbers<[1], [0], [0], [1], [0, 0, 1, 1], [], []>} : vector<16x16xbf16>, vector<16x32xbf16>, vector<16x32xf32> -> vector<16x32xf32>
    %c3_70 = arith.constant 3 : index
    %c0_71 = arith.constant 0 : index
    %c0_72 = arith.constant 0 : index
    %95 = vector.load %arg10[%c3_70, %c0_71, %c0_72] : memref<15x8x32xbf16, #tpu.memory_space<vmem>>, vector<1x8x32xbf16>
    %96 = vector.shape_cast %95 : vector<1x8x32xbf16> to vector<8x32xbf16>
    %97 = arith.truncf %86 : vector<16x8xf32> to vector<16x8xbf16>
    %cst_73 = arith.constant dense<0.000000e+00> : vector<16x32xf32>
    %98 = tpu.matmul %97, %96, %cst_73 {dimension_numbers = #tpu.dot_dimension_numbers<[1], [0], [0], [1], [0, 0, 1, 1], [], []>} : vector<16x8xbf16>, vector<8x32xbf16>, vector<16x32xf32> -> vector<16x32xf32>
    %99 = arith.addf %94, %98 : vector<16x32xf32>
    %c4 = arith.constant 4 : index
    %c0_74 = arith.constant 0 : index
    %c0_75 = arith.constant 0 : index
    %100 = vector.load %arg9[%c4, %c0_74, %c0_75] : memref<15x16x32xbf16, #tpu.memory_space<vmem>>, vector<1x16x32xbf16>
    %101 = vector.shape_cast %100 : vector<1x16x32xbf16> to vector<16x32xbf16>
    %102 = arith.truncf %82 : vector<16x16xf32> to vector<16x16xbf16>
    %cst_76 = arith.constant dense<0.000000e+00> : vector<16x32xf32>
    %103 = tpu.matmul %102, %101, %cst_76 {dimension_numbers = #tpu.dot_dimension_numbers<[1], [0], [0], [1], [0, 0, 1, 1], [], []>} : vector<16x16xbf16>, vector<16x32xbf16>, vector<16x32xf32> -> vector<16x32xf32>
    %c4_77 = arith.constant 4 : index
    %c0_78 = arith.constant 0 : index
    %c0_79 = arith.constant 0 : index
    %104 = vector.load %arg10[%c4_77, %c0_78, %c0_79] : memref<15x8x32xbf16, #tpu.memory_space<vmem>>, vector<1x8x32xbf16>
    %105 = vector.shape_cast %104 : vector<1x8x32xbf16> to vector<8x32xbf16>
    %106 = arith.truncf %86 : vector<16x8xf32> to vector<16x8xbf16>
    %cst_80 = arith.constant dense<0.000000e+00> : vector<16x32xf32>
    %107 = tpu.matmul %106, %105, %cst_80 {dimension_numbers = #tpu.dot_dimension_numbers<[1], [0], [0], [1], [0, 0, 1, 1], [], []>} : vector<16x8xbf16>, vector<8x32xbf16>, vector<16x32xf32> -> vector<16x32xf32>
    %108 = arith.addf %103, %107 : vector<16x32xf32>
    %c5 = arith.constant 5 : index
    %c0_81 = arith.constant 0 : index
    %c0_82 = arith.constant 0 : index
    %109 = vector.load %arg9[%c5, %c0_81, %c0_82] : memref<15x16x32xbf16, #tpu.memory_space<vmem>>, vector<1x16x32xbf16>
    %110 = vector.shape_cast %109 : vector<1x16x32xbf16> to vector<16x32xbf16>
    %111 = arith.truncf %82 : vector<16x16xf32> to vector<16x16xbf16>
    %cst_83 = arith.constant dense<0.000000e+00> : vector<16x32xf32>
    %112 = tpu.matmul %111, %110, %cst_83 {dimension_numbers = #tpu.dot_dimension_numbers<[1], [0], [0], [1], [0, 0, 1, 1], [], []>} : vector<16x16xbf16>, vector<16x32xbf16>, vector<16x32xf32> -> vector<16x32xf32>
    %c5_84 = arith.constant 5 : index
    %c0_85 = arith.constant 0 : index
    %c0_86 = arith.constant 0 : index
    %113 = vector.load %arg10[%c5_84, %c0_85, %c0_86] : memref<15x8x32xbf16, #tpu.memory_space<vmem>>, vector<1x8x32xbf16>
    %114 = vector.shape_cast %113 : vector<1x8x32xbf16> to vector<8x32xbf16>
    %115 = arith.truncf %86 : vector<16x8xf32> to vector<16x8xbf16>
    %cst_87 = arith.constant dense<0.000000e+00> : vector<16x32xf32>
    %116 = tpu.matmul %115, %114, %cst_87 {dimension_numbers = #tpu.dot_dimension_numbers<[1], [0], [0], [1], [0, 0, 1, 1], [], []>} : vector<16x8xbf16>, vector<8x32xbf16>, vector<16x32xf32> -> vector<16x32xf32>
    %117 = arith.addf %112, %116 : vector<16x32xf32>
    %c2_88 = arith.constant 2 : index
    %c0_89 = arith.constant 0 : index
    %c0_90 = arith.constant 0 : index
    %118 = vector.load %arg11[%c2_88, %c0_89, %c0_90] : memref<10x32x32xbf16, #tpu.memory_space<vmem>>, vector<1x32x32xbf16>
    %119 = vector.shape_cast %118 : vector<1x32x32xbf16> to vector<32x32xbf16>
    %120 = arith.truncf %90 : vector<16x32xf32> to vector<16x32xbf16>
    %cst_91 = arith.constant dense<0.000000e+00> : vector<16x32xf32>
    %121 = tpu.matmul %120, %119, %cst_91 {dimension_numbers = #tpu.dot_dimension_numbers<[1], [0], [0], [1], [0, 0, 1, 1], [], []>} : vector<16x32xbf16>, vector<32x32xbf16>, vector<16x32xf32> -> vector<16x32xf32>
    %c3_92 = arith.constant 3 : index
    %c0_93 = arith.constant 0 : index
    %c0_94 = arith.constant 0 : index
    %122 = vector.load %arg11[%c3_92, %c0_93, %c0_94] : memref<10x32x32xbf16, #tpu.memory_space<vmem>>, vector<1x32x32xbf16>
    %123 = vector.shape_cast %122 : vector<1x32x32xbf16> to vector<32x32xbf16>
    %124 = arith.truncf %90 : vector<16x32xf32> to vector<16x32xbf16>
    %cst_95 = arith.constant dense<0.000000e+00> : vector<16x32xf32>
    %125 = tpu.matmul %124, %123, %cst_95 {dimension_numbers = #tpu.dot_dimension_numbers<[1], [0], [0], [1], [0, 0, 1, 1], [], []>} : vector<16x32xbf16>, vector<32x32xbf16>, vector<16x32xf32> -> vector<16x32xf32>
    %126 = arith.addf %99, %121 : vector<16x32xf32>
    %127 = arith.addf %77, %126 : vector<16x32xf32>
    %128 = arith.addf %108, %125 : vector<16x32xf32>
    %129 = arith.addf %78, %128 : vector<16x32xf32>
    %130 = arith.addf %68, %117 : vector<16x32xf32>
    %131 = arith.truncf %82 : vector<16x16xf32> to vector<16x16xbf16>
    %cst_96 = arith.constant dense<0.000000e+00> : vector<16x16xf32>
    %132 = tpu.matmul %32, %131, %cst_96 {dimension_numbers = #tpu.dot_dimension_numbers<[1], [0], [0], [1], [0, 0, 1, 1], [], []>} : vector<16x16xbf16>, vector<16x16xbf16>, vector<16x16xf32> -> vector<16x16xf32>
    %133 = vector.broadcast %38 : vector<16x1xf32> to vector<16x16xf32>
    %134 = arith.mulf %132, %133 : vector<16x16xf32>
    %135 = arith.truncf %86 : vector<16x8xf32> to vector<16x8xbf16>
    %cst_97 = arith.constant dense<0.000000e+00> : vector<16x8xf32>
    %136 = tpu.matmul %32, %135, %cst_97 {dimension_numbers = #tpu.dot_dimension_numbers<[1], [0], [0], [1], [0, 0, 1, 1], [], []>} : vector<16x16xbf16>, vector<16x8xbf16>, vector<16x8xf32> -> vector<16x8xf32>
    %137 = vector.broadcast %38 : vector<16x1xf32> to vector<16x8xf32>
    %138 = arith.mulf %136, %137 : vector<16x8xf32>
    %139 = arith.truncf %90 : vector<16x32xf32> to vector<16x32xbf16>
    %cst_98 = arith.constant dense<0.000000e+00> : vector<16x32xf32>
    %140 = tpu.matmul %32, %139, %cst_98 {dimension_numbers = #tpu.dot_dimension_numbers<[1], [0], [0], [1], [0, 0, 1, 1], [], []>} : vector<16x16xbf16>, vector<16x32xbf16>, vector<16x32xf32> -> vector<16x32xf32>
    %141 = vector.broadcast %38 : vector<16x1xf32> to vector<16x32xf32>
    %142 = arith.mulf %140, %141 : vector<16x32xf32>
    %c6 = arith.constant 6 : index
    %c0_99 = arith.constant 0 : index
    %c0_100 = arith.constant 0 : index
    %143 = vector.load %arg9[%c6, %c0_99, %c0_100] : memref<15x16x32xbf16, #tpu.memory_space<vmem>>, vector<1x16x32xbf16>
    %144 = vector.shape_cast %143 : vector<1x16x32xbf16> to vector<16x32xbf16>
    %145 = arith.truncf %134 : vector<16x16xf32> to vector<16x16xbf16>
    %cst_101 = arith.constant dense<0.000000e+00> : vector<16x32xf32>
    %146 = tpu.matmul %145, %144, %cst_101 {dimension_numbers = #tpu.dot_dimension_numbers<[1], [0], [0], [1], [0, 0, 1, 1], [], []>} : vector<16x16xbf16>, vector<16x32xbf16>, vector<16x32xf32> -> vector<16x32xf32>
    %c6_102 = arith.constant 6 : index
    %c0_103 = arith.constant 0 : index
    %c0_104 = arith.constant 0 : index
    %147 = vector.load %arg10[%c6_102, %c0_103, %c0_104] : memref<15x8x32xbf16, #tpu.memory_space<vmem>>, vector<1x8x32xbf16>
    %148 = vector.shape_cast %147 : vector<1x8x32xbf16> to vector<8x32xbf16>
    %149 = arith.truncf %138 : vector<16x8xf32> to vector<16x8xbf16>
    %cst_105 = arith.constant dense<0.000000e+00> : vector<16x32xf32>
    %150 = tpu.matmul %149, %148, %cst_105 {dimension_numbers = #tpu.dot_dimension_numbers<[1], [0], [0], [1], [0, 0, 1, 1], [], []>} : vector<16x8xbf16>, vector<8x32xbf16>, vector<16x32xf32> -> vector<16x32xf32>
    %151 = arith.addf %146, %150 : vector<16x32xf32>
    %c7 = arith.constant 7 : index
    %c0_106 = arith.constant 0 : index
    %c0_107 = arith.constant 0 : index
    %152 = vector.load %arg9[%c7, %c0_106, %c0_107] : memref<15x16x32xbf16, #tpu.memory_space<vmem>>, vector<1x16x32xbf16>
    %153 = vector.shape_cast %152 : vector<1x16x32xbf16> to vector<16x32xbf16>
    %154 = arith.truncf %134 : vector<16x16xf32> to vector<16x16xbf16>
    %cst_108 = arith.constant dense<0.000000e+00> : vector<16x32xf32>
    %155 = tpu.matmul %154, %153, %cst_108 {dimension_numbers = #tpu.dot_dimension_numbers<[1], [0], [0], [1], [0, 0, 1, 1], [], []>} : vector<16x16xbf16>, vector<16x32xbf16>, vector<16x32xf32> -> vector<16x32xf32>
    %c7_109 = arith.constant 7 : index
    %c0_110 = arith.constant 0 : index
    %c0_111 = arith.constant 0 : index
    %156 = vector.load %arg10[%c7_109, %c0_110, %c0_111] : memref<15x8x32xbf16, #tpu.memory_space<vmem>>, vector<1x8x32xbf16>
    %157 = vector.shape_cast %156 : vector<1x8x32xbf16> to vector<8x32xbf16>
    %158 = arith.truncf %138 : vector<16x8xf32> to vector<16x8xbf16>
    %cst_112 = arith.constant dense<0.000000e+00> : vector<16x32xf32>
    %159 = tpu.matmul %158, %157, %cst_112 {dimension_numbers = #tpu.dot_dimension_numbers<[1], [0], [0], [1], [0, 0, 1, 1], [], []>} : vector<16x8xbf16>, vector<8x32xbf16>, vector<16x32xf32> -> vector<16x32xf32>
    %160 = arith.addf %155, %159 : vector<16x32xf32>
    %c8 = arith.constant 8 : index
    %c0_113 = arith.constant 0 : index
    %c0_114 = arith.constant 0 : index
    %161 = vector.load %arg9[%c8, %c0_113, %c0_114] : memref<15x16x32xbf16, #tpu.memory_space<vmem>>, vector<1x16x32xbf16>
    %162 = vector.shape_cast %161 : vector<1x16x32xbf16> to vector<16x32xbf16>
    %163 = arith.truncf %134 : vector<16x16xf32> to vector<16x16xbf16>
    %cst_115 = arith.constant dense<0.000000e+00> : vector<16x32xf32>
    %164 = tpu.matmul %163, %162, %cst_115 {dimension_numbers = #tpu.dot_dimension_numbers<[1], [0], [0], [1], [0, 0, 1, 1], [], []>} : vector<16x16xbf16>, vector<16x32xbf16>, vector<16x32xf32> -> vector<16x32xf32>
    %c8_116 = arith.constant 8 : index
    %c0_117 = arith.constant 0 : index
    %c0_118 = arith.constant 0 : index
    %165 = vector.load %arg10[%c8_116, %c0_117, %c0_118] : memref<15x8x32xbf16, #tpu.memory_space<vmem>>, vector<1x8x32xbf16>
    %166 = vector.shape_cast %165 : vector<1x8x32xbf16> to vector<8x32xbf16>
    %167 = arith.truncf %138 : vector<16x8xf32> to vector<16x8xbf16>
    %cst_119 = arith.constant dense<0.000000e+00> : vector<16x32xf32>
    %168 = tpu.matmul %167, %166, %cst_119 {dimension_numbers = #tpu.dot_dimension_numbers<[1], [0], [0], [1], [0, 0, 1, 1], [], []>} : vector<16x8xbf16>, vector<8x32xbf16>, vector<16x32xf32> -> vector<16x32xf32>
    %169 = arith.addf %164, %168 : vector<16x32xf32>
    %c4_120 = arith.constant 4 : index
    %c0_121 = arith.constant 0 : index
    %c0_122 = arith.constant 0 : index
    %170 = vector.load %arg11[%c4_120, %c0_121, %c0_122] : memref<10x32x32xbf16, #tpu.memory_space<vmem>>, vector<1x32x32xbf16>
    %171 = vector.shape_cast %170 : vector<1x32x32xbf16> to vector<32x32xbf16>
    %172 = arith.truncf %142 : vector<16x32xf32> to vector<16x32xbf16>
    %cst_123 = arith.constant dense<0.000000e+00> : vector<16x32xf32>
    %173 = tpu.matmul %172, %171, %cst_123 {dimension_numbers = #tpu.dot_dimension_numbers<[1], [0], [0], [1], [0, 0, 1, 1], [], []>} : vector<16x32xbf16>, vector<32x32xbf16>, vector<16x32xf32> -> vector<16x32xf32>
    %c5_124 = arith.constant 5 : index
    %c0_125 = arith.constant 0 : index
    %c0_126 = arith.constant 0 : index
    %174 = vector.load %arg11[%c5_124, %c0_125, %c0_126] : memref<10x32x32xbf16, #tpu.memory_space<vmem>>, vector<1x32x32xbf16>
    %175 = vector.shape_cast %174 : vector<1x32x32xbf16> to vector<32x32xbf16>
    %176 = arith.truncf %142 : vector<16x32xf32> to vector<16x32xbf16>
    %cst_127 = arith.constant dense<0.000000e+00> : vector<16x32xf32>
    %177 = tpu.matmul %176, %175, %cst_127 {dimension_numbers = #tpu.dot_dimension_numbers<[1], [0], [0], [1], [0, 0, 1, 1], [], []>} : vector<16x32xbf16>, vector<32x32xbf16>, vector<16x32xf32> -> vector<16x32xf32>
    %178 = arith.addf %151, %173 : vector<16x32xf32>
    %179 = arith.addf %127, %178 : vector<16x32xf32>
    %180 = arith.addf %160, %177 : vector<16x32xf32>
    %181 = arith.addf %129, %180 : vector<16x32xf32>
    %182 = arith.addf %130, %169 : vector<16x32xf32>
    %183 = arith.truncf %24 : vector<16x16xf32> to vector<16x16xbf16>
    %cst_128 = arith.constant dense<0.000000e+00> : vector<16x16xf32>
    %184 = tpu.matmul %32, %183, %cst_128 {dimension_numbers = #tpu.dot_dimension_numbers<[0], [0], [1], [1], [0, 1, 1, 1], [], []>} : vector<16x16xbf16>, vector<16x16xbf16>, vector<16x16xf32> -> vector<16x16xf32>
    %185 = vector.broadcast %41 : vector<16x1xf32> to vector<16x16xf32>
    %186 = arith.mulf %184, %185 : vector<16x16xf32>
    %187 = arith.truncf %30 : vector<16x8xf32> to vector<16x8xbf16>
    %cst_129 = arith.constant dense<0.000000e+00> : vector<16x8xf32>
    %188 = tpu.matmul %32, %187, %cst_129 {dimension_numbers = #tpu.dot_dimension_numbers<[0], [0], [1], [1], [0, 1, 1, 1], [], []>} : vector<16x16xbf16>, vector<16x8xbf16>, vector<16x8xf32> -> vector<16x8xf32>
    %189 = vector.broadcast %41 : vector<16x1xf32> to vector<16x8xf32>
    %190 = arith.mulf %188, %189 : vector<16x8xf32>
    %191 = arith.truncf %29 : vector<16x32xf32> to vector<16x32xbf16>
    %cst_130 = arith.constant dense<0.000000e+00> : vector<16x32xf32>
    %192 = tpu.matmul %32, %191, %cst_130 {dimension_numbers = #tpu.dot_dimension_numbers<[0], [0], [1], [1], [0, 1, 1, 1], [], []>} : vector<16x16xbf16>, vector<16x32xbf16>, vector<16x32xf32> -> vector<16x32xf32>
    %193 = vector.broadcast %41 : vector<16x1xf32> to vector<16x32xf32>
    %194 = arith.mulf %192, %193 : vector<16x32xf32>
    %c9 = arith.constant 9 : index
    %c0_131 = arith.constant 0 : index
    %c0_132 = arith.constant 0 : index
    %195 = vector.load %arg9[%c9, %c0_131, %c0_132] : memref<15x16x32xbf16, #tpu.memory_space<vmem>>, vector<1x16x32xbf16>
    %196 = vector.shape_cast %195 : vector<1x16x32xbf16> to vector<16x32xbf16>
    %197 = arith.truncf %186 : vector<16x16xf32> to vector<16x16xbf16>
    %cst_133 = arith.constant dense<0.000000e+00> : vector<16x32xf32>
    %198 = tpu.matmul %197, %196, %cst_133 {dimension_numbers = #tpu.dot_dimension_numbers<[1], [0], [0], [1], [0, 0, 1, 1], [], []>} : vector<16x16xbf16>, vector<16x32xbf16>, vector<16x32xf32> -> vector<16x32xf32>
    %c9_134 = arith.constant 9 : index
    %c0_135 = arith.constant 0 : index
    %c0_136 = arith.constant 0 : index
    %199 = vector.load %arg10[%c9_134, %c0_135, %c0_136] : memref<15x8x32xbf16, #tpu.memory_space<vmem>>, vector<1x8x32xbf16>
    %200 = vector.shape_cast %199 : vector<1x8x32xbf16> to vector<8x32xbf16>
    %201 = arith.truncf %190 : vector<16x8xf32> to vector<16x8xbf16>
    %cst_137 = arith.constant dense<0.000000e+00> : vector<16x32xf32>
    %202 = tpu.matmul %201, %200, %cst_137 {dimension_numbers = #tpu.dot_dimension_numbers<[1], [0], [0], [1], [0, 0, 1, 1], [], []>} : vector<16x8xbf16>, vector<8x32xbf16>, vector<16x32xf32> -> vector<16x32xf32>
    %203 = arith.addf %198, %202 : vector<16x32xf32>
    %c10 = arith.constant 10 : index
    %c0_138 = arith.constant 0 : index
    %c0_139 = arith.constant 0 : index
    %204 = vector.load %arg9[%c10, %c0_138, %c0_139] : memref<15x16x32xbf16, #tpu.memory_space<vmem>>, vector<1x16x32xbf16>
    %205 = vector.shape_cast %204 : vector<1x16x32xbf16> to vector<16x32xbf16>
    %206 = arith.truncf %186 : vector<16x16xf32> to vector<16x16xbf16>
    %cst_140 = arith.constant dense<0.000000e+00> : vector<16x32xf32>
    %207 = tpu.matmul %206, %205, %cst_140 {dimension_numbers = #tpu.dot_dimension_numbers<[1], [0], [0], [1], [0, 0, 1, 1], [], []>} : vector<16x16xbf16>, vector<16x32xbf16>, vector<16x32xf32> -> vector<16x32xf32>
    %c10_141 = arith.constant 10 : index
    %c0_142 = arith.constant 0 : index
    %c0_143 = arith.constant 0 : index
    %208 = vector.load %arg10[%c10_141, %c0_142, %c0_143] : memref<15x8x32xbf16, #tpu.memory_space<vmem>>, vector<1x8x32xbf16>
    %209 = vector.shape_cast %208 : vector<1x8x32xbf16> to vector<8x32xbf16>
    %210 = arith.truncf %190 : vector<16x8xf32> to vector<16x8xbf16>
    %cst_144 = arith.constant dense<0.000000e+00> : vector<16x32xf32>
    %211 = tpu.matmul %210, %209, %cst_144 {dimension_numbers = #tpu.dot_dimension_numbers<[1], [0], [0], [1], [0, 0, 1, 1], [], []>} : vector<16x8xbf16>, vector<8x32xbf16>, vector<16x32xf32> -> vector<16x32xf32>
    %212 = arith.addf %207, %211 : vector<16x32xf32>
    %c11 = arith.constant 11 : index
    %c0_145 = arith.constant 0 : index
    %c0_146 = arith.constant 0 : index
    %213 = vector.load %arg9[%c11, %c0_145, %c0_146] : memref<15x16x32xbf16, #tpu.memory_space<vmem>>, vector<1x16x32xbf16>
    %214 = vector.shape_cast %213 : vector<1x16x32xbf16> to vector<16x32xbf16>
    %215 = arith.truncf %186 : vector<16x16xf32> to vector<16x16xbf16>
    %cst_147 = arith.constant dense<0.000000e+00> : vector<16x32xf32>
    %216 = tpu.matmul %215, %214, %cst_147 {dimension_numbers = #tpu.dot_dimension_numbers<[1], [0], [0], [1], [0, 0, 1, 1], [], []>} : vector<16x16xbf16>, vector<16x32xbf16>, vector<16x32xf32> -> vector<16x32xf32>
    %c11_148 = arith.constant 11 : index
    %c0_149 = arith.constant 0 : index
    %c0_150 = arith.constant 0 : index
    %217 = vector.load %arg10[%c11_148, %c0_149, %c0_150] : memref<15x8x32xbf16, #tpu.memory_space<vmem>>, vector<1x8x32xbf16>
    %218 = vector.shape_cast %217 : vector<1x8x32xbf16> to vector<8x32xbf16>
    %219 = arith.truncf %190 : vector<16x8xf32> to vector<16x8xbf16>
    %cst_151 = arith.constant dense<0.000000e+00> : vector<16x32xf32>
    %220 = tpu.matmul %219, %218, %cst_151 {dimension_numbers = #tpu.dot_dimension_numbers<[1], [0], [0], [1], [0, 0, 1, 1], [], []>} : vector<16x8xbf16>, vector<8x32xbf16>, vector<16x32xf32> -> vector<16x32xf32>
    %221 = arith.addf %216, %220 : vector<16x32xf32>
    %c6_152 = arith.constant 6 : index
    %c0_153 = arith.constant 0 : index
    %c0_154 = arith.constant 0 : index
    %222 = vector.load %arg11[%c6_152, %c0_153, %c0_154] : memref<10x32x32xbf16, #tpu.memory_space<vmem>>, vector<1x32x32xbf16>
    %223 = vector.shape_cast %222 : vector<1x32x32xbf16> to vector<32x32xbf16>
    %224 = arith.truncf %194 : vector<16x32xf32> to vector<16x32xbf16>
    %cst_155 = arith.constant dense<0.000000e+00> : vector<16x32xf32>
    %225 = tpu.matmul %224, %223, %cst_155 {dimension_numbers = #tpu.dot_dimension_numbers<[1], [0], [0], [1], [0, 0, 1, 1], [], []>} : vector<16x32xbf16>, vector<32x32xbf16>, vector<16x32xf32> -> vector<16x32xf32>
    %c7_156 = arith.constant 7 : index
    %c0_157 = arith.constant 0 : index
    %c0_158 = arith.constant 0 : index
    %226 = vector.load %arg11[%c7_156, %c0_157, %c0_158] : memref<10x32x32xbf16, #tpu.memory_space<vmem>>, vector<1x32x32xbf16>
    %227 = vector.shape_cast %226 : vector<1x32x32xbf16> to vector<32x32xbf16>
    %228 = arith.truncf %194 : vector<16x32xf32> to vector<16x32xbf16>
    %cst_159 = arith.constant dense<0.000000e+00> : vector<16x32xf32>
    %229 = tpu.matmul %228, %227, %cst_159 {dimension_numbers = #tpu.dot_dimension_numbers<[1], [0], [0], [1], [0, 0, 1, 1], [], []>} : vector<16x32xbf16>, vector<32x32xbf16>, vector<16x32xf32> -> vector<16x32xf32>
    %230 = arith.addf %203, %225 : vector<16x32xf32>
    %231 = arith.addf %179, %230 : vector<16x32xf32>
    %232 = arith.addf %212, %229 : vector<16x32xf32>
    %233 = arith.addf %181, %232 : vector<16x32xf32>
    %234 = arith.addf %182, %221 : vector<16x32xf32>
    %235 = arith.truncf %186 : vector<16x16xf32> to vector<16x16xbf16>
    %cst_160 = arith.constant dense<0.000000e+00> : vector<16x16xf32>
    %236 = tpu.matmul %32, %235, %cst_160 {dimension_numbers = #tpu.dot_dimension_numbers<[0], [0], [1], [1], [0, 1, 1, 1], [], []>} : vector<16x16xbf16>, vector<16x16xbf16>, vector<16x16xf32> -> vector<16x16xf32>
    %237 = vector.broadcast %41 : vector<16x1xf32> to vector<16x16xf32>
    %238 = arith.mulf %236, %237 : vector<16x16xf32>
    %239 = arith.truncf %190 : vector<16x8xf32> to vector<16x8xbf16>
    %cst_161 = arith.constant dense<0.000000e+00> : vector<16x8xf32>
    %240 = tpu.matmul %32, %239, %cst_161 {dimension_numbers = #tpu.dot_dimension_numbers<[0], [0], [1], [1], [0, 1, 1, 1], [], []>} : vector<16x16xbf16>, vector<16x8xbf16>, vector<16x8xf32> -> vector<16x8xf32>
    %241 = vector.broadcast %41 : vector<16x1xf32> to vector<16x8xf32>
    %242 = arith.mulf %240, %241 : vector<16x8xf32>
    %243 = arith.truncf %194 : vector<16x32xf32> to vector<16x32xbf16>
    %cst_162 = arith.constant dense<0.000000e+00> : vector<16x32xf32>
    %244 = tpu.matmul %32, %243, %cst_162 {dimension_numbers = #tpu.dot_dimension_numbers<[0], [0], [1], [1], [0, 1, 1, 1], [], []>} : vector<16x16xbf16>, vector<16x32xbf16>, vector<16x32xf32> -> vector<16x32xf32>
    %245 = vector.broadcast %41 : vector<16x1xf32> to vector<16x32xf32>
    %246 = arith.mulf %244, %245 : vector<16x32xf32>
    %c12 = arith.constant 12 : index
    %c0_163 = arith.constant 0 : index
    %c0_164 = arith.constant 0 : index
    %247 = vector.load %arg9[%c12, %c0_163, %c0_164] : memref<15x16x32xbf16, #tpu.memory_space<vmem>>, vector<1x16x32xbf16>
    %248 = vector.shape_cast %247 : vector<1x16x32xbf16> to vector<16x32xbf16>
    %249 = arith.truncf %238 : vector<16x16xf32> to vector<16x16xbf16>
    %cst_165 = arith.constant dense<0.000000e+00> : vector<16x32xf32>
    %250 = tpu.matmul %249, %248, %cst_165 {dimension_numbers = #tpu.dot_dimension_numbers<[1], [0], [0], [1], [0, 0, 1, 1], [], []>} : vector<16x16xbf16>, vector<16x32xbf16>, vector<16x32xf32> -> vector<16x32xf32>
    %c12_166 = arith.constant 12 : index
    %c0_167 = arith.constant 0 : index
    %c0_168 = arith.constant 0 : index
    %251 = vector.load %arg10[%c12_166, %c0_167, %c0_168] : memref<15x8x32xbf16, #tpu.memory_space<vmem>>, vector<1x8x32xbf16>
    %252 = vector.shape_cast %251 : vector<1x8x32xbf16> to vector<8x32xbf16>
    %253 = arith.truncf %242 : vector<16x8xf32> to vector<16x8xbf16>
    %cst_169 = arith.constant dense<0.000000e+00> : vector<16x32xf32>
    %254 = tpu.matmul %253, %252, %cst_169 {dimension_numbers = #tpu.dot_dimension_numbers<[1], [0], [0], [1], [0, 0, 1, 1], [], []>} : vector<16x8xbf16>, vector<8x32xbf16>, vector<16x32xf32> -> vector<16x32xf32>
    %255 = arith.addf %250, %254 : vector<16x32xf32>
    %c13 = arith.constant 13 : index
    %c0_170 = arith.constant 0 : index
    %c0_171 = arith.constant 0 : index
    %256 = vector.load %arg9[%c13, %c0_170, %c0_171] : memref<15x16x32xbf16, #tpu.memory_space<vmem>>, vector<1x16x32xbf16>
    %257 = vector.shape_cast %256 : vector<1x16x32xbf16> to vector<16x32xbf16>
    %258 = arith.truncf %238 : vector<16x16xf32> to vector<16x16xbf16>
    %cst_172 = arith.constant dense<0.000000e+00> : vector<16x32xf32>
    %259 = tpu.matmul %258, %257, %cst_172 {dimension_numbers = #tpu.dot_dimension_numbers<[1], [0], [0], [1], [0, 0, 1, 1], [], []>} : vector<16x16xbf16>, vector<16x32xbf16>, vector<16x32xf32> -> vector<16x32xf32>
    %c13_173 = arith.constant 13 : index
    %c0_174 = arith.constant 0 : index
    %c0_175 = arith.constant 0 : index
    %260 = vector.load %arg10[%c13_173, %c0_174, %c0_175] : memref<15x8x32xbf16, #tpu.memory_space<vmem>>, vector<1x8x32xbf16>
    %261 = vector.shape_cast %260 : vector<1x8x32xbf16> to vector<8x32xbf16>
    %262 = arith.truncf %242 : vector<16x8xf32> to vector<16x8xbf16>
    %cst_176 = arith.constant dense<0.000000e+00> : vector<16x32xf32>
    %263 = tpu.matmul %262, %261, %cst_176 {dimension_numbers = #tpu.dot_dimension_numbers<[1], [0], [0], [1], [0, 0, 1, 1], [], []>} : vector<16x8xbf16>, vector<8x32xbf16>, vector<16x32xf32> -> vector<16x32xf32>
    %264 = arith.addf %259, %263 : vector<16x32xf32>
    %c14 = arith.constant 14 : index
    %c0_177 = arith.constant 0 : index
    %c0_178 = arith.constant 0 : index
    %265 = vector.load %arg9[%c14, %c0_177, %c0_178] : memref<15x16x32xbf16, #tpu.memory_space<vmem>>, vector<1x16x32xbf16>
    %266 = vector.shape_cast %265 : vector<1x16x32xbf16> to vector<16x32xbf16>
    %267 = arith.truncf %238 : vector<16x16xf32> to vector<16x16xbf16>
    %cst_179 = arith.constant dense<0.000000e+00> : vector<16x32xf32>
    %268 = tpu.matmul %267, %266, %cst_179 {dimension_numbers = #tpu.dot_dimension_numbers<[1], [0], [0], [1], [0, 0, 1, 1], [], []>} : vector<16x16xbf16>, vector<16x32xbf16>, vector<16x32xf32> -> vector<16x32xf32>
    %c14_180 = arith.constant 14 : index
    %c0_181 = arith.constant 0 : index
    %c0_182 = arith.constant 0 : index
    %269 = vector.load %arg10[%c14_180, %c0_181, %c0_182] : memref<15x8x32xbf16, #tpu.memory_space<vmem>>, vector<1x8x32xbf16>
    %270 = vector.shape_cast %269 : vector<1x8x32xbf16> to vector<8x32xbf16>
    %271 = arith.truncf %242 : vector<16x8xf32> to vector<16x8xbf16>
    %cst_183 = arith.constant dense<0.000000e+00> : vector<16x32xf32>
    %272 = tpu.matmul %271, %270, %cst_183 {dimension_numbers = #tpu.dot_dimension_numbers<[1], [0], [0], [1], [0, 0, 1, 1], [], []>} : vector<16x8xbf16>, vector<8x32xbf16>, vector<16x32xf32> -> vector<16x32xf32>
    %273 = arith.addf %268, %272 : vector<16x32xf32>
    %c8_184 = arith.constant 8 : index
    %c0_185 = arith.constant 0 : index
    %c0_186 = arith.constant 0 : index
    %274 = vector.load %arg11[%c8_184, %c0_185, %c0_186] : memref<10x32x32xbf16, #tpu.memory_space<vmem>>, vector<1x32x32xbf16>
    %275 = vector.shape_cast %274 : vector<1x32x32xbf16> to vector<32x32xbf16>
    %276 = arith.truncf %246 : vector<16x32xf32> to vector<16x32xbf16>
    %cst_187 = arith.constant dense<0.000000e+00> : vector<16x32xf32>
    %277 = tpu.matmul %276, %275, %cst_187 {dimension_numbers = #tpu.dot_dimension_numbers<[1], [0], [0], [1], [0, 0, 1, 1], [], []>} : vector<16x32xbf16>, vector<32x32xbf16>, vector<16x32xf32> -> vector<16x32xf32>
    %c9_188 = arith.constant 9 : index
    %c0_189 = arith.constant 0 : index
    %c0_190 = arith.constant 0 : index
    %278 = vector.load %arg11[%c9_188, %c0_189, %c0_190] : memref<10x32x32xbf16, #tpu.memory_space<vmem>>, vector<1x32x32xbf16>
    %279 = vector.shape_cast %278 : vector<1x32x32xbf16> to vector<32x32xbf16>
    %280 = arith.truncf %246 : vector<16x32xf32> to vector<16x32xbf16>
    %cst_191 = arith.constant dense<0.000000e+00> : vector<16x32xf32>
    %281 = tpu.matmul %280, %279, %cst_191 {dimension_numbers = #tpu.dot_dimension_numbers<[1], [0], [0], [1], [0, 0, 1, 1], [], []>} : vector<16x32xbf16>, vector<32x32xbf16>, vector<16x32xf32> -> vector<16x32xf32>
    %282 = arith.addf %255, %277 : vector<16x32xf32>
    %283 = arith.addf %231, %282 : vector<16x32xf32>
    %284 = arith.addf %264, %281 : vector<16x32xf32>
    %285 = arith.addf %233, %284 : vector<16x32xf32>
    %286 = arith.addf %234, %273 : vector<16x32xf32>
    %c0_192 = arith.constant 0 : index
    %c0_193 = arith.constant 0 : index
    %c0_194 = arith.constant 0 : index
    %287 = vector.load %arg13[%c0_192, %c0_193, %c0_194] : memref<3x1x32xf32, #tpu.memory_space<vmem>>, vector<1x1x32xf32>
    %288 = vector.shape_cast %287 : vector<1x1x32xf32> to vector<1x32xf32>
    %289 = vector.broadcast %288 : vector<1x32xf32> to vector<16x32xf32>
    %290 = arith.addf %283, %289 : vector<16x32xf32>
    %291 = arith.negf %290 : vector<16x32xf32>
    %292 = math.exp %291 : vector<16x32xf32>
    %cst_195 = arith.constant 1.000000e+00 : f32
    %293 = vector.broadcast %cst_195 : f32 to vector<16x32xf32>
    %294 = arith.addf %293, %292 : vector<16x32xf32>
    %295 = arith.divf %293, %294 : vector<16x32xf32>
    %c1_196 = arith.constant 1 : index
    %c0_197 = arith.constant 0 : index
    %c0_198 = arith.constant 0 : index
    %296 = vector.load %arg13[%c1_196, %c0_197, %c0_198] : memref<3x1x32xf32, #tpu.memory_space<vmem>>, vector<1x1x32xf32>
    %297 = vector.shape_cast %296 : vector<1x1x32xf32> to vector<1x32xf32>
    %298 = vector.broadcast %297 : vector<1x32xf32> to vector<16x32xf32>
    %299 = arith.addf %285, %298 : vector<16x32xf32>
    %300 = arith.negf %299 : vector<16x32xf32>
    %301 = math.exp %300 : vector<16x32xf32>
    %cst_199 = arith.constant 1.000000e+00 : f32
    %302 = vector.broadcast %cst_199 : f32 to vector<16x32xf32>
    %303 = arith.addf %302, %301 : vector<16x32xf32>
    %304 = arith.divf %302, %303 : vector<16x32xf32>
    %305 = arith.mulf %304, %29 : vector<16x32xf32>
    %c0_200 = arith.constant 0 : index
    %c0_201 = arith.constant 0 : index
    %c0_202 = arith.constant 0 : index
    %306 = vector.load %arg12[%c0_200, %c0_201, %c0_202] : memref<5x32x32xbf16, #tpu.memory_space<vmem>>, vector<1x32x32xbf16>
    %307 = vector.shape_cast %306 : vector<1x32x32xbf16> to vector<32x32xbf16>
    %308 = arith.truncf %305 : vector<16x32xf32> to vector<16x32xbf16>
    %cst_203 = arith.constant dense<0.000000e+00> : vector<16x32xf32>
    %309 = tpu.matmul %308, %307, %cst_203 {dimension_numbers = #tpu.dot_dimension_numbers<[1], [0], [0], [1], [0, 0, 1, 1], [], []>} : vector<16x32xbf16>, vector<32x32xbf16>, vector<16x32xf32> -> vector<16x32xf32>
    %310 = arith.addf %286, %309 : vector<16x32xf32>
    %311 = arith.truncf %305 : vector<16x32xf32> to vector<16x32xbf16>
    %cst_204 = arith.constant dense<0.000000e+00> : vector<16x32xf32>
    %312 = tpu.matmul %32, %311, %cst_204 {dimension_numbers = #tpu.dot_dimension_numbers<[1], [0], [0], [1], [0, 0, 1, 1], [], []>} : vector<16x16xbf16>, vector<16x32xbf16>, vector<16x32xf32> -> vector<16x32xf32>
    %313 = vector.broadcast %38 : vector<16x1xf32> to vector<16x32xf32>
    %314 = arith.mulf %312, %313 : vector<16x32xf32>
    %c1_205 = arith.constant 1 : index
    %c0_206 = arith.constant 0 : index
    %c0_207 = arith.constant 0 : index
    %315 = vector.load %arg12[%c1_205, %c0_206, %c0_207] : memref<5x32x32xbf16, #tpu.memory_space<vmem>>, vector<1x32x32xbf16>
    %316 = vector.shape_cast %315 : vector<1x32x32xbf16> to vector<32x32xbf16>
    %317 = arith.truncf %314 : vector<16x32xf32> to vector<16x32xbf16>
    %cst_208 = arith.constant dense<0.000000e+00> : vector<16x32xf32>
    %318 = tpu.matmul %317, %316, %cst_208 {dimension_numbers = #tpu.dot_dimension_numbers<[1], [0], [0], [1], [0, 0, 1, 1], [], []>} : vector<16x32xbf16>, vector<32x32xbf16>, vector<16x32xf32> -> vector<16x32xf32>
    %319 = arith.addf %310, %318 : vector<16x32xf32>
    %320 = arith.truncf %314 : vector<16x32xf32> to vector<16x32xbf16>
    %cst_209 = arith.constant dense<0.000000e+00> : vector<16x32xf32>
    %321 = tpu.matmul %32, %320, %cst_209 {dimension_numbers = #tpu.dot_dimension_numbers<[1], [0], [0], [1], [0, 0, 1, 1], [], []>} : vector<16x16xbf16>, vector<16x32xbf16>, vector<16x32xf32> -> vector<16x32xf32>
    %322 = vector.broadcast %38 : vector<16x1xf32> to vector<16x32xf32>
    %323 = arith.mulf %321, %322 : vector<16x32xf32>
    %c2_210 = arith.constant 2 : index
    %c0_211 = arith.constant 0 : index
    %c0_212 = arith.constant 0 : index
    %324 = vector.load %arg12[%c2_210, %c0_211, %c0_212] : memref<5x32x32xbf16, #tpu.memory_space<vmem>>, vector<1x32x32xbf16>
    %325 = vector.shape_cast %324 : vector<1x32x32xbf16> to vector<32x32xbf16>
    %326 = arith.truncf %323 : vector<16x32xf32> to vector<16x32xbf16>
    %cst_213 = arith.constant dense<0.000000e+00> : vector<16x32xf32>
    %327 = tpu.matmul %326, %325, %cst_213 {dimension_numbers = #tpu.dot_dimension_numbers<[1], [0], [0], [1], [0, 0, 1, 1], [], []>} : vector<16x32xbf16>, vector<32x32xbf16>, vector<16x32xf32> -> vector<16x32xf32>
    %328 = arith.addf %319, %327 : vector<16x32xf32>
    %329 = arith.truncf %305 : vector<16x32xf32> to vector<16x32xbf16>
    %cst_214 = arith.constant dense<0.000000e+00> : vector<16x32xf32>
    %330 = tpu.matmul %32, %329, %cst_214 {dimension_numbers = #tpu.dot_dimension_numbers<[0], [0], [1], [1], [0, 1, 1, 1], [], []>} : vector<16x16xbf16>, vector<16x32xbf16>, vector<16x32xf32> -> vector<16x32xf32>
    %331 = vector.broadcast %41 : vector<16x1xf32> to vector<16x32xf32>
    %332 = arith.mulf %330, %331 : vector<16x32xf32>
    %c3_215 = arith.constant 3 : index
    %c0_216 = arith.constant 0 : index
    %c0_217 = arith.constant 0 : index
    %333 = vector.load %arg12[%c3_215, %c0_216, %c0_217] : memref<5x32x32xbf16, #tpu.memory_space<vmem>>, vector<1x32x32xbf16>
    %334 = vector.shape_cast %333 : vector<1x32x32xbf16> to vector<32x32xbf16>
    %335 = arith.truncf %332 : vector<16x32xf32> to vector<16x32xbf16>
    %cst_218 = arith.constant dense<0.000000e+00> : vector<16x32xf32>
    %336 = tpu.matmul %335, %334, %cst_218 {dimension_numbers = #tpu.dot_dimension_numbers<[1], [0], [0], [1], [0, 0, 1, 1], [], []>} : vector<16x32xbf16>, vector<32x32xbf16>, vector<16x32xf32> -> vector<16x32xf32>
    %337 = arith.addf %328, %336 : vector<16x32xf32>
    %338 = arith.truncf %332 : vector<16x32xf32> to vector<16x32xbf16>
    %cst_219 = arith.constant dense<0.000000e+00> : vector<16x32xf32>
    %339 = tpu.matmul %32, %338, %cst_219 {dimension_numbers = #tpu.dot_dimension_numbers<[0], [0], [1], [1], [0, 1, 1, 1], [], []>} : vector<16x16xbf16>, vector<16x32xbf16>, vector<16x32xf32> -> vector<16x32xf32>
    %340 = vector.broadcast %41 : vector<16x1xf32> to vector<16x32xf32>
    %341 = arith.mulf %339, %340 : vector<16x32xf32>
    %c4_220 = arith.constant 4 : index
    %c0_221 = arith.constant 0 : index
    %c0_222 = arith.constant 0 : index
    %342 = vector.load %arg12[%c4_220, %c0_221, %c0_222] : memref<5x32x32xbf16, #tpu.memory_space<vmem>>, vector<1x32x32xbf16>
    %343 = vector.shape_cast %342 : vector<1x32x32xbf16> to vector<32x32xbf16>
    %344 = arith.truncf %341 : vector<16x32xf32> to vector<16x32xbf16>
    %cst_223 = arith.constant dense<0.000000e+00> : vector<16x32xf32>
    %345 = tpu.matmul %344, %343, %cst_223 {dimension_numbers = #tpu.dot_dimension_numbers<[1], [0], [0], [1], [0, 0, 1, 1], [], []>} : vector<16x32xbf16>, vector<32x32xbf16>, vector<16x32xf32> -> vector<16x32xf32>
    %346 = arith.addf %337, %345 : vector<16x32xf32>
    %c2_224 = arith.constant 2 : index
    %c0_225 = arith.constant 0 : index
    %c0_226 = arith.constant 0 : index
    %347 = vector.load %arg13[%c2_224, %c0_225, %c0_226] : memref<3x1x32xf32, #tpu.memory_space<vmem>>, vector<1x1x32xf32>
    %348 = vector.shape_cast %347 : vector<1x1x32xf32> to vector<1x32xf32>
    %349 = vector.broadcast %348 : vector<1x32xf32> to vector<16x32xf32>
    %350 = arith.addf %346, %349 : vector<16x32xf32>
    %351 = math.tanh %350 : vector<16x32xf32>
    %352 = arith.mulf %295, %29 : vector<16x32xf32>
    %cst_227 = arith.constant 1.000000e+00 : f32
    %353 = vector.broadcast %cst_227 : f32 to vector<16x32xf32>
    %354 = arith.subf %353, %295 : vector<16x32xf32>
    %355 = arith.mulf %354, %351 : vector<16x32xf32>
    %356 = arith.addf %352, %355 : vector<16x32xf32>
    %c0_228 = arith.constant 0 : index
    %c0_229 = arith.constant 0 : index
    %c0_230 = arith.constant 0 : index
    %357 = vector.load %arg14[%c0_228, %c0_229, %c0_230] : memref<1x16x32xf32, #tpu.memory_space<vmem>>, vector<1x16x32xf32>
    %358 = vector.shape_cast %357 : vector<1x16x32xf32> to vector<16x32xf32>
    %359 = vector.shape_cast %356 : vector<16x32xf32> to vector<1x16x32xf32>
    tpu.vector_store %arg14[%c0_228, %c0_229, %c0_230], %359 {strides = array<i32>} : memref<1x16x32xf32, #tpu.memory_space<vmem>>, vector<1x16x32xf32>,
    return
  }
  func.func @transform_0(%arg0: i32, %arg1: i32) -> (i32, i32, i32, i32) {
    %c0_i32 = arith.constant 0 : i32
    %c0_i32_0 = arith.constant 0 : i32
    %c0_i32_1 = arith.constant 0 : i32
    %c0_i32_2 = arith.constant 0 : i32
    return %arg0, %c0_i32, %c0_i32_0, %c0_i32_1 : i32, i32, i32, i32
  }
  func.func @transform_1(%arg0: i32, %arg1: i32) -> (i32, i32, i32, i32) {
    %c0_i32 = arith.constant 0 : i32
    %c0_i32_0 = arith.constant 0 : i32
    %c0_i32_1 = arith.constant 0 : i32
    return %arg0, %arg1, %c0_i32, %c0_i32_0 : i32, i32, i32, i32
  }
  func.func @transform_2(%arg0: i32, %arg1: i32) -> (i32, i32) {
    %c0_i32 = arith.constant 0 : i32
    %c0_i32_0 = arith.constant 0 : i32
    %c0_i32_1 = arith.constant 0 : i32
    return %c0_i32, %c0_i32_0 : i32, i32
  }
  func.func @transform_3(%arg0: i32, %arg1: i32) -> (i32, i32) {
    %c0_i32 = arith.constant 0 : i32
    %c0_i32_0 = arith.constant 0 : i32
    %c0_i32_1 = arith.constant 0 : i32
    return %c0_i32, %c0_i32_0 : i32, i32
  }
  func.func @transform_4(%arg0: i32, %arg1: i32) -> (i32, i32, i32) {
    %c0_i32 = arith.constant 0 : i32
    %c0_i32_0 = arith.constant 0 : i32
    %c0_i32_1 = arith.constant 0 : i32
    return %arg0, %c0_i32, %c0_i32_0 : i32, i32, i32
  }
  func.func @transform_5(%arg0: i32, %arg1: i32) -> (i32, i32, i32) {
    %c0_i32 = arith.constant 0 : i32
    %c0_i32_0 = arith.constant 0 : i32
    %c0_i32_1 = arith.constant 0 : i32
    %c0_i32_2 = arith.constant 0 : i32
    return %c0_i32, %c0_i32_0, %c0_i32_1 : i32, i32, i32
  }
  func.func @transform_6(%arg0: i32, %arg1: i32) -> (i32, i32) {
    %c0_i32 = arith.constant 0 : i32
    %c0_i32_0 = arith.constant 0 : i32
    %c0_i32_1 = arith.constant 0 : i32
    return %c0_i32, %c0_i32_0 : i32, i32
  }
  func.func @transform_7(%arg0: i32, %arg1: i32) -> (i32, i32, i32) {
    %c0_i32 = arith.constant 0 : i32
    %c0_i32_0 = arith.constant 0 : i32
    %c0_i32_1 = arith.constant 0 : i32
    %c0_i32_2 = arith.constant 0 : i32
    return %c0_i32, %c0_i32_0, %c0_i32_1 : i32, i32, i32
  }
  func.func @transform_8(%arg0: i32, %arg1: i32) -> (i32, i32, i32) {
    %c0_i32 = arith.constant 0 : i32
    %c0_i32_0 = arith.constant 0 : i32
    %c0_i32_1 = arith.constant 0 : i32
    %c0_i32_2 = arith.constant 0 : i32
    return %c0_i32, %c0_i32_0, %c0_i32_1 : i32, i32, i32
  }
  func.func @transform_9(%arg0: i32, %arg1: i32) -> (i32, i32, i32) {
    %c0_i32 = arith.constant 0 : i32
    %c0_i32_0 = arith.constant 0 : i32
    %c0_i32_1 = arith.constant 0 : i32
    %c0_i32_2 = arith.constant 0 : i32
    return %c0_i32, %c0_i32_0, %c0_i32_1 : i32, i32, i32
  }
  func.func @transform_10(%arg0: i32, %arg1: i32) -> (i32, i32, i32) {
    %c0_i32 = arith.constant 0 : i32
    %c0_i32_0 = arith.constant 0 : i32
    %c0_i32_1 = arith.constant 0 : i32
    %c0_i32_2 = arith.constant 0 : i32
    return %c0_i32, %c0_i32_0, %c0_i32_1 : i32, i32, i32
  }
  func.func @transform_11(%arg0: i32, %arg1: i32) -> (i32, i32, i32) {
    %c0_i32 = arith.constant 0 : i32
    %c0_i32_0 = arith.constant 0 : i32
    %c0_i32_1 = arith.constant 0 : i32
    %c0_i32_2 = arith.constant 0 : i32
    return %c0_i32, %c0_i32_0, %c0_i32_1 : i32, i32, i32
  }
  func.func @transform_12(%arg0: i32, %arg1: i32) -> (i32, i32, i32) {
    %c0_i32 = arith.constant 0 : i32
    %c0_i32_0 = arith.constant 0 : i32
    %c0_i32_1 = arith.constant 0 : i32
    return %arg0, %c0_i32, %c0_i32_0 : i32, i32, i32
  }
}

</mosaic_0001>

<bundles_post_ra>
// kernel: oddcrnn_forward.2
= control target key start
LH: loop header
LB: loop body
LE: loop exit
PB: predicated region body
PF: predicated region fallthrough
CT: control target
= control target key end

     0   :  { %s6337_s0 = inlined_call_operand.vmem [shape: f32[2,4,16,2], index: 0, kind: input, shape index: {}]   ;;  %s6338_s1 = inlined_call_operand.vmem [shape: bf16[2,4,16,16], index: 1, kind: input, shape index: {}]   ;;  %s6339_s2 = inlined_call_operand.vmem [shape: bf16[16,16], index: 2, kind: input, shape index: {}]   ;;  %s6340_s3 = inlined_call_operand.vmem [shape: f32[16,8], index: 3, kind: input, shape index: {}]   ;;  %s6341_s4 = inlined_call_operand.vmem [shape: f32[2,16,32], index: 4, kind: input, shape index: {}]   ;;  %s6342_s5 = inlined_call_operand.vmem [shape: bf16[3,2,16], index: 5, kind: input, shape index: {}]   ;;  %s6343_s6 = inlined_call_operand.vmem [shape: f32[1,16], index: 6, kind: input, shape index: {}]   ;;  %s6344_s7 = inlined_call_operand.vmem [shape: bf16[15,16,32], index: 7, kind: input, shape index: {}]   ;;  %s6345_s8 = inlined_call_operand.vmem [shape: bf16[15,8,32], index: 8, kind: input, shape index: {}]   ;;  %s6346_s9 = inlined_call_operand.vmem [shape: bf16[10,32,32], index: 9, kind: input, shape index: {}]   ;;  %s6347_s10 = inlined_call_operand.vmem [shape: bf16[5,32,32], index: 10, kind: input, shape index: {}]   ;;  %s6348_s11 = inlined_call_operand.vmem [shape: f32[3,1,32], index: 11, kind: input, shape index: {}]   ;;  %s6349_s12 = inlined_call_operand.vmem [shape: f32[2,4,16,16], index: 12, kind: output, shape index: {0}]   ;;  %s6350_s13 = inlined_call_operand.hbm [shape: f32[2,16,32], index: 13, kind: output, shape index: {1}]  }
   0x1   :  { %6370 = sst [smem:[#allocation17_spill]] %s6340_s3 }
   0x2   :  { %6371 = sst [smem:[#allocation18_spill]] %s6344_s7 }
   0x3   :  { %6372 = sst [smem:[#allocation19_spill]] %s6346_s9 }
   0x4   :  { %6373 = sst [smem:[#allocation20_spill]] %s6347_s10 }
   0x5   :  { %6374 = sst [smem:[#allocation21_spill]] %s6348_s11 }
   0x6   :  { %6375 = sst [smem:[#allocation22_spill]] %s6350_s13 }
   0x7   :  { %19 = vsyncpa [#allocation3], 0 }
   0x8   :  { %21 = vsyncpa [#allocation3 + $0x1], 0  ;;  %s5450_s25 = smov 0   ;;  %s5452_s26 = smov 0  }
   0x9   :  { %s5454_s27 = smov 0   ;;  %s5456_s28 = smov 0  }
   0xa   :  { %s5458_s29 = smov 0   ;;  %s5460_s30 = smov 0  }
   0xb   :  { %s5462_s14 = smov 0   ;;  %s5464_s15 = smov 0  }
   0xc LB: > { %6376 = sst [smem:[#allocation5_spill]] %s5343_s25  ;;  %s4286_s16 = sadd.s32 4294967295, %s5371_s15   ;;  %s5371_s15 = sphi %s5464_s15, %s27_s15   ;;  %s5367_s14 = sphi %s5462_s14, %s6410_s14   ;;  %s5363_s30 = sphi %s5460_s30, %s6409_s30   ;;  %s5359_s29 = sphi %s5458_s29, %s6408_s29   ;;  %s5355_s28 = sphi %s5456_s28, %s6407_s28   ;;  %s5351_s27 = sphi %s5454_s27, %s6406_s27   ;;  %s5347_s26 = sphi %s5452_s26, %s6405_s26   ;;  %s5343_s25 = sphi %s5450_s25, %s6404_s25  }
   0xd   : > { %6377 = sst [smem:[#allocation6_spill]] %s5347_s26  ;;  %s4287_s17 = sadd.s32 4294967294, %s5371_s15  }
   0xe   : > { %6378 = sst [smem:[#allocation7_spill]] %s5351_s27  ;;  %s36_s18 = sadd.s32 1, %s5363_s30 }
   0xf   : > { %6379 = sst [smem:[#allocation8_spill]] %s5359_s29  ;;  %p37_p0 = scmp.ge.s32.totalorder %s36_s18, 4 }
  0x10   : > { %6380 = sst [smem:[#allocation9_spill]] %s5363_s30  ;;  %s39_s19 = sadd.s32 1, %s5367_s14 }
  0x11   : > { %6381 = sst [smem:[#allocation10_spill]] %s5367_s14  ;;  %p351_p1 = scmp.ne.s32.totalorder %s5351_s27, %s5347_s26 }
  0x12   : > { %6382 = sst [smem:[#allocation11_spill]] %s5371_s15  ;;  %p352_p2 = scmp.eq.s32.totalorder %s4286_s16, 7 }
  0x13   : > { %s6412_s18 = smov (%p37_p0, %s36_s18), 0  ;;  %s6414_s19 = smov (!%p37_p0, %s39_s19), %s5367_s14 }
  0x14   : > { %6383 = sst [smem:[#allocation12_spill]] %s6412_s18  ;;  %p5499_p3 = por %p352_p2, %p351_p1 }
  0x15   : > { %p357_p4 = scmp.ne.s32.totalorder %s5347_s26, %s5343_s25  ;;  %p41_p5 = scmp.ge.s32.totalorder %s6414_s19, 2 }
  0x16   : > { %s6384_s20 = scalar_select %p5499_p3, 1, 0 }
  0x17   : > { %p358_p6 = scmp.eq.s32.totalorder %s4287_s17, 7  ;;  %p4290_p7 = scmp.ge.s32.totalorder %s5371_s15, 1 }
  0x18   : > { %6385 = sst [smem:[#allocation13_spill]] %s6384_s20  ;;  %p431_p8 = scmp.lt.s32.totalorder %s5371_s15, 9 }
  0x19   : > { %s6416_s19 = smov (%p41_p5, %s6414_s19), 0  ;;  %p5509_p9 = por %p358_p6, %p357_p4 }
  0x1a   : > { %6386 = sst [smem:[#allocation14_spill]] %s6416_s19  ;;  %p432_p10 = pnand %p4290_p7, %p431_p8 }
  0x1b   : > { %s6387_s21 = scalar_select %p5509_p9, 1, 0 }
  0x1c   : > { %s338_s22 = ssub.s32 %s5367_s14, %s6416_s19  ;;  %s341_s23 = sadd.s32 1, %s5351_s27 }
  0x1d   : > { %6388 = sst [smem:[#allocation15_spill]] %s6387_s21  ;;  %p339_p11 = scmp.eq.s32.totalorder %s338_s22, 0 }
  0x1e   : > { %435 = sbr.rel (%p432_p10) target bundleno = 2814 (0xafe), region = 68  ;;  %s6353_s16 = sand.u32 (!%p432_p10), 1, %s5347_s26  }
  0x1f   : > { %s5517_s24 = scalar_select %p339_p11, %s5351_s27, %s341_s23  }
  0x20   : > { %p494_p12 = scmp.lt.s32.totalorder (!%p432_p10), %s5359_s29, 1  ;;  %s5523_s17 = sshll.u32 (!%p432_p10), %s6353_s16, 4 }
  0x21   : > { %6389 = sst [smem:[#allocation16_spill]] %s5517_s24  ;;  %p501_p13 = scmp.lt.s32.totalorder (!%p432_p10), %s5355_s28, 3 }
  0x22   : > { %s4301_s22 = sshll.u32 (!%p432_p10), %s5355_s28, 4  ;;  %p4311_p0 = scmp.ne.s32.totalorder (!%p432_p10), %s5355_s28, 0 }
  0x23   : > { %v5373_v0 = vmov 0.0   ;;  %vm5374_vm0 = vmmov 0   ;;  %s495_s23 = scalar_select %p494_p12, %s5359_s29, 1  ;;  %v5199_v4 = vld [vmem:[%s6339_s2] sm:$0xff]   ;;  %vm532_vm1 = vcmask 130048   ;;  %vm626_vm2 = vcmask 1040384  }
  0x24   : > { %4684 = vmatprep.subr.bf16.mxu0 %v5373_v0  ;;  %4686 = vmatprep.mubr.msk.bf16.mxu0 %vm5374_vm0, %v5373_v0  ;;  %s502_s19 = scalar_select %p501_p13, %s5355_s28, 3  ;;  %v4305_v5 = vld [vmem:[%s6342_s5 + $0x1] sm:$0x1]  ;;  %vm622_vm3 = vcmask 15360   ;;  %v619_v11 = vld [vmem:[%s6342_s5] sm:$0x1] }
  0x25   : > { %4690 = vmatprep.subr.bf16.mxu1 %v5373_v0  ;;  %4692 = vmatprep.mubr.msk.bf16.mxu1 %vm5374_vm0, %v5373_v0  ;;  %s4529_s18 = sshll.u32 %s495_s23, 6  ;;  %s4295_s14 = sshll.u32 %s495_s23, 3  ;;  %v628_v6 = vsel %vm626_vm2, %v4305_v5, 0  ;;  %v675_v13 = vsel %vm626_vm2, %v619_v11, 0  ;;  %v4308_v14 = vld [vmem:[%s6342_s5 + $0x2] sm:$0x1] }
  0x26   : > { %s498_s24 = scalar_lea.vmem %s6337_s0, %s4529_s18  ;;  %s4294_s27 = sshll.u32 %s502_s19, 1  ;;  %v725_v15 = vsel %vm626_vm2, %v4308_v14, 0  ;;  %v4310_v32 = vld [vmem:[%s6343_s6] ss:$0 sm:$0xff] }
  0x27   : > { %s505_s21 = sadd.s32 %s4295_s14, %s4294_s27  ;;  %s4530_s25 = sshll.u32 %s495_s23, 4 }
  0x28   : > { %s4296_s15 = sshll.u32 %s505_s21, 2  ;;  %s5541_s26 = scalar_lea.vmem %s6341_s4, %s4530_s25 }
  0x29   : > { %s5546_s29 = scalar_lea.vmem %s6338_s1, %s4296_s15  ;;  %s517_s3 = scalar_lea.vmem %s6349_s12, %s4529_s18 }
  0x2a   : > { %s523_s30 = scalar_lea.vmem %s498_s24, %s4301_s22  ;;  %s5551_s16 = scalar_lea.vmem %s517_s3, %s4301_s22 }
  0x2b   : > { %v524_v1 = vld [vmem:[%s523_s30] sm:$0xff]  ;;  %v525_v2 = vld [vmem:[%s523_s30 + $0x8] sm:$0xff]  ;;  %s5590_s18 = scalar_lea.vmem [#allocation2], %s5523_s17 }
  0x2c   : > { %v526_v3 = vpack.c.bf16 %v525_v2, %v524_v1 }
  0x2e   : > { %4685 = vmatpush3.bf16.msra.mxu0 %v526_v3 }
  0x2f   : > { %4696 = vmatprep.subr.bf16.mxu0 %v5373_v0 }
  0x31   : > { %4687 = vmatmul.mubr.msk.bf16.vlgmr.msra.gmra.mxu0 %vm532_vm1, %v5199_v4 }
  0x32   : > { %4698 = vmatprep.mubr.msk.bf16.mxu0 %vm5374_vm0, %v5373_v0  ;;  %4697 = vmatpush3.bf16.msra.mxu0 %v628_v6 }
  0x33   : > { %4708 = vmatprep.subr.bf16.mxu0 %v5373_v0 }
  0xf1   : > { %v570_v7 = vpop.f32.mrf.mxu0 }
  0xf3   : > { %v4688_v8 = vpop.f32.mrf.mxu0 }
  0xf5   : > { %v573_v9 = vpop.f32.mrf.mxu0 }
  0xf6   : > { %v577_v10 = vpack.c.bf16 %v573_v9, %v570_v7 }
  0xf7   : > { %v4689_v12 = vpop.f32.mrf.mxu0 }
  0xf8   : > { %4691 = vmatpush3.bf16.msra.mxu1 %v577_v10  ;;  %4699 = vmatmul.mubr.msk.bf16.vlgmr.msra.gmra.mxu0 %vm622_vm3, %v577_v10 }
  0xf9   : > { %4702 = vmatprep.subr.bf16.mxu1 %v5373_v0  ;;  %4710 = vmatprep.mubr.msk.bf16.mxu0 %vm5374_vm0, %v5373_v0 }
  0xfa   : > { %4709 = vmatpush3.bf16.msra.mxu0 %v725_v15 }
  0xfb   : > { %4693 = vmatmul.mubr.msk.bf16.vlgmr.msra.gmra.mxu1 %vm532_vm1, %v5199_v4 }
  0xfc   : > { %4703 = vmatpush3.bf16.msra.mxu1 %v675_v13  ;;  %4704 = vmatprep.mubr.msk.bf16.mxu1 %vm5374_vm0, %v5373_v0 }
 0x103   : > { %4705 = vmatmul.mubr.msk.bf16.vlgmr.msra.gmra.mxu1 %vm622_vm3, %v526_v3 }
 0x1b8   : > { %v664_v16 = vpop.f32.mrf.mxu0 }
 0x1ba   : > { %v4700_v17 = vpop.f32.mrf.mxu0 }
 0x1bb   : > { %v612_v18 = vpop.f32.mrf.mxu1 }
 0x1bc   : > { %v667_v19 = vpop.f32.mrf.mxu0 }
 0x1bd   : > { %v4694_v20 = vpop.f32.mrf.mxu1 }
 0x1be   : > { %v4701_v21 = vpop.f32.mrf.mxu0 }
 0x1bf   : > { %v615_v22 = vpop.f32.mrf.mxu1 }
 0x1c0   : > { %v720_v23 = vpack.c.bf16 %v615_v22, %v612_v18 }
 0x1c1   : > { %v4695_v24 = vpop.f32.mrf.mxu1 }
 0x1c2   : > { %4711 = vmatmul.mubr.msk.bf16.vlgmr.msra.gmra.mxu0 %vm622_vm3, %v720_v23 }
 0x1c3   : > { %v711_v25 = vpop.f32.mrf.mxu1 }
 0x1c4   : > { %v712_v26 = vadd.f32 %v711_v25, %v664_v16 }
 0x1c5   : > { %v4706_v27 = vpop.f32.mrf.mxu1 }
 0x1c7   : > { %v714_v28 = vpop.f32.mrf.mxu1 }
 0x1c8   : > { %v715_v29 = vadd.f32 %v714_v28, %v667_v19 }
 0x1c9   : > { %v4707_v30 = vpop.f32.mrf.mxu1 }
 0x282   : > { %v761_v31 = vpop.f32.mrf.mxu0 }
 0x283   : > { %v768_v33 = vadd.f32 %v761_v31, %v712_v26 }
 0x284   : > { %v4712_v34 = vpop.f32.mrf.mxu0 }
 0x285   : > { %v777_v35 = vadd.f32 %v4310_v32, %v768_v33 }
 0x286   : > { %v764_v36 = vpop.f32.mrf.mxu0 }
 0x287   : > { %780 = vst.msk [vmem:[%s5551_s16] sm:$0xff] %vm532_vm1, %v777_v35  ;;  %v769_v37 = vadd.f32 %v764_v36, %v715_v29  ;;  %785 = sbr.rel (%p4311_p0) target bundleno = 654 (0x28e), region = 72 }
 0x288   : > { %v4713_v38 = vpop.f32.mrf.mxu0 }
 0x289   : > { %v778_v39 = vadd.f32 %v4310_v32, %v769_v37 }
 0x28b   : > { %781 = vst.msk [vmem:[%s5551_s16 + $0x8] sm:$0xff] %vm532_vm1, %v778_v39 }
 0x28c   : > { %v786_v40 = vld [vmem:[%s5541_s26] sm:$0xff]  ;;  %vm788_vm4 = vcmask 261120   ;;  %v787_v41 = vld [vmem:[%s5541_s26 + $0x8] sm:$0xff] }
 0x28d   : > { %789 = vst.msk [vmem:[%s5590_s18] sm:$0xff] %vm788_vm4, %v786_v40  ;;  %790 = vst.msk [vmem:[%s5590_s18 + $0x8] sm:$0xff] %vm788_vm4, %v787_v41 }
 0x28e PF: > { %4714 = vmatprep.subr.bf16.mxu1 %v5373_v0  ;;  %4716 = vmatprep.mubr.msk.bf16.mxu1 %vm5374_vm0, %v5373_v0  ;;  %v5375_v42 = vmov 1065369472   ;;  %v5601_v43 = vld [vmem:[%s5546_s29] sm:$0xff]   ;;  %vm920_vm5 = vcmask 1043456   ;;  %s6390_s21 = sld [smem:[#allocation17_spill]]  ;;  %vm916_vm6 = vcmask 64512   ;;  %v5660_v58 = vpack.c.bf16 %v778_v39, %v777_v35 }
 0x28f   : > { %4715 = vmatpush3.bf16.msra.mxu1 %v5375_v42  ;;  %v914_v44 = vld [vmem:[%s6345_s8] sm:$0xf]  ;;  %4720 = vmatprep.subr.bf16.mxu0 %v5373_v0  ;;  %v4320_v48 = vld [vmem:[%s6345_s8 + $0x4] sm:$0xf]  ;;  %v4326_v49 = vld [vmem:[%s6345_s8 + $0x8] sm:$0xf] }
 0x290   : > { %4726 = vmatprep.subr.bf16.mxu1 %v5373_v0  ;;  %v922_v45 = vsel %vm920_vm5, %v914_v44, 0  ;;  %4721 = vmatpush3.bf16.msra.mxu0 %v5375_v42  ;;  %v1021_v51 = vsel %vm920_vm5, %v4320_v48, 0  ;;  %v1117_v52 = vsel %vm920_vm5, %v4326_v49, 0  ;;  %s6391_s7 = sld [smem:[#allocation19_spill]]  ;;  %vm1224_vm7 = vcmask 261120   ;;  %s4151_s14 = sshll.u32 %s5590_s18, 4  ;;  %s6280_s14 = int_to_ptr.vmem [resolvable:$true] %s4151_s14 }
 0x291   : > { %849 = vxpose.xlu0.c.b16.start.end [1/1] (short) (narrow) %v5601_v43, 16  ;;  %4722 = vmatprep.mubr.msk.bf16.mxu0 %vm5374_vm0, %v5373_v0  ;;  %v5376_v59 = vmov 0   ;;  %s6392_s13 = sld [smem:[#allocation18_spill]]  ;;  %v4345_v15 = vld [vmem:[%s6345_s8 + $0xc] sm:$0xf]  ;;  %s5279_s28 = scalar_lea.vmem %s6280_s14, 256 }
 0x292   : > { %4717 = vmatmul.mubr.msk.bf16.vlgmr.msra.gmra.mxu1 %vm532_vm1, %v5601_v43  ;;  %4732 = vmatprep.subr.bf16.mxu0 %v5373_v0  ;;  %v1481_v18 = vsel %vm920_vm5, %v4345_v15, 0  ;;  %s6393_s25 = sld [smem:[#allocation20_spill]]  ;;  %p5280_p1 = scmp.ne.s32.totalorder %s6280_s14, %s5279_s28 }
 0x293   : > { %4727 = vmatpush3.bf16.msra.mxu1 %v922_v45  ;;  %4728 = vmatprep.mubr.msk.bf16.mxu1 %vm5374_vm0, %v5373_v0  ;;  %s6395_s24 = sld [smem:[#allocation21_spill]]  ;;  %s5377_s26 = smov [#allocation2]  }
 0x294   : > { %v793_v46 = vld [vmem:[%s6390_s21] sm:$0xff]  ;;  %v794_v47 = vld [vmem:[%s6390_s21 + $0x8] sm:$0xff]  ;;  %4738 = vmatprep.subr.bf16.mxu1 %v5373_v0  ;;  %5201 = vset.pattern.permute.xlu1 %v5376_v59  ;;  %s6396_s30 = sld [smem:[#allocation8_spill]]  ;;  %p5281_p2 = pnand %p5280_p1, %p5499_p3 }
 0x295   : > { %v5630_v50 = vpack.c.bf16 %v794_v47, %v793_v46  ;;  %v791_v55 = vld [vmem:[%s5590_s18] sm:$0xff]  ;;  %v792_v56 = vld [vmem:[%s5590_s18 + $0x8] sm:$0xff]  ;;  %s6399_s10 = sld [smem:[#allocation22_spill]]  ;;  %s5283_s20 = sshll.u32 %s5377_s26, 4  ;;  %s5284_s20 = int_to_ptr.vmem [resolvable:$false] %s5283_s20 }
 0x296   : > { %v5203_v53 = vld [vmem:[%s6391_s7 + $0x8] sm:$0xff]   ;;  %v5205_v54 = vld [vmem:[%s6391_s7] sm:$0xff]   ;;  %v5657_v57 = vpack.c.bf16 %v792_v56, %v791_v55  ;;  %v5208_v1 = vld [vmem:[%s6391_s7 + $0x18] sm:$0xff]   ;;  %p5282_p4 = pneg %p5281_p2  ;;  %s5285_s17 = scalar_lea.vmem %s5284_s20, 512 }
 0x297   : > { %v5204_v60 = vld [vmem:[%s6392_s13] sm:$0xff]   ;;  %v5206_v62 = vld [vmem:[%s6392_s13 + $0x8] sm:$0xff]   ;;  %v5207_v63 = vld [vmem:[%s6392_s13 + $0x10] sm:$0xff]   ;;  %p5286_p5 = scmp.lt.s32.totalorder %s6280_s14, %s5284_s20  ;;  %p5287_p6 = scmp.lt.s32.totalorder %s5285_s17, %s5279_s28 }
 0x298   : > { %v5209_v2 = vld [vmem:[%s6391_s7 + $0x10] sm:$0xff]   ;;  %v5210_v16 = vld [vmem:[%s6392_s13 + $0x18] sm:$0xff]   ;;  %s6394_s19 = smov %s6393_s25 }
 0x299   : > { %p5288_p7 = por %p5287_p6, %p5286_p5 }
 0x29a   : > { %4729 = vmatmul.mubr.msk.bf16.vlgmr.msra.gmra.mxu1 %vm916_vm6, %v5630_v50  ;;  %5200 = vset.pattern.permute.xlu0 %v5376_v59  ;;  %s4532_s27 = sshll.u32 %s6396_s30, 8 }
 0x29b   : > { %4739 = vmatpush3.bf16.msra.mxu1 %v1021_v51  ;;  %4740 = vmatprep.mubr.msk.bf16.mxu1 %vm5374_vm0, %v5373_v0  ;;  %s6278_s11 = scalar_lea.hbm %s6399_s10, %s4532_s27  ;;  %p5289_p8 = pnand %p5288_p7, %p5282_p4 }
 0x29c   : > { %4750 = vmatprep.subr.bf16.mxu1 %v5373_v0 }
 0x2a2   : > { %4741 = vmatmul.mubr.msk.bf16.vlgmr.msra.gmra.mxu1 %vm916_vm6, %v5630_v50 }
 0x2a3   : > { %4751 = vmatpush3.bf16.msra.mxu1 %v1117_v52  ;;  %4752 = vmatprep.mubr.msk.bf16.mxu1 %vm5374_vm0, %v5373_v0 }
 0x2a4   : > { %4762 = vmatprep.subr.bf16.mxu1 %v5373_v0 }
 0x2aa   : > { %4753 = vmatmul.mubr.msk.bf16.vlgmr.msra.gmra.mxu1 %vm916_vm6, %v5630_v50 }
 0x2ab   : > { %4763 = vmatpush3.bf16.msra.mxu1 %v5203_v53  ;;  %4766 = vmatprep.mubr.msk.bf16.mxu1 %vm5374_vm0, %v5373_v0 }
 0x2ac   : > { %4764 = vmatprep.subr.bf16.mxu1 %v5373_v0 }
 0x2af   : > { %4765 = vmatpush3.bf16.msra.mxu1 %v5205_v54 }
 0x2b0   : > { %4778 = vmatprep.subr.bf16.mxu1 %v5373_v0 }
 0x2b2   : > { %4767 = vmatmul.mubr.msk.bf16.vlgmr.msra.gmra.mxu1 %vm1224_vm7, %v5657_v57 }
 0x2b3   : > { %4779 = vmatpush3.bf16.msra.mxu1 %v5660_v58  ;;  %4780 = vmatprep.mubr.msk.bf16.mxu1 %vm5374_vm0, %v5373_v0 }
 0x2b4   : > { %4790 = vmatprep.subr.bf16.mxu1 %v5373_v0 }
 0x2ba   : > { %4781 = vmatmul.mubr.msk.bf16.vlgmr.msra.gmra.mxu1 %vm532_vm1, %v5601_v43 }
 0x2bb   : > { %4791 = vmatpush3.bf16.msra.mxu1 %v5657_v57  ;;  %4792 = vmatprep.mubr.msk.bf16.mxu1 %vm5374_vm0, %v5373_v0 }
 0x2bc   : > { %4802 = vmatprep.subr.bf16.mxu1 %v5373_v0 }
 0x2c2   : > { %4793 = vmatmul.mubr.msk.bf16.vlgmr.msra.gmra.mxu1 %vm532_vm1, %v5601_v43 }
 0x2c3   : > { %4804 = vmatprep.mubr.msk.bf16.mxu1 %vm5374_vm0, %v5373_v0  ;;  %4803 = vmatpush3.bf16.msra.mxu1 %v5210_v16 }
 0x2c4   : > { %4814 = vmatprep.subr.bf16.mxu1 %v5373_v0 }
 0x2f3   : > { %v5681_v61 = vpop.trf.xlu0 }
 0x2f4   : > { %4723 = vmatmul.mubr.msk.bf16.vlgmr.msra.gmra.mxu0 %vm532_vm1, %v5681_v61 }
 0x2f5   : > { %4733 = vmatpush3.bf16.msra.mxu0 %v5204_v60  ;;  %4734 = vmatprep.mubr.msk.bf16.mxu0 %vm5374_vm0, %v5373_v0 }
 0x2f6   : > { %4744 = vmatprep.subr.bf16.mxu0 %v5373_v0 }
 0x2fc   : > { %4735 = vmatmul.mubr.msk.bf16.vlgmr.msra.gmra.mxu0 %vm532_vm1, %v5660_v58 }
 0x2fd   : > { %4745 = vmatpush3.bf16.msra.mxu0 %v5206_v62  ;;  %4746 = vmatprep.mubr.msk.bf16.mxu0 %vm5374_vm0, %v5373_v0 }
 0x2fe   : > { %4756 = vmatprep.subr.bf16.mxu0 %v5373_v0 }
 0x304   : > { %4747 = vmatmul.mubr.msk.bf16.vlgmr.msra.gmra.mxu0 %vm532_vm1, %v5660_v58 }
 0x305   : > { %4757 = vmatpush3.bf16.msra.mxu0 %v5207_v63  ;;  %4758 = vmatprep.mubr.msk.bf16.mxu0 %vm5374_vm0, %v5373_v0 }
 0x306   : > { %4770 = vmatprep.subr.bf16.mxu0 %v5373_v0 }
 0x30c   : > { %4759 = vmatmul.mubr.msk.bf16.vlgmr.msra.gmra.mxu0 %vm532_vm1, %v5660_v58 }
 0x30d   : > { %4771 = vmatpush3.bf16.msra.mxu0 %v5208_v1  ;;  %4774 = vmatprep.mubr.msk.bf16.mxu0 %vm5374_vm0, %v5373_v0 }
 0x30e   : > { %4772 = vmatprep.subr.bf16.mxu0 %v5373_v0 }
 0x311   : > { %4773 = vmatpush3.bf16.msra.mxu0 %v5209_v2 }
 0x312   : > { %4784 = vmatprep.subr.bf16.mxu0 %v5373_v0 }
 0x314   : > { %4775 = vmatmul.mubr.msk.bf16.vlgmr.msra.gmra.mxu0 %vm1224_vm7, %v5657_v57 }
 0x315   : > { %4785 = vmatpush3.bf16.msra.mxu0 %v5630_v50  ;;  %4786 = vmatprep.mubr.msk.bf16.mxu0 %vm5374_vm0, %v5373_v0 }
 0x316   : > { %4796 = vmatprep.subr.bf16.mxu0 %v5373_v0 }
 0x31c   : > { %4787 = vmatmul.mubr.msk.bf16.vlgmr.msra.gmra.mxu0 %vm532_vm1, %v5601_v43 }
 0x31d   : > { %4798 = vmatprep.mubr.msk.bf16.mxu0 %vm5374_vm0, %v5373_v0  ;;  %4797 = vmatpush3.bf16.msra.mxu0 %v1481_v18 }
 0x31e   : > { %4808 = vmatprep.subr.bf16.mxu0 %v5373_v0 }
 0x352   : > { %v839_v3 = vpop.f32.mrf.mxu1 }
 0x353   : > { %v840_v4 = vadd.f32 1e-06, %v839_v3 }
 0x354   : > { %v4718_v5 = vpop.f32.mrf.mxu1 }
 0x355   : > { %5248 = vrcp.f32 %v840_v4 }
 0x356   : > { %v842_v6 = vpop.f32.mrf.mxu1 }
 0x357   : > { %v843_v7 = vadd.f32 1e-06, %v842_v6 }
 0x358   : > { %v4719_v8 = vpop.f32.mrf.mxu1 }
 0x359   : > { %5250 = vrcp.f32 %v843_v7 }
 0x35a   : > { %v5726_v9 = vpop.f32.mrf.mxu1 }
 0x35c   : > { %v4730_v10 = vpop.f32.mrf.mxu1 }
 0x35e   : > { %v5728_v11 = vpop.f32.mrf.mxu1 }
 0x360   : > { %v4731_v12 = vpop.f32.mrf.mxu1 }
 0x362   : > { %v5249_v13 = vpop.eup %5248  ;;  %v1057_v14 = vpop.f32.mrf.mxu1 }
 0x363   : > { %1374 = vperm.xlu0 %5200, %v5249_v13  }
 0x364   : > { %v4742_v17 = vpop.f32.mrf.mxu1 }
 0x366   : > { %v5251_v19 = vpop.eup %5250  ;;  %v1060_v20 = vpop.f32.mrf.mxu1 }
 0x367   : > { %1379 = vperm.xlu1 %5201, %v5251_v19  }
 0x368   : > { %v4743_v21 = vpop.f32.mrf.mxu1 }
 0x369   : > { %v5211_v21 = vld [vmem:[%s6392_s13 + $0x20] sm:$0xff]  }
 0x36a   : > { %v5739_v22 = vpop.f32.mrf.mxu1 }
 0x36c   : > { %v4754_v23 = vpop.f32.mrf.mxu1 }
 0x36e   : > { %v5741_v24 = vpop.f32.mrf.mxu1 }
 0x370   : > { %v4755_v25 = vpop.f32.mrf.mxu1 }
 0x372   : > { %v5743_v26 = vpop.f32.mrf.mxu1 }
 0x374   : > { %v4768_v27 = vpop.f32.mrf.mxu1 }
 0x376   : > { %v5745_v28 = vpop.f32.mrf.mxu1 }
 0x378   : > { %v4769_v29 = vpop.f32.mrf.mxu1 }
 0x379   : > { %v4357_v29 = vld [vmem:[%s6345_s8 + $0x14] sm:$0xf] }
 0x37a   : > { %v1365_v30 = vpop.f32.mrf.mxu1 }
 0x37c   : > { %v4782_v31 = vpop.f32.mrf.mxu1 }
 0x37d   : > { %v1676_v31 = vsel %vm920_vm5, %v4357_v29, 0 }
 0x37e   : > { %v1368_v32 = vpop.f32.mrf.mxu1 }
 0x380   : > { %v4783_v33 = vpop.f32.mrf.mxu1 }
 0x381   : > { %v5214_v33 = vld [vmem:[%s6391_s7 + $0x38] sm:$0xff]  }
 0x382   : > { %v5747_v34 = vpop.f32.mrf.mxu1 }
 0x384   : > { %v4794_v35 = vpop.f32.mrf.mxu1 }
 0x385   : > { %v5215_v35 = vld [vmem:[%s6391_s7 + $0x20] sm:$0xff]  }
 0x386   : > { %v5749_v36 = vpop.f32.mrf.mxu1 }
 0x388   : > { %v4795_v37 = vpop.f32.mrf.mxu1 }
 0x389   : > { %v5216_v37 = vld [vmem:[%s6391_s7 + $0x30] sm:$0xff]  }
 0x3b4   : > { %v902_v38 = vpop.f32.mrf.mxu0 }
 0x3b5   : > { %v903_v39 = vadd.f32 1e-06, %v902_v38 }
 0x3b6   : > { %v4724_v40 = vpop.f32.mrf.mxu0 }
 0x3b7   : > { %5252 = vrcp.f32 %v903_v39 }
 0x3b8   : > { %v905_v41 = vpop.f32.mrf.mxu0 }
 0x3b9   : > { %v906_v42 = vadd.f32 1e-06, %v905_v41 }
 0x3ba   : > { %v4725_v44 = vpop.f32.mrf.mxu0 }
 0x3bb   : > { %5254 = vrcp.f32 %v906_v42 }
 0x3bc   : > { %v5751_v45 = vpop.f32.mrf.mxu0 }
 0x3be   : > { %v4736_v46 = vpop.f32.mrf.mxu0 }
 0x3c0   : > { %v5753_v47 = vpop.f32.mrf.mxu0 }
 0x3c2   : > { %v4737_v48 = vpop.f32.mrf.mxu0 }
 0x3c4   : > { %v5253_v49 = vpop.eup %5252  ;;  %v1104_v51 = vpop.f32.mrf.mxu0 }
 0x3c5   : > { %2494 = vperm.xlu1 %5201, %v5253_v49   ;;  %v1105_v63 = vadd.f32 %v1104_v51, %v1057_v14  ;;  %v4351_v14 = vld [vmem:[%s6345_s8 + $0x10] sm:$0xf] }
 0x3c6   : > { %v4748_v52 = vpop.f32.mrf.mxu0  ;;  %v1580_v27 = vsel %vm920_vm5, %v4351_v14, 0 }
 0x3c8   : > { %v5255_v53 = vpop.eup %5254  ;;  %v1107_v54 = vpop.f32.mrf.mxu0 }
 0x3c9   : > { %2499 = vperm.xlu1 %5201, %v5255_v53   ;;  %v1108_v4 = vadd.f32 %v1107_v54, %v1060_v20 }
 0x3ca   : > { %v4749_v55 = vpop.f32.mrf.mxu0 }
 0x3cc   : > { %v5755_v56 = vpop.f32.mrf.mxu0 }
 0x3ce   : > { %v4760_v59 = vpop.f32.mrf.mxu0 }
 0x3d0   : > { %v5757_v60 = vpop.f32.mrf.mxu0 }
 0x3d2   : > { %v4761_v62 = vpop.f32.mrf.mxu0 }
 0x3d4   : > { %v1320_v1 = vpop.f32.mrf.mxu0 }
 0x3d5   : > { %v5759_v2 = vadd.f32 %v1320_v1, %v1105_v63 }
 0x3d6   : > { %v4776_v3 = vpop.f32.mrf.mxu0 }
 0x3d8   : > { %v1323_v5 = vpop.f32.mrf.mxu0 }
 0x3d9   : > { %v5761_v6 = vadd.f32 %v1323_v5, %v1108_v4 }
 0x3da   : > { %v4777_v7 = vpop.f32.mrf.mxu0 }
 0x3dc   : > { %v1418_v8 = vpop.f32.mrf.mxu0 }
 0x3de   : > { %v4788_v10 = vpop.f32.mrf.mxu0  ;;  %v5763_v12 = vpop.permute.xlu0 %1374 }
 0x3df   : > { %v1425_v17 = vmul.f32 %v1418_v8, %v5763_v12  ;;  %v1382_v19 = vmul.f32 %v5763_v12, %v1365_v30  ;;  %v5212_v30 = vld [vmem:[%s6392_s13 + $0x28] sm:$0xff]   ;;  %v1468_v39 = vmul.f32 %v5747_v34, %v5763_v12  ;;  %v4380_v34 = vld [vmem:[%s6345_s8 + $0x18] sm:$0xf] }
 0x3e0   : > { %v1421_v13 = vpop.f32.mrf.mxu0  ;;  %v2036_v41 = vsel %vm920_vm5, %v4380_v34, 0 }
 0x3e2   : > { %v5765_v15 = vpop.permute.xlu1 %1379  ;;  %v4789_v16 = vpop.f32.mrf.mxu0 }
 0x3e3   : > { %v1426_v18 = vmul.f32 %v1421_v13, %v5765_v15  ;;  %v1383_v20 = vmul.f32 %v5765_v15, %v1368_v32  ;;  %v5213_v32 = vld [vmem:[%s6391_s7 + $0x28] sm:$0xff]   ;;  %v1469_v38 = vmul.f32 %v5749_v36, %v5765_v15  ;;  %v5217_v36 = vld [vmem:[%s6392_s13 + $0x30] sm:$0xff]   ;;  %v1201_v16 = vadd.f32 %v5755_v56, %v5739_v22 }
 0x3e5   : > { %v1476_v23 = vpack.c.bf16 %v1426_v18, %v1425_v17  ;;  %v1473_v25 = vpack.c.bf16 %v1383_v20, %v1382_v19  ;;  %v1771_v40 = vpack.c.bf16 %v1469_v38, %v1468_v39 }
 0x3e7   : > { %4799 = vmatmul.mubr.msk.bf16.vlgmr.msra.gmra.mxu0 %vm916_vm6, %v1476_v23  ;;  %4805 = vmatmul.mubr.msk.bf16.vlgmr.msra.gmra.mxu1 %vm532_vm1, %v1473_v25 }
 0x3e8   : > { %4809 = vmatpush3.bf16.msra.mxu0 %v1580_v27  ;;  %4815 = vmatpush3.bf16.msra.mxu1 %v5211_v21 }
 0x3e9   : > { %4810 = vmatprep.mubr.msk.bf16.mxu0 %vm5374_vm0, %v5373_v0  ;;  %4816 = vmatprep.mubr.msk.bf16.mxu1 %vm5374_vm0, %v5373_v0 }
 0x3ea   : > { %4820 = vmatprep.subr.bf16.mxu0 %v5373_v0  ;;  %4826 = vmatprep.subr.bf16.mxu1 %v5373_v0 }
 0x3ef   : > { %4811 = vmatmul.mubr.msk.bf16.vlgmr.msra.gmra.mxu0 %vm916_vm6, %v1476_v23  ;;  %4817 = vmatmul.mubr.msk.bf16.vlgmr.msra.gmra.mxu1 %vm532_vm1, %v1473_v25 }
 0x3f0   : > { %4821 = vmatpush3.bf16.msra.mxu0 %v1676_v31  ;;  %4827 = vmatpush3.bf16.msra.mxu1 %v5212_v30 }
 0x3f1   : > { %4822 = vmatprep.mubr.msk.bf16.mxu0 %vm5374_vm0, %v5373_v0  ;;  %4828 = vmatprep.mubr.msk.bf16.mxu1 %vm5374_vm0, %v5373_v0 }
 0x3f2   : > { %4832 = vmatprep.subr.bf16.mxu0 %v5373_v0  ;;  %4840 = vmatprep.subr.bf16.mxu1 %v5373_v0 }
 0x3f7   : > { %4823 = vmatmul.mubr.msk.bf16.vlgmr.msra.gmra.mxu0 %vm916_vm6, %v1476_v23  ;;  %4829 = vmatmul.mubr.msk.bf16.vlgmr.msra.gmra.mxu1 %vm532_vm1, %v1473_v25 }
 0x3f8   : > { %4833 = vmatpush3.bf16.msra.mxu0 %v5213_v32  ;;  %4841 = vmatpush3.bf16.msra.mxu1 %v5214_v33  ;;  %v1012_v33 = vadd.f32 %v5753_v47, %v5728_v11 }
 0x3f9   : > { %4834 = vmatprep.subr.bf16.mxu0 %v5373_v0  ;;  %4842 = vmatprep.subr.bf16.mxu1 %v5373_v0 }
 0x3fa   : > { %4836 = vmatprep.mubr.msk.bf16.mxu0 %vm5374_vm0, %v5373_v0  ;;  %4844 = vmatprep.mubr.msk.bf16.mxu1 %vm5374_vm0, %v5373_v0 }
 0x3fc   : > { %4835 = vmatpush3.bf16.msra.mxu0 %v5215_v35  ;;  %4843 = vmatpush3.bf16.msra.mxu1 %v5216_v37 }
 0x3fd   : > { %4848 = vmatprep.subr.bf16.mxu0 %v5373_v0  ;;  %4854 = vmatprep.subr.bf16.mxu1 %v5373_v0 }
 0x3ff   : > { %4837 = vmatmul.mubr.msk.bf16.vlgmr.msra.gmra.mxu0 %vm1224_vm7, %v1771_v40  ;;  %4845 = vmatmul.mubr.msk.bf16.vlgmr.msra.gmra.mxu1 %vm1224_vm7, %v1771_v40 }
 0x400   : > { %4849 = vmatpush3.bf16.msra.mxu0 %v1473_v25  ;;  %4855 = vmatpush3.bf16.msra.mxu1 %v1476_v23  ;;  %v1009_v23 = vadd.f32 %v5751_v45, %v5726_v9  ;;  %v1204_v25 = vadd.f32 %v5757_v60, %v5741_v24 }
 0x401   : > { %4850 = vmatprep.mubr.msk.bf16.mxu0 %vm5374_vm0, %v5373_v0  ;;  %4856 = vmatprep.mubr.msk.bf16.mxu1 %vm5374_vm0, %v5373_v0 }
 0x402   : > { %4860 = vmatprep.subr.bf16.mxu0 %v5373_v0  ;;  %4866 = vmatprep.subr.bf16.mxu1 %v5373_v0  ;;  %v1327_v56 = vadd.f32 %v5743_v26, %v1009_v23 }
 0x407   : > { %4851 = vmatmul.mubr.msk.bf16.vlgmr.msra.gmra.mxu0 %vm532_vm1, %v5601_v43  ;;  %4857 = vmatmul.mubr.msk.bf16.vlgmr.msra.gmra.mxu1 %vm532_vm1, %v5601_v43 }
 0x408   : > { %4861 = vmatpush3.bf16.msra.mxu0 %v1771_v40  ;;  %4862 = vmatprep.mubr.msk.bf16.mxu0 %vm5374_vm0, %v5373_v0  ;;  %v1328_v40 = vadd.f32 %v5745_v28, %v1012_v33 }
 0x409   : > { %4872 = vmatprep.subr.bf16.mxu0 %v5373_v0  ;;  %4868 = vmatprep.mubr.msk.bf16.mxu1 %vm5374_vm0, %v5373_v0 }
 0x40a   : > { %4867 = vmatpush3.bf16.msra.mxu1 %v2036_v41 }
 0x40b   : > { %4878 = vmatprep.subr.bf16.mxu1 %v5373_v0 }
 0x40f   : > { %4863 = vmatmul.mubr.msk.bf16.vlgmr.msra.gmra.mxu0 %vm532_vm1, %v5601_v43 }
 0x410   : > { %4874 = vmatprep.mubr.msk.bf16.mxu0 %vm5374_vm0, %v5373_v0  ;;  %4873 = vmatpush3.bf16.msra.mxu0 %v5217_v36 }
 0x411   : > { %4884 = vmatprep.subr.bf16.mxu0 %v5373_v0 }
 0x4a7   : > { %v1517_v43 = vpop.f32.mrf.mxu0  ;;  %v1567_v42 = vpop.f32.mrf.mxu1 }
 0x4a8   : > { %v1568_v44 = vadd.f32 %v1567_v42, %v1517_v43 }
 0x4a9   : > { %v4800_v46 = vpop.f32.mrf.mxu0  ;;  %v4806_v48 = vpop.f32.mrf.mxu1 }
 0x4ab   : > { %v1520_v49 = vpop.f32.mrf.mxu0  ;;  %v1570_v51 = vpop.f32.mrf.mxu1 }
 0x4ac   : > { %v1571_v52 = vadd.f32 %v1570_v51, %v1520_v49  ;;  %v4386_v49 = vld [vmem:[%s6345_s8 + $0x1c] sm:$0xf] }
 0x4ad   : > { %v4801_v53 = vpop.f32.mrf.mxu0  ;;  %v4807_v54 = vpop.f32.mrf.mxu1 }
 0x4af   : > { %v1616_v55 = vpop.f32.mrf.mxu0  ;;  %v1663_v59 = vpop.f32.mrf.mxu1 }
 0x4b0   : > { %v1664_v62 = vadd.f32 %v1663_v59, %v1616_v55  ;;  %v5218_v55 = vld [vmem:[%s6392_s13 + $0x38] sm:$0xff]  }
 0x4b1   : > { %v4812_v63 = vpop.f32.mrf.mxu0  ;;  %v4818_v1 = vpop.f32.mrf.mxu1 }
 0x4b2   : > { %v2135_v63 = vsel %vm920_vm5, %v4386_v49, 0 }
 0x4b3   : > { %v1619_v3 = vpop.f32.mrf.mxu0  ;;  %v1666_v4 = vpop.f32.mrf.mxu1 }
 0x4b4   : > { %v1667_v5 = vadd.f32 %v1666_v4, %v1619_v3 }
 0x4b5   : > { %v4813_v7 = vpop.f32.mrf.mxu0  ;;  %v4819_v8 = vpop.f32.mrf.mxu1 }
 0x4b6   : > { %v5219_v7 = vld [vmem:[%s6392_s13 + $0x40] sm:$0xff]  }
 0x4b7   : > { %v1712_v10 = vpop.f32.mrf.mxu0  ;;  %v1759_v13 = vpop.f32.mrf.mxu1 }
 0x4b8   : > { %v1760_v14 = vadd.f32 %v1759_v13, %v1712_v10  ;;  %v5220_v13 = vld [vmem:[%s6391_s7 + $0x48] sm:$0xff]  }
 0x4b9   : > { %v4824_v17 = vpop.f32.mrf.mxu0  ;;  %v4830_v18 = vpop.f32.mrf.mxu1 }
 0x4ba   : > { %v5859_v19 = vadd.f32 %v1760_v14, %v1201_v16  ;;  %v5221_v16 = vld [vmem:[%s6391_s7 + $0x58] sm:$0xff]   ;;  %v5222_v14 = vld [vmem:[%s6391_s7 + $0x40] sm:$0xff]   ;;  %v5223_v17 = vld [vmem:[%s6391_s7 + $0x50] sm:$0xff]  }
 0x4bb   : > { %v1715_v20 = vpop.f32.mrf.mxu0  ;;  %v1762_v21 = vpop.f32.mrf.mxu1 }
 0x4bc   : > { %v1763_v27 = vadd.f32 %v1762_v21, %v1715_v20 }
 0x4bd   : > { %v4825_v29 = vpop.f32.mrf.mxu0  ;;  %v4831_v30 = vpop.f32.mrf.mxu1 }
 0x4be   : > { %v5865_v31 = vadd.f32 %v1763_v27, %v1204_v25 }
 0x4bf   : > { %v1821_v32 = vpop.f32.mrf.mxu0  ;;  %v1879_v22 = vpop.f32.mrf.mxu1 }
 0x4c0   : > { %v1886_v35 = vadd.f32 %v1821_v32, %v1568_v44  ;;  %v1890_v37 = vadd.f32 %v1879_v22, %v1664_v62 }
 0x4c1   : > { %v4838_v38 = vpop.f32.mrf.mxu0  ;;  %v4846_v39 = vpop.f32.mrf.mxu1 }
 0x4c2   : > { %v5870_v9 = vadd.f32 %v1886_v35, %v1327_v56  ;;  %v5873_v24 = vadd.f32 %v1890_v37, %v5759_v2 }
 0x4c3   : > { %v1824_v45 = vpop.f32.mrf.mxu0  ;;  %v1882_v60 = vpop.f32.mrf.mxu1 }
 0x4c4   : > { %v1887_v34 = vadd.f32 %v1824_v45, %v1571_v52  ;;  %v1891_v36 = vadd.f32 %v1882_v60, %v1667_v5  ;;  %v4392_v5 = vld [vmem:[%s6345_s8 + $0x20] sm:$0xf] }
 0x4c5   : > { %v4839_v41 = vpop.f32.mrf.mxu0  ;;  %v4847_v26 = vpop.f32.mrf.mxu1  ;;  %v2231_v10 = vsel %vm920_vm5, %v4392_v5, 0 }
 0x4c6   : > { %v5876_v43 = vadd.f32 %v1887_v34, %v1328_v40  ;;  %v5879_v11 = vadd.f32 %v1891_v36, %v5761_v6 }
 0x4c7   : > { %v1930_v47 = vpop.f32.mrf.mxu0  ;;  %v1973_v42 = vpop.f32.mrf.mxu1 }
 0x4c8   : > { %v1937_v28 = vmul.f32 %v1930_v47, %v5763_v12  ;;  %v1980_v51 = vmul.f32 %v1973_v42, %v5763_v12 }
 0x4c9   : > { %v4852_v44 = vpop.f32.mrf.mxu0  ;;  %v4858_v46 = vpop.f32.mrf.mxu1 }
 0x4cb   : > { %v1933_v48 = vpop.f32.mrf.mxu0  ;;  %v1976_v2 = vpop.f32.mrf.mxu1 }
 0x4cc   : > { %v1938_v52 = vmul.f32 %v1933_v48, %v5765_v15  ;;  %v1981_v53 = vmul.f32 %v1976_v2, %v5765_v15 }
 0x4cd   : > { %v4853_v6 = vpop.f32.mrf.mxu0  ;;  %v4859_v54 = vpop.f32.mrf.mxu1 }
 0x4ce   : > { %v2028_v59 = vpack.c.bf16 %v1938_v52, %v1937_v28  ;;  %v2031_v62 = vpack.c.bf16 %v1981_v53, %v1980_v51 }
 0x4cf   : > { %v2016_v1 = vpop.f32.mrf.mxu0 }
 0x4d0   : > { %4869 = vmatmul.mubr.msk.bf16.vlgmr.msra.gmra.mxu1 %vm916_vm6, %v2031_v62  ;;  %4875 = vmatmul.mubr.msk.bf16.vlgmr.msra.gmra.mxu0 %vm532_vm1, %v2028_v59  ;;  %v2023_v20 = vmul.f32 %v2016_v1, %v5763_v12 }
 0x4d1   : > { %v4864_v3 = vpop.f32.mrf.mxu0  ;;  %4879 = vmatpush3.bf16.msra.mxu1 %v2135_v63  ;;  %4885 = vmatpush3.bf16.msra.mxu0 %v5218_v55 }
 0x4d2   : > { %4880 = vmatprep.mubr.msk.bf16.mxu1 %vm5374_vm0, %v5373_v0  ;;  %4886 = vmatprep.mubr.msk.bf16.mxu0 %vm5374_vm0, %v5373_v0 }
 0x4d3   : > { %v2019_v4 = vpop.f32.mrf.mxu0  ;;  %4890 = vmatprep.subr.bf16.mxu1 %v5373_v0  ;;  %4896 = vmatprep.subr.bf16.mxu0 %v5373_v0 }
 0x4d4   : > { %v2024_v18 = vmul.f32 %v2019_v4, %v5765_v15 }
 0x4d5   : > { %v4865_v8 = vpop.f32.mrf.mxu0 }
 0x4d6   : > { %v2326_v21 = vpack.c.bf16 %v2024_v18, %v2023_v20 }
 0x4d8   : > { %4881 = vmatmul.mubr.msk.bf16.vlgmr.msra.gmra.mxu1 %vm916_vm6, %v2031_v62  ;;  %4887 = vmatmul.mubr.msk.bf16.vlgmr.msra.gmra.mxu0 %vm532_vm1, %v2028_v59 }
 0x4d9   : > { %4891 = vmatpush3.bf16.msra.mxu1 %v2231_v10  ;;  %4897 = vmatpush3.bf16.msra.mxu0 %v5219_v7  ;;  %v5984_v7 = vpop.permute.xlu1 %2494 }
 0x4da   : > { %4892 = vmatprep.mubr.msk.bf16.mxu1 %vm5374_vm0, %v5373_v0  ;;  %4898 = vmatprep.mubr.msk.bf16.mxu0 %vm5374_vm0, %v5373_v0 }
 0x4db   : > { %4902 = vmatprep.subr.bf16.mxu1 %v5373_v0  ;;  %4910 = vmatprep.subr.bf16.mxu0 %v5373_v0 }
 0x4e0   : > { %4893 = vmatmul.mubr.msk.bf16.vlgmr.msra.gmra.mxu1 %vm916_vm6, %v2031_v62  ;;  %4899 = vmatmul.mubr.msk.bf16.vlgmr.msra.gmra.mxu0 %vm532_vm1, %v2028_v59 }
 0x4e1   : > { %4903 = vmatpush3.bf16.msra.mxu1 %v5220_v13  ;;  %4911 = vmatpush3.bf16.msra.mxu0 %v5221_v16 }
 0x4e2   : > { %4904 = vmatprep.subr.bf16.mxu1 %v5373_v0  ;;  %4912 = vmatprep.subr.bf16.mxu0 %v5373_v0 }
 0x4e3   : > { %4906 = vmatprep.mubr.msk.bf16.mxu1 %vm5374_vm0, %v5373_v0  ;;  %4914 = vmatprep.mubr.msk.bf16.mxu0 %vm5374_vm0, %v5373_v0 }
 0x4e5   : > { %4905 = vmatpush3.bf16.msra.mxu1 %v5222_v14  ;;  %4913 = vmatpush3.bf16.msra.mxu0 %v5223_v17 }
 0x4e6   : > { %4918 = vmatprep.subr.bf16.mxu1 %v5373_v0  ;;  %4924 = vmatprep.subr.bf16.mxu0 %v5373_v0 }
 0x4e8   : > { %4907 = vmatmul.mubr.msk.bf16.vlgmr.msra.gmra.mxu1 %vm1224_vm7, %v2326_v21  ;;  %4915 = vmatmul.mubr.msk.bf16.vlgmr.msra.gmra.mxu0 %vm1224_vm7, %v2326_v21 }
 0x4e9   : > { %4919 = vmatpush3.bf16.msra.mxu1 %v5660_v58  ;;  %4925 = vmatpush3.bf16.msra.mxu0 %v5630_v50  ;;  %v4415_v50 = vld [vmem:[%s6345_s8 + $0x24] sm:$0xf] }
 0x4ea   : > { %4920 = vmatprep.mubr.msk.bf16.mxu1 %vm5374_vm0, %v5373_v0  ;;  %4926 = vmatprep.mubr.msk.bf16.mxu0 %vm5374_vm0, %v5373_v0  ;;  %v2601_v58 = vsel %vm920_vm5, %v4415_v50, 0 }
 0x4eb   : > { %4930 = vmatprep.subr.bf16.mxu1 %v5373_v0  ;;  %4936 = vmatprep.subr.bf16.mxu0 %v5373_v0 }
 0x4f0   : > { %4921 = vmatmul.mubr.msk.bf16.vlgmr.msra.gmra.mxu1 %vm532_vm1, %v5681_v61  ;;  %4927 = vmatmul.mubr.msk.bf16.vlgmr.msra.gmra.mxu0 %vm532_vm1, %v5681_v61 }
 0x4f1   : > { %4931 = vmatpush3.bf16.msra.mxu1 %v5657_v57  ;;  %4932 = vmatprep.mubr.msk.bf16.mxu1 %vm5374_vm0, %v5373_v0  ;;  %v5224_v57 = vld [vmem:[%s6392_s13 + $0x48] sm:$0xff]  }
 0x4f2   : > { %4942 = vmatprep.subr.bf16.mxu1 %v5373_v0  ;;  %4938 = vmatprep.mubr.msk.bf16.mxu0 %vm5374_vm0, %v5373_v0 }
 0x4f3   : > { %4937 = vmatpush3.bf16.msra.mxu0 %v2601_v58 }
 0x4f4   : > { %4948 = vmatprep.subr.bf16.mxu0 %v5373_v0 }
 0x4f8   : > { %4933 = vmatmul.mubr.msk.bf16.vlgmr.msra.gmra.mxu1 %vm532_vm1, %v5681_v61 }
 0x4f9   : > { %4944 = vmatprep.mubr.msk.bf16.mxu1 %vm5374_vm0, %v5373_v0  ;;  %4943 = vmatpush3.bf16.msra.mxu1 %v5224_v57  ;;  %v4421_v57 = vld [vmem:[%s6345_s8 + $0x28] sm:$0xf] }
 0x4fa   : > { %4954 = vmatprep.subr.bf16.mxu1 %v5373_v0 }
 0x590   : > { %v2072_v23 = vpop.f32.mrf.mxu1  ;;  %v2122_v25 = vpop.f32.mrf.mxu0 }
 0x591   : > { %v2123_v27 = vadd.f32 %v2122_v25, %v2072_v23 }
 0x592   : > { %v4870_v29 = vpop.f32.mrf.mxu1  ;;  %v4876_v30 = vpop.f32.mrf.mxu0 }
 0x593   : > { %v5225_v29 = vld [vmem:[%s6392_s13 + $0x50] sm:$0xff]  }
 0x594   : > { %v2075_v32 = vpop.f32.mrf.mxu1  ;;  %v2125_v22 = vpop.f32.mrf.mxu0 }
 0x595   : > { %v2126_v56 = vadd.f32 %v2125_v22, %v2075_v32  ;;  %v2700_v22 = vsel %vm920_vm5, %v4421_v57, 0 }
 0x596   : > { %v4871_v33 = vpop.f32.mrf.mxu1  ;;  %v4877_v35 = vpop.f32.mrf.mxu0 }
 0x598   : > { %v2171_v37 = vpop.f32.mrf.mxu1  ;;  %v2218_v38 = vpop.f32.mrf.mxu0 }
 0x599   : > { %v2219_v39 = vadd.f32 %v2218_v38, %v2171_v37  ;;  %v4427_v37 = vld [vmem:[%s6345_s8 + $0x2c] sm:$0xf] }
 0x59a   : > { %v4882_v45 = vpop.f32.mrf.mxu1  ;;  %v4888_v60 = vpop.f32.mrf.mxu0 }
 0x59b   : > { %v2796_v45 = vsel %vm920_vm5, %v4427_v37, 0  ;;  %v5227_v60 = vld [vmem:[%s6391_s7 + $0x68] sm:$0xff]  }
 0x59c   : > { %v2174_v40 = vpop.f32.mrf.mxu1  ;;  %v2221_v34 = vpop.f32.mrf.mxu0 }
 0x59d   : > { %v2222_v36 = vadd.f32 %v2221_v34, %v2174_v40  ;;  %v5228_v40 = vld [vmem:[%s6391_s7 + $0x78] sm:$0xff]   ;;  %v5229_v34 = vld [vmem:[%s6391_s7 + $0x60] sm:$0xff]  }
 0x59e   : > { %v4883_v41 = vpop.f32.mrf.mxu1  ;;  %v4889_v26 = vpop.f32.mrf.mxu0 }
 0x5a0   : > { %v2267_v47 = vpop.f32.mrf.mxu1  ;;  %v2314_v42 = vpop.f32.mrf.mxu0 }
 0x5a1   : > { %v2315_v44 = vadd.f32 %v2314_v42, %v2267_v47  ;;  %v4450_v42 = vld [vmem:[%s6345_s8 + $0x30] sm:$0xf] }
 0x5a2   : > { %v4894_v46 = vpop.f32.mrf.mxu1  ;;  %v4900_v48 = vpop.f32.mrf.mxu0 }
 0x5a3   : > { %v5973_v2 = vadd.f32 %v2315_v44, %v5859_v19  ;;  %v5231_v44 = vld [vmem:[%s6392_s13 + $0x60] sm:$0xff]   ;;  %v3156_v46 = vsel %vm920_vm5, %v4450_v42, 0 }
 0x5a4   : > { %v2270_v49 = vpop.f32.mrf.mxu1  ;;  %v2317_v28 = vpop.f32.mrf.mxu0 }
 0x5a5   : > { %v2318_v51 = vadd.f32 %v2317_v28, %v2270_v49 }
 0x5a6   : > { %v4895_v52 = vpop.f32.mrf.mxu1  ;;  %v4901_v53 = vpop.f32.mrf.mxu0 }
 0x5a7   : > { %v5976_v6 = vadd.f32 %v2318_v51, %v5865_v31 }
 0x5a8   : > { %v2376_v54 = vpop.f32.mrf.mxu1  ;;  %v2434_v55 = vpop.f32.mrf.mxu0 }
 0x5a9   : > { %v2441_v59 = vadd.f32 %v2376_v54, %v2123_v27  ;;  %v2445_v62 = vadd.f32 %v2434_v55, %v2219_v39  ;;  %v5226_v39 = vld [vmem:[%s6392_s13 + $0x58] sm:$0xff]  }
 0x5aa   : > { %v4908_v63 = vpop.f32.mrf.mxu1  ;;  %v4916_v1 = vpop.f32.mrf.mxu0 }
 0x5ab   : > { %v5979_v3 = vadd.f32 %v2441_v59, %v5870_v9  ;;  %v5982_v19 = vadd.f32 %v2445_v62, %v5873_v24  ;;  %v5992_v24 = vpop.permute.xlu1 %2499 }
 0x5ac   : > { %v2379_v4 = vpop.f32.mrf.mxu1  ;;  %v2437_v5 = vpop.f32.mrf.mxu0 }
 0x5ad   : > { %v2442_v8 = vadd.f32 %v2379_v4, %v2126_v56  ;;  %v2446_v10 = vadd.f32 %v2437_v5, %v2222_v36  ;;  %v5230_v36 = vld [vmem:[%s6391_s7 + $0x70] sm:$0xff]  }
 0x5ae   : > { %v4909_v31 = vpop.f32.mrf.mxu1  ;;  %v4917_v13 = vpop.f32.mrf.mxu0 }
 0x5af   : > { %v5987_v16 = vadd.f32 %v2442_v8, %v5876_v43  ;;  %v5990_v14 = vadd.f32 %v2446_v10, %v5879_v11 }
 0x5b0   : > { %v2485_v17 = vpop.f32.mrf.mxu1  ;;  %v2538_v9 = vpop.f32.mrf.mxu0 }
 0x5b1   : > { %v2502_v58 = vmul.f32 %v5984_v7, %v2485_v17  ;;  %v2545_v43 = vmul.f32 %v2538_v9, %v5984_v7 }
 0x5b2   : > { %v4922_v18 = vpop.f32.mrf.mxu1  ;;  %v4928_v20 = vpop.f32.mrf.mxu0 }
 0x5b4   : > { %v2488_v21 = vpop.f32.mrf.mxu1  ;;  %v2541_v50 = vpop.f32.mrf.mxu0 }
 0x5b5   : > { %v2503_v23 = vmul.f32 %v5992_v24, %v2488_v21  ;;  %v2546_v11 = vmul.f32 %v2541_v50, %v5992_v24 }
 0x5b6   : > { %v4923_v25 = vpop.f32.mrf.mxu1  ;;  %v4929_v27 = vpop.f32.mrf.mxu0 }
 0x5b7   : > { %v2593_v30 = vpack.c.bf16 %v2503_v23, %v2502_v58  ;;  %v2596_v32 = vpack.c.bf16 %v2546_v11, %v2545_v43 }
 0x5b8   : > { %v2581_v56 = vpop.f32.mrf.mxu1 }
 0x5b9   : > { %4939 = vmatmul.mubr.msk.bf16.vlgmr.msra.gmra.mxu0 %vm916_vm6, %v2596_v32  ;;  %4945 = vmatmul.mubr.msk.bf16.vlgmr.msra.gmra.mxu1 %vm532_vm1, %v2593_v30  ;;  %v2588_v26 = vmul.f32 %v2581_v56, %v5984_v7 }
 0x5ba   : > { %v4934_v33 = vpop.f32.mrf.mxu1  ;;  %4949 = vmatpush3.bf16.msra.mxu0 %v2700_v22  ;;  %4955 = vmatpush3.bf16.msra.mxu1 %v5225_v29 }
 0x5bb   : > { %4950 = vmatprep.mubr.msk.bf16.mxu0 %vm5374_vm0, %v5373_v0  ;;  %4956 = vmatprep.mubr.msk.bf16.mxu1 %vm5374_vm0, %v5373_v0 }
 0x5bc   : > { %v2584_v35 = vpop.f32.mrf.mxu1  ;;  %4960 = vmatprep.subr.bf16.mxu0 %v5373_v0  ;;  %4966 = vmatprep.subr.bf16.mxu1 %v5373_v0 }
 0x5bd   : > { %v2589_v41 = vmul.f32 %v2584_v35, %v5992_v24 }
 0x5be   : > { %v4935_v38 = vpop.f32.mrf.mxu1 }
 0x5bf   : > { %v2891_v47 = vpack.c.bf16 %v2589_v41, %v2588_v26 }
 0x5c1   : > { %4951 = vmatmul.mubr.msk.bf16.vlgmr.msra.gmra.mxu0 %vm916_vm6, %v2596_v32  ;;  %4957 = vmatmul.mubr.msk.bf16.vlgmr.msra.gmra.mxu1 %vm532_vm1, %v2593_v30 }
 0x5c2   : > { %4961 = vmatpush3.bf16.msra.mxu0 %v2796_v45  ;;  %4967 = vmatpush3.bf16.msra.mxu1 %v5226_v39 }
 0x5c3   : > { %4962 = vmatprep.mubr.msk.bf16.mxu0 %vm5374_vm0, %v5373_v0  ;;  %4968 = vmatprep.mubr.msk.bf16.mxu1 %vm5374_vm0, %v5373_v0 }
 0x5c4   : > { %4972 = vmatprep.subr.bf16.mxu0 %v5373_v0  ;;  %4980 = vmatprep.subr.bf16.mxu1 %v5373_v0 }
 0x5c9   : > { %4963 = vmatmul.mubr.msk.bf16.vlgmr.msra.gmra.mxu0 %vm916_vm6, %v2596_v32  ;;  %4969 = vmatmul.mubr.msk.bf16.vlgmr.msra.gmra.mxu1 %vm532_vm1, %v2593_v30 }
 0x5ca   : > { %4973 = vmatpush3.bf16.msra.mxu0 %v5227_v60  ;;  %4981 = vmatpush3.bf16.msra.mxu1 %v5228_v40 }
 0x5cb   : > { %4974 = vmatprep.subr.bf16.mxu0 %v5373_v0  ;;  %4982 = vmatprep.subr.bf16.mxu1 %v5373_v0 }
 0x5cc   : > { %4976 = vmatprep.mubr.msk.bf16.mxu0 %vm5374_vm0, %v5373_v0  ;;  %4984 = vmatprep.mubr.msk.bf16.mxu1 %vm5374_vm0, %v5373_v0 }
 0x5ce   : > { %4975 = vmatpush3.bf16.msra.mxu0 %v5229_v34  ;;  %4983 = vmatpush3.bf16.msra.mxu1 %v5230_v36 }
 0x5cf   : > { %4988 = vmatprep.subr.bf16.mxu0 %v5373_v0  ;;  %4994 = vmatprep.subr.bf16.mxu1 %v5373_v0 }
 0x5d1   : > { %4977 = vmatmul.mubr.msk.bf16.vlgmr.msra.gmra.mxu0 %vm1224_vm7, %v2891_v47  ;;  %4985 = vmatmul.mubr.msk.bf16.vlgmr.msra.gmra.mxu1 %vm1224_vm7, %v2891_v47 }
 0x5d2   : > { %4989 = vmatpush3.bf16.msra.mxu0 %v2593_v30  ;;  %4995 = vmatpush3.bf16.msra.mxu1 %v2596_v32 }
 0x5d3   : > { %4990 = vmatprep.mubr.msk.bf16.mxu0 %vm5374_vm0, %v5373_v0  ;;  %4996 = vmatprep.mubr.msk.bf16.mxu1 %vm5374_vm0, %v5373_v0 }
 0x5d4   : > { %5000 = vmatprep.subr.bf16.mxu0 %v5373_v0  ;;  %5006 = vmatprep.subr.bf16.mxu1 %v5373_v0 }
 0x5d9   : > { %4991 = vmatmul.mubr.msk.bf16.vlgmr.msra.gmra.mxu0 %vm532_vm1, %v5681_v61  ;;  %4997 = vmatmul.mubr.msk.bf16.vlgmr.msra.gmra.mxu1 %vm532_vm1, %v5681_v61 }
 0x5da   : > { %5001 = vmatpush3.bf16.msra.mxu0 %v2891_v47  ;;  %5002 = vmatprep.mubr.msk.bf16.mxu0 %vm5374_vm0, %v5373_v0 }
 0x5db   : > { %5012 = vmatprep.subr.bf16.mxu0 %v5373_v0  ;;  %5008 = vmatprep.mubr.msk.bf16.mxu1 %vm5374_vm0, %v5373_v0 }
 0x5dc   : > { %5007 = vmatpush3.bf16.msra.mxu1 %v3156_v46 }
 0x5dd   : > { %5018 = vmatprep.subr.bf16.mxu1 %v5373_v0 }
 0x5e1   : > { %5003 = vmatmul.mubr.msk.bf16.vlgmr.msra.gmra.mxu0 %vm532_vm1, %v5681_v61 }
 0x5e2   : > { %5014 = vmatprep.mubr.msk.bf16.mxu0 %vm5374_vm0, %v5373_v0  ;;  %5013 = vmatpush3.bf16.msra.mxu0 %v5231_v44 }
 0x5e3   : > { %5024 = vmatprep.subr.bf16.mxu0 %v5373_v0 }
 0x679   : > { %v2637_v48 = vpop.f32.mrf.mxu0  ;;  %v2687_v49 = vpop.f32.mrf.mxu1 }
 0x67a   : > { %v2688_v28 = vadd.f32 %v2687_v49, %v2637_v48 }
 0x67b   : > { %v4940_v51 = vpop.f32.mrf.mxu0  ;;  %v4946_v52 = vpop.f32.mrf.mxu1 }
 0x67c   : > { %v5232_v51 = vld [vmem:[%s6392_s13 + $0x68] sm:$0xff]  }
 0x67d   : > { %v2640_v53 = vpop.f32.mrf.mxu0  ;;  %v2690_v54 = vpop.f32.mrf.mxu1 }
 0x67e   : > { %v2691_v55 = vadd.f32 %v2690_v54, %v2640_v53 }
 0x67f   : > { %v4941_v59 = vpop.f32.mrf.mxu0  ;;  %v4947_v62 = vpop.f32.mrf.mxu1 }
 0x681   : > { %v2736_v63 = vpop.f32.mrf.mxu0  ;;  %v2783_v1 = vpop.f32.mrf.mxu1 }
 0x682   : > { %v2784_v4 = vadd.f32 %v2783_v1, %v2736_v63  ;;  %v4462_v63 = vld [vmem:[%s6345_s8 + $0x38] sm:$0xf] }
 0x683   : > { %v4952_v5 = vpop.f32.mrf.mxu0  ;;  %v4958_v8 = vpop.f32.mrf.mxu1 }
 0x684   : > { %v3351_v5 = vsel %vm920_vm5, %v4462_v63, 0  ;;  %v5234_v8 = vld [vmem:[%s6391_s7 + $0x88] sm:$0xff]  }
 0x685   : > { %v2739_v10 = vpop.f32.mrf.mxu0  ;;  %v2786_v31 = vpop.f32.mrf.mxu1 }
 0x686   : > { %v2787_v13 = vadd.f32 %v2786_v31, %v2739_v10  ;;  %v5235_v10 = vld [vmem:[%s6391_s7 + $0x98] sm:$0xff]   ;;  %v5236_v31 = vld [vmem:[%s6391_s7 + $0x80] sm:$0xff]  }
 0x687   : > { %v4953_v17 = vpop.f32.mrf.mxu0  ;;  %v4959_v9 = vpop.f32.mrf.mxu1 }
 0x689   : > { %v2832_v18 = vpop.f32.mrf.mxu0  ;;  %v2879_v20 = vpop.f32.mrf.mxu1 }
 0x68a   : > { %v2880_v21 = vadd.f32 %v2879_v20, %v2832_v18  ;;  %v5238_v20 = vld [vmem:[%s6393_s25 + $0x8] sm:$0xff]  }
 0x68b   : > { %v4964_v50 = vpop.f32.mrf.mxu0  ;;  %v4970_v57 = vpop.f32.mrf.mxu1 }
 0x68c   : > { %v6083_v58 = vadd.f32 %v2880_v21, %v5973_v2  ;;  %v5239_v21 = vld [vmem:[%s6394_s19] sm:$0xff]  }
 0x68d   : > { %v2835_v43 = vpop.f32.mrf.mxu0  ;;  %v2882_v23 = vpop.f32.mrf.mxu1 }
 0x68e   : > { %v2883_v11 = vadd.f32 %v2882_v23, %v2835_v43 }
 0x68f   : > { %v4965_v25 = vpop.f32.mrf.mxu0  ;;  %v4971_v27 = vpop.f32.mrf.mxu1 }
 0x690   : > { %v6086_v29 = vadd.f32 %v2883_v11, %v5976_v6 }
 0x691   : > { %v2941_v30 = vpop.f32.mrf.mxu0  ;;  %v2999_v32 = vpop.f32.mrf.mxu1 }
 0x692   : > { %v3006_v22 = vadd.f32 %v2941_v30, %v2688_v28  ;;  %v3010_v56 = vadd.f32 %v2999_v32, %v2784_v4  ;;  %v5233_v4 = vld [vmem:[%s6392_s13 + $0x70] sm:$0xff]  }
 0x693   : > { %v4978_v33 = vpop.f32.mrf.mxu0  ;;  %v4986_v35 = vpop.f32.mrf.mxu1 }
 0x694   : > { %v6089_v37 = vadd.f32 %v3006_v22, %v5979_v3  ;;  %v6092_v2 = vadd.f32 %v3010_v56, %v5982_v19  ;;  %v4456_v19 = vld [vmem:[%s6345_s8 + $0x34] sm:$0xf] }
 0x695   : > { %v2944_v38 = vpop.f32.mrf.mxu0  ;;  %v3002_v39 = vpop.f32.mrf.mxu1  ;;  %v3255_v54 = vsel %vm920_vm5, %v4456_v19, 0 }
 0x696   : > { %v3007_v45 = vadd.f32 %v2944_v38, %v2691_v55  ;;  %v3011_v60 = vadd.f32 %v3002_v39, %v2787_v13  ;;  %v5237_v13 = vld [vmem:[%s6391_s7 + $0x90] sm:$0xff]  }
 0x697   : > { %v4979_v40 = vpop.f32.mrf.mxu0  ;;  %v4987_v34 = vpop.f32.mrf.mxu1 }
 0x698   : > { %v6095_v6 = vadd.f32 %v3007_v45, %v5987_v16  ;;  %v6098_v36 = vadd.f32 %v3011_v60, %v5990_v14 }
 0x699   : > { %v3050_v41 = vpop.f32.mrf.mxu0  ;;  %v3093_v26 = vpop.f32.mrf.mxu1 }
 0x69a   : > { %v3057_v46 = vmul.f32 %v3050_v41, %v5984_v7  ;;  %v3100_v48 = vmul.f32 %v3093_v26, %v5984_v7 }
 0x69b   : > { %v4992_v47 = vpop.f32.mrf.mxu0  ;;  %v4998_v3 = vpop.f32.mrf.mxu1 }
 0x69d   : > { %v3053_v42 = vpop.f32.mrf.mxu0  ;;  %v3096_v44 = vpop.f32.mrf.mxu1 }
 0x69e   : > { %v3058_v16 = vmul.f32 %v3053_v42, %v5992_v24  ;;  %v3101_v49 = vmul.f32 %v3096_v44, %v5992_v24 }
 0x69f   : > { %v4993_v14 = vpop.f32.mrf.mxu0  ;;  %v4999_v28 = vpop.f32.mrf.mxu1 }
 0x6a0   : > { %v3148_v52 = vpack.c.bf16 %v3058_v16, %v3057_v46  ;;  %v3151_v53 = vpack.c.bf16 %v3101_v49, %v3100_v48 }
 0x6a1   : > { %v3136_v55 = vpop.f32.mrf.mxu0 }
 0x6a2   : > { %5009 = vmatmul.mubr.msk.bf16.vlgmr.msra.gmra.mxu1 %vm916_vm6, %v3151_v53  ;;  %5015 = vmatmul.mubr.msk.bf16.vlgmr.msra.gmra.mxu0 %vm532_vm1, %v3148_v52  ;;  %v3143_v9 = vmul.f32 %v3136_v55, %v5984_v7 }
 0x6a3   : > { %v5004_v59 = vpop.f32.mrf.mxu0  ;;  %5019 = vmatpush3.bf16.msra.mxu1 %v3255_v54  ;;  %5025 = vmatpush3.bf16.msra.mxu0 %v5232_v51  ;;  %v4484_v54 = vld [vmem:[%s6395_s24 + $0x1] ss:$0 sm:$0xff] }
 0x6a4   : > { %5020 = vmatprep.mubr.msk.bf16.mxu1 %vm5374_vm0, %v5373_v0  ;;  %5026 = vmatprep.mubr.msk.bf16.mxu0 %vm5374_vm0, %v5373_v0 }
 0x6a5   : > { %v3139_v62 = vpop.f32.mrf.mxu0  ;;  %5030 = vmatprep.subr.bf16.mxu1 %v5373_v0  ;;  %5036 = vmatprep.subr.bf16.mxu0 %v5373_v0 }
 0x6a6   : > { %v3144_v17 = vmul.f32 %v3139_v62, %v5992_v24 }
 0x6a7   : > { %v5005_v1 = vpop.f32.mrf.mxu0 }
 0x6a8   : > { %v3446_v18 = vpack.c.bf16 %v3144_v17, %v3143_v9 }
 0x6aa   : > { %5021 = vmatmul.mubr.msk.bf16.vlgmr.msra.gmra.mxu1 %vm916_vm6, %v3151_v53  ;;  %5027 = vmatmul.mubr.msk.bf16.vlgmr.msra.gmra.mxu0 %vm532_vm1, %v3148_v52 }
 0x6ab   : > { %5031 = vmatpush3.bf16.msra.mxu1 %v3351_v5  ;;  %5037 = vmatpush3.bf16.msra.mxu0 %v5233_v4 }
 0x6ac   : > { %5032 = vmatprep.mubr.msk.bf16.mxu1 %vm5374_vm0, %v5373_v0  ;;  %5038 = vmatprep.mubr.msk.bf16.mxu0 %vm5374_vm0, %v5373_v0 }
 0x6ad   : > { %5042 = vmatprep.subr.bf16.mxu1 %v5373_v0  ;;  %5050 = vmatprep.subr.bf16.mxu0 %v5373_v0 }
 0x6b2   : > { %5033 = vmatmul.mubr.msk.bf16.vlgmr.msra.gmra.mxu1 %vm916_vm6, %v3151_v53  ;;  %5039 = vmatmul.mubr.msk.bf16.vlgmr.msra.gmra.mxu0 %vm532_vm1, %v3148_v52 }
 0x6b3   : > { %5043 = vmatpush3.bf16.msra.mxu1 %v5234_v8  ;;  %5051 = vmatpush3.bf16.msra.mxu0 %v5235_v10 }
 0x6b4   : > { %5044 = vmatprep.subr.bf16.mxu1 %v5373_v0  ;;  %5052 = vmatprep.subr.bf16.mxu0 %v5373_v0 }
 0x6b5   : > { %5046 = vmatprep.mubr.msk.bf16.mxu1 %vm5374_vm0, %v5373_v0  ;;  %5054 = vmatprep.mubr.msk.bf16.mxu0 %vm5374_vm0, %v5373_v0 }
 0x6b7   : > { %5045 = vmatpush3.bf16.msra.mxu1 %v5236_v31  ;;  %5053 = vmatpush3.bf16.msra.mxu0 %v5237_v13 }
 0x6b8   : > { %5058 = vmatprep.subr.bf16.mxu1 %v5373_v0  ;;  %5066 = vmatprep.subr.bf16.mxu0 %v5373_v0 }
 0x6ba   : > { %5047 = vmatmul.mubr.msk.bf16.vlgmr.msra.gmra.mxu1 %vm1224_vm7, %v3446_v18  ;;  %5055 = vmatmul.mubr.msk.bf16.vlgmr.msra.gmra.mxu0 %vm1224_vm7, %v3446_v18 }
 0x6bb   : > { %5062 = vmatprep.mubr.msk.bf16.mxu1 %vm5374_vm0, %v5373_v0  ;;  %5068 = vmatprep.mubr.msk.bf16.mxu0 %vm5374_vm0, %v5373_v0 }
 0x6bc   : > { %5059 = vmatpush3.bf16.msra.mxu1 %v5238_v20 }
 0x6bd   : > { %5060 = vmatprep.subr.bf16.mxu1 %v5373_v0 }
 0x6c0   : > { %5061 = vmatpush3.bf16.msra.mxu1 %v5239_v21 }
 0x6c1   : > { %5072 = vmatprep.subr.bf16.mxu1 %v5373_v0 }
 0x762   : > { %v3192_v50 = vpop.f32.mrf.mxu1  ;;  %v3242_v57 = vpop.f32.mrf.mxu0 }
 0x763   : > { %v3243_v43 = vadd.f32 %v3242_v57, %v3192_v50 }
 0x764   : > { %v5010_v23 = vpop.f32.mrf.mxu1  ;;  %v5016_v11 = vpop.f32.mrf.mxu0 }
 0x765   : > { %v6186_v23 = vld [vmem:[%s5590_s18] sm:$0xff]  ;;  %v6190_v11 = vld [vmem:[%s5590_s18 + $0x8] sm:$0xff] }
 0x766   : > { %v3195_v25 = vpop.f32.mrf.mxu1  ;;  %v3245_v27 = vpop.f32.mrf.mxu0 }
 0x767   : > { %v3246_v30 = vadd.f32 %v3245_v27, %v3195_v25  ;;  %v5278_v27 = vld [vmem:[%s5546_s29] sm:$0xff]   ;;  %s6397_s29 = sld [smem:[#allocation6_spill]] }
 0x768   : > { %v5011_v32 = vpop.f32.mrf.mxu1  ;;  %v5017_v22 = vpop.f32.mrf.mxu0 }
 0x769   : > { %v5241_v32 = vld [vmem:[%s6394_s19 + $0x10] sm:$0xff]  }
 0x76a   : > { %v3291_v56 = vpop.f32.mrf.mxu1  ;;  %v3338_v33 = vpop.f32.mrf.mxu0 }
 0x76b   : > { %v3339_v49 = vadd.f32 %v3338_v33, %v3291_v56 }
 0x76c   : > { %v5022_v35 = vpop.f32.mrf.mxu1  ;;  %v5028_v38 = vpop.f32.mrf.mxu0 }
 0x76d   : > { %s6400_s25 = sand.u32 1, %s6397_s29  }
 0x76e   : > { %v3294_v39 = vpop.f32.mrf.mxu1  ;;  %v3341_v45 = vpop.f32.mrf.mxu0  ;;  %s6286_s15 = scalar_lea.sflag [#allocation3], %s6400_s25 }
 0x76f   : > { %v3342_v62 = vadd.f32 %v3341_v45, %v3294_v39 }
 0x770   : > { %v5023_v60 = vpop.f32.mrf.mxu1  ;;  %v5029_v40 = vpop.f32.mrf.mxu0 }
 0x772   : > { %v3387_v34 = vpop.f32.mrf.mxu1  ;;  %v3434_v41 = vpop.f32.mrf.mxu0 }
 0x773   : > { %v3435_v26 = vadd.f32 %v3434_v41, %v3387_v34 }
 0x774   : > { %v5034_v47 = vpop.f32.mrf.mxu1  ;;  %v5040_v3 = vpop.f32.mrf.mxu0 }
 0x775   : > { %v3569_v42 = vadd.f32 %v3435_v26, %v6083_v58  ;;  %v5242_v3 = vld [vmem:[%s6394_s19 + $0x28] sm:$0xff]  }
 0x776   : > { %v3390_v44 = vpop.f32.mrf.mxu1  ;;  %v3437_v19 = vpop.f32.mrf.mxu0 }
 0x777   : > { %v3438_v46 = vadd.f32 %v3437_v19, %v3390_v44 }
 0x778   : > { %v5035_v48 = vpop.f32.mrf.mxu1  ;;  %v5041_v16 = vpop.f32.mrf.mxu0 }
 0x779   : > { %v3570_v14 = vadd.f32 %v3438_v46, %v6086_v29 }
 0x77a   : > { %v3496_v28 = vpop.f32.mrf.mxu1  ;;  %v3554_v51 = vpop.f32.mrf.mxu0 }
 0x77b   : > { %v3561_v52 = vadd.f32 %v3496_v28, %v3243_v43  ;;  %v3565_v53 = vadd.f32 %v3554_v51, %v3339_v49 }
 0x77c   : > { %v5048_v55 = vpop.f32.mrf.mxu1  ;;  %v5056_v59 = vpop.f32.mrf.mxu0 }
 0x77d   : > { %v6178_v58 = vadd.f32 %v3561_v52, %v6089_v37  ;;  %v3567_v63 = vadd.f32 %v3565_v53, %v6092_v2  ;;  %v5244_v55 = vld [vmem:[%s6394_s19 + $0x38] sm:$0xff]  }
 0x77e   : > { %v3499_v1 = vpop.f32.mrf.mxu1  ;;  %v3557_v4 = vpop.f32.mrf.mxu0 }
 0x77f   : > { %v3600_v5 = vadd.f32 %v4484_v54, %v3567_v63  ;;  %v3562_v29 = vadd.f32 %v3499_v1, %v3246_v30  ;;  %v3566_v8 = vadd.f32 %v3557_v4, %v3342_v62  ;;  %v5240_v30 = vld [vmem:[%s6394_s19 + $0x18] sm:$0xff]   ;;  %v5245_v1 = vld [vmem:[%s6394_s19 + $0x30] sm:$0xff]  }
 0x780   : > { %v5049_v10 = vpop.f32.mrf.mxu1  ;;  %v5057_v31 = vpop.f32.mrf.mxu0 }
 0x781   : > { %v4485_v13 = vmul.f32 -1.442695, %v3600_v5  ;;  %v6182_v17 = vadd.f32 %v3562_v29, %v6095_v6  ;;  %v3568_v9 = vadd.f32 %v3566_v8, %v6098_v36  ;;  %v5246_v8 = vld [vmem:[%s6394_s19 + $0x48] sm:$0xff]   ;;  %v5247_v10 = vld [vmem:[%s6394_s19 + $0x40] sm:$0xff]  }
 0x783   : > { %v3601_v18 = vadd.f32 %v4484_v54, %v3568_v9  ;;  %5256 = vpow2.f32 %v4485_v13 }
 0x785   : > { %v4486_v37 = vmul.f32 -1.442695, %v3601_v18 }
 0x787   : > { %5258 = vpow2.f32 %v4486_v37 }
 0x790   : > { %v5257_v2 = vpop.eup %5256 }
 0x791   : > { %v3608_v20 = vadd.f32 1.0, %v5257_v2 }
 0x793   : > { %5260 = vrcp.f32 %v3608_v20 }
 0x794   : > { %v5259_v21 = vpop.eup %5258 }
 0x795   : > { %v3609_v50 = vadd.f32 1.0, %v5259_v21 }
 0x797   : > { %5262 = vrcp.f32 %v3609_v50 }
 0x7a0   : > { %v5261_v57 = vpop.eup %5260 }
 0x7a1   : > { %v3614_v6 = vmul.f32 %v6186_v23, %v5261_v57 }
 0x7a4   : > { %v5263_v43 = vpop.eup %5262 }
 0x7a5   : > { %v3615_v36 = vmul.f32 %v6190_v11, %v5263_v43 }
 0x7a7   : > { %v3620_v25 = vpack.c.bf16 %v3615_v36, %v3614_v6 }
 0x7a9   : > { %5063 = vmatmul.mubr.msk.bf16.vlgmr.msra.gmra.mxu1 %vm1224_vm7, %v3620_v25  ;;  %5067 = vmatpush3.bf16.msra.mxu0 %v3620_v25 }
 0x7aa   : > { %5076 = vmatprep.mubr.msk.bf16.mxu1 %vm5374_vm0, %v5373_v0  ;;  %5080 = vmatprep.subr.bf16.mxu0 %v5373_v0 }
 0x7ab   : > { %5073 = vmatpush3.bf16.msra.mxu1 %v5240_v30 }
 0x7ac   : > { %5069 = vmatmul.mubr.msk.bf16.vlgmr.msra.gmra.mxu0 %vm532_vm1, %v5278_v27  ;;  %5074 = vmatprep.subr.bf16.mxu1 %v5373_v0 }
 0x7ad   : > { %5082 = vmatprep.mubr.msk.bf16.mxu0 %vm5374_vm0, %v5373_v0 }
 0x7af   : > { %5075 = vmatpush3.bf16.msra.mxu1 %v5241_v32 }
 0x7b0   : > { %5086 = vmatprep.subr.bf16.mxu1 %v5373_v0 }
 0x869   : > { %v3670_v22 = vpop.f32.mrf.mxu1 }
 0x86a   : > { %v3677_v56 = vadd.f32 %v3670_v22, %v3569_v42  ;;  %v5243_v42 = vld [vmem:[%s6394_s19 + $0x20] sm:$0xff]  }
 0x86b   : > { %v5064_v33 = vpop.f32.mrf.mxu1  ;;  %v4480_v22 = vld [vmem:[%s6395_s24] ss:$0 sm:$0xff] }
 0x86c   : > { %v3713_v35 = vpop.f32.mrf.mxu0  ;;  %v3579_v33 = vadd.f32 %v4480_v22, %v6182_v17 }
 0x86d   : > { %v3673_v38 = vpop.f32.mrf.mxu1  ;;  %v3720_v34 = vmul.f32 %v3713_v35, %v5763_v12 }
 0x86e   : > { %v3678_v39 = vadd.f32 %v3673_v38, %v3570_v14  ;;  %v5070_v45 = vpop.f32.mrf.mxu0  ;;  %v4482_v38 = vmul.f32 -1.442695, %v3579_v33 }
 0x86f   : > { %v5065_v60 = vpop.f32.mrf.mxu1 }
 0x870   : > { %v3716_v40 = vpop.f32.mrf.mxu0 }
 0x871   : > { %v3721_v41 = vmul.f32 %v3716_v40, %v5765_v15  ;;  %v4523_v40 = vld [vmem:[%s6395_s24 + $0x2] ss:$0 sm:$0xff] }
 0x872   : > { %v5071_v26 = vpop.f32.mrf.mxu0 }
 0x873   : > { %v3727_v47 = vpack.c.bf16 %v3721_v41, %v3720_v34 }
 0x875   : > { %5077 = vmatmul.mubr.msk.bf16.vlgmr.msra.gmra.mxu1 %vm1224_vm7, %v3727_v47  ;;  %5081 = vmatpush3.bf16.msra.mxu0 %v3727_v47 }
 0x876   : > { %5094 = vmatprep.subr.bf16.mxu0 %v5373_v0  ;;  %5090 = vmatprep.mubr.msk.bf16.mxu1 %vm5374_vm0, %v5373_v0 }
 0x877   : > { %5087 = vmatpush3.bf16.msra.mxu1 %v5242_v3 }
 0x878   : > { %5083 = vmatmul.mubr.msk.bf16.vlgmr.msra.gmra.mxu0 %vm532_vm1, %v5278_v27  ;;  %5088 = vmatprep.subr.bf16.mxu1 %v5373_v0 }
 0x879   : > { %5095 = vmatpush3.bf16.msra.mxu0 %v3620_v25  ;;  %5096 = vmatprep.mubr.msk.bf16.mxu0 %vm5374_vm0, %v5373_v0 }
 0x87a   : > { %5108 = vmatprep.subr.bf16.mxu0 %v5373_v0 }
 0x87b   : > { %5089 = vmatpush3.bf16.msra.mxu1 %v5243_v42 }
 0x87c   : > { %5100 = vmatprep.subr.bf16.mxu1 %v5373_v0 }
 0x880   : > { %5097 = vmatmul.mubr.msk.bf16.vlgmr.msra.gmra.mxu0 %vm532_vm1, %v5681_v61 }
 0x881   : > { %5110 = vmatprep.mubr.msk.bf16.mxu0 %vm5374_vm0, %v5373_v0 }
 0x935   : > { %v3777_v44 = vpop.f32.mrf.mxu1 }
 0x936   : > { %v3784_v19 = vadd.f32 %v3777_v44, %v3677_v56  ;;  %v3578_v56 = vadd.f32 %v4480_v22, %v6178_v58 }
 0x937   : > { %v5078_v46 = vpop.f32.mrf.mxu1 }
 0x938   : > { %v3820_v48 = vpop.f32.mrf.mxu0  ;;  %v4481_v35 = vmul.f32 -1.442695, %v3578_v56 }
 0x939   : > { %v3780_v16 = vpop.f32.mrf.mxu1  ;;  %v3827_v52 = vmul.f32 %v3820_v48, %v5763_v12 }
 0x93a   : > { %v3785_v49 = vadd.f32 %v3780_v16, %v3678_v39  ;;  %v5084_v14 = vpop.f32.mrf.mxu0  ;;  %5264 = vpow2.f32 %v4481_v35 }
 0x93b   : > { %v5079_v28 = vpop.f32.mrf.mxu1  ;;  %5266 = vpow2.f32 %v4482_v38 }
 0x93c   : > { %v3823_v51 = vpop.f32.mrf.mxu0 }
 0x93d   : > { %v3828_v53 = vmul.f32 %v3823_v51, %v5765_v15 }
 0x93e   : > { %v5085_v54 = vpop.f32.mrf.mxu0 }
 0x93f   : > { %v3834_v59 = vpack.c.bf16 %v3828_v53, %v3827_v52 }
 0x940   : > { %v3927_v62 = vpop.f32.mrf.mxu0 }
 0x941   : > { %5091 = vmatmul.mubr.msk.bf16.vlgmr.msra.gmra.mxu1 %vm1224_vm7, %v3834_v59  ;;  %v3934_v15 = vmul.f32 %v3927_v62, %v5984_v7 }
 0x942   : > { %v5098_v63 = vpop.f32.mrf.mxu0  ;;  %5101 = vmatpush3.bf16.msra.mxu1 %v5244_v55  ;;  %5104 = vmatprep.mubr.msk.bf16.mxu1 %vm5374_vm0, %v5373_v0 }
 0x943   : > { %5102 = vmatprep.subr.bf16.mxu1 %v5373_v0 }
 0x944   : > { %v3930_v12 = vpop.f32.mrf.mxu0 }
 0x945   : > { %v3935_v4 = vmul.f32 %v3930_v12, %v5992_v24 }
 0x946   : > { %v5099_v5 = vpop.f32.mrf.mxu0  ;;  %5103 = vmatpush3.bf16.msra.mxu1 %v5245_v1 }
 0x947   : > { %v3941_v29 = vpack.c.bf16 %v3935_v4, %v3934_v15  ;;  %5114 = vmatprep.subr.bf16.mxu1 %v5373_v0  ;;  %v5265_v39 = vpop.eup %5264 }
 0x948   : > { %v3586_v45 = vadd.f32 1.0, %v5265_v39 }
 0x949   : > { %5105 = vmatmul.mubr.msk.bf16.vlgmr.msra.gmra.mxu1 %vm1224_vm7, %v3941_v29  ;;  %5109 = vmatpush3.bf16.msra.mxu0 %v3941_v29 }
 0x94a   : > { %5118 = vmatprep.mubr.msk.bf16.mxu1 %vm5374_vm0, %v5373_v0  ;;  %5115 = vmatpush3.bf16.msra.mxu1 %v5246_v8  ;;  %5268 = vrcp.f32 %v3586_v45 }
 0x94b   : > { %5116 = vmatprep.subr.bf16.mxu1 %v5373_v0 }
 0x94c   : > { %5111 = vmatmul.mubr.msk.bf16.vlgmr.msra.gmra.mxu0 %vm532_vm1, %v5681_v61 }
 0x94e   : > { %5117 = vmatpush3.bf16.msra.mxu1 %v5247_v10 }
 0xa01   : > { %v3884_v31 = vpop.f32.mrf.mxu1 }
 0xa02   : > { %v3891_v13 = vadd.f32 %v3884_v31, %v3784_v19 }
 0xa03   : > { %v5092_v9 = vpop.f32.mrf.mxu1 }
 0xa05   : > { %v3887_v18 = vpop.f32.mrf.mxu1 }
 0xa06   : > { %v3892_v37 = vadd.f32 %v3887_v18, %v3785_v49 }
 0xa07   : > { %v5093_v2 = vpop.f32.mrf.mxu1 }
 0xa09   : > { %v3991_v20 = vpop.f32.mrf.mxu1 }
 0xa0a   : > { %v3998_v61 = vadd.f32 %v3991_v20, %v3891_v13 }
 0xa0b   : > { %v5106_v21 = vpop.f32.mrf.mxu1 }
 0xa0c   : > { %v4034_v50 = vpop.f32.mrf.mxu0 }
 0xa0d   : > { %v3994_v57 = vpop.f32.mrf.mxu1  ;;  %v4041_v25 = vmul.f32 %v4034_v50, %v5984_v7  ;;  %v5267_v7 = vpop.eup %5266 }
 0xa0e   : > { %v3999_v43 = vadd.f32 %v3994_v57, %v3892_v37  ;;  %v5112_v6 = vpop.f32.mrf.mxu0  ;;  %v5269_v42 = vpop.eup %5268 }
 0xa0f   : > { %v5107_v36 = vpop.f32.mrf.mxu1  ;;  %v4121_v19 = vsub.f32 1.0, %v5269_v42  ;;  %v4119_v16 = vmul.f32 %v6186_v23, %v5269_v42 }
 0xa10   : > { %v4037_v0 = vpop.f32.mrf.mxu0 }
 0xa11   : > { %v4042_v27 = vmul.f32 %v4037_v0, %v5992_v24  ;;  %v3587_v24 = vadd.f32 1.0, %v5267_v7 }
 0xa12   : > { %v5113_v30 = vpop.f32.mrf.mxu0 }
 0xa13   : > { %v4048_v32 = vpack.c.bf16 %v4042_v27, %v4041_v25  ;;  %5270 = vrcp.f32 %v3587_v24 }
 0xa15   : > { %5119 = vmatmul.mubr.msk.bf16.vlgmr.msra.gmra.mxu1 %vm1224_vm7, %v4048_v32 }
 0xa20   : > { %v5271_v44 = vpop.eup %5270 }
 0xa21   : > { %v4122_v49 = vsub.f32 1.0, %v5271_v44  ;;  %v4120_v52 = vmul.f32 %v6190_v11, %v5271_v44 }
 0xad5   : > { %v4098_v60 = vpop.f32.mrf.mxu1 }
 0xad6   : > { %v4105_v34 = vadd.f32 %v4098_v60, %v3998_v61 }
 0xad7   : > { %v5120_v41 = vpop.f32.mrf.mxu1 }
 0xad8   : > { %v4115_v26 = vadd.f32 %v4523_v40, %v4105_v34 }
 0xad9   : > { %v4101_v58 = vpop.f32.mrf.mxu1 }
 0xada   : > { %5272 = vtanh.f32 %v4115_v26  ;;  %v4106_v17 = vadd.f32 %v4101_v58, %v3999_v43 }
 0xadb   : > { %v5121_v47 = vpop.f32.mrf.mxu1 }
 0xadc   : > { %v4116_v3 = vadd.f32 %v4523_v40, %v4106_v17 }
 0xade   : > { %5274 = vtanh.f32 %v4116_v3 }
 0xae7   : > { %v5273_v46 = vpop.eup %5272 }
 0xae8   : > { %v4123_v48 = vmul.f32 %v5273_v46, %v4121_v19 }
 0xaea   : > { %v4125_v14 = vadd.f32 %v4123_v48, %v4119_v16 }
 0xaeb   : > { %v5275_v28 = vpop.eup %5274 }
 0xaec   : > { %v4124_v51 = vmul.f32 %v5275_v28, %v4122_v49  ;;  %4127 = vst.msk [vmem:[%s5590_s18] sm:$0xff] %vm1224_vm7, %v4125_v14 }
 0xaee   : > { %v4126_v23 = vadd.f32 %v4124_v51, %v4120_v52 }
 0xaf0   : > { %4128 = vst.msk [vmem:[%s5590_s18 + $0x8] sm:$0xff] %vm1224_vm7, %v4126_v23 }
 0xaf1   : > { %5292 = shalt.err (!%p5289_p8)
}
 0xaf2   : > { %s5293_s18 = scalar_lea.hbm %s6278_s11, 256  ;;  %s5297_s30 = scalar_lea.hbm %s6399_s10, 512 }
 0xaf3   : > { %p5294_p10 = scmp.ne.s32.totalorder %s6278_s11, %s5293_s18  ;;  %p5298_p13 = scmp.lt.s32.totalorder %s6278_s11, %s6399_s10 }
 0xaf4   : > { %p5299_p0 = scmp.lt.s32.totalorder %s5297_s30, %s5293_s18 }
 0xaf5   : > { %p5295_p11 = pnand %p5294_p10, %p5499_p3 }
 0xaf6   : > { %p5300_p1 = por %p5299_p0, %p5298_p13 }
 0xaf7   : > { %p5296_p12 = pneg %p5295_p11 }
 0xaf9   : > { %p5301_p2 = pnand %p5300_p1, %p5296_p12 }
 0xafb   : > { %5304 = shalt.err (!%p5301_p2)
}
 0xafc   : > { %s5378_s9 = smov 128   ;;  %s5379_s3 = smov 8  }
 0xafd   : > { %5122 = dma.vmem_to_hbm [thread:$0]  (%p5499_p3), %s6280_s14, 256, %s6278_s11, %s6286_s15, %s5378_s9, %s5378_s9, %s5379_s3  }
 0xafe PF: > { %s6401_s25 = sld [smem:[#allocation11_spill]] }
 0xaff   : > { %s6402_s28 = sld [smem:[#allocation5_spill]] }
 0xb04   : > { %p5128_p4 = scmp.ge.s32.totalorder %s6401_s25, 2 }
 0xb05   : > { %s4174_s20 = sand.u32 1, %s6402_s28  }
 0xb06   : > { %p5125_p5 = pnand %p5128_p4, %p5509_p9  ;;  %s4175_s17 = scalar_lea.sflag [#allocation3], %s4174_s20 }
 0xb08   : > { %p5126_p6 = pneg %p5125_p5 }
 0xb0a   : > { %5338 = dma.done.wait (%p5126_p6), %s4175_s17, 256  }
 0xb0b   : > { %5340 = vsyncadd (%p5126_p6), %s4175_s17, 4294967040  ;;  %s27_s15 = sadd.s32 1, %s6401_s25   ;;  %s6404_s25 = sld [smem:[#allocation6_spill]] }
 0xb0c   : > { %p24_p7 = scmp.ge.s32.totalorder %s27_s15, 10   ;;  %s6405_s26 = sld [smem:[#allocation7_spill]] }
 0xb0d   : > { %s6406_s27 = sld [smem:[#allocation16_spill]] }
 0xb0e   : > { %s6407_s28 = sld [smem:[#allocation9_spill]]  ;;  %26 = sbr.rel (!%p24_p7) target bundleno = 12 (0xc), region = 172 }
 0xb0f   : > { %s6408_s29 = sld [smem:[#allocation10_spill]] }
 0xb10   : > { %s6409_s30 = sld [smem:[#allocation12_spill]] }
 0xb11   : > { %s6410_s14 = sld [smem:[#allocation14_spill]] }
 0xb13   :  { %4180 = vsyncpa [#allocation3], 1 }
 0xb14   :  { %4182 = vsyncpa [#allocation3 + $0x1], 1 }

// kernel: oddcrnn_forward.3
= control target key start
LH: loop header
LB: loop body
LE: loop exit
PB: predicated region body
PF: predicated region fallthrough
CT: control target
= control target key end

     0   :  { %s6257_s0 = inlined_call_operand.vmem [shape: f32[2,4,16,16], index: 0, kind: input, shape index: {}]   ;;  %s6258_s1 = inlined_call_operand.vmem [shape: bf16[2,4,16,16], index: 1, kind: input, shape index: {}]   ;;  %s6259_s2 = inlined_call_operand.vmem [shape: bf16[16,16], index: 2, kind: input, shape index: {}]   ;;  %s6260_s3 = inlined_call_operand.vmem [shape: f32[16,8], index: 3, kind: input, shape index: {}]   ;;  %s6261_s4 = inlined_call_operand.vmem [shape: f32[2,16,32], index: 4, kind: input, shape index: {}]   ;;  %s6262_s5 = inlined_call_operand.vmem [shape: bf16[3,16,16], index: 5, kind: input, shape index: {}]   ;;  %s6263_s6 = inlined_call_operand.vmem [shape: f32[1,16], index: 6, kind: input, shape index: {}]   ;;  %s6264_s7 = inlined_call_operand.vmem [shape: bf16[15,16,32], index: 7, kind: input, shape index: {}]   ;;  %s6265_s8 = inlined_call_operand.vmem [shape: bf16[15,8,32], index: 8, kind: input, shape index: {}]   ;;  %s6266_s9 = inlined_call_operand.vmem [shape: bf16[10,32,32], index: 9, kind: input, shape index: {}]   ;;  %s6267_s10 = inlined_call_operand.vmem [shape: bf16[5,32,32], index: 10, kind: input, shape index: {}]   ;;  %s6268_s11 = inlined_call_operand.vmem [shape: f32[3,1,32], index: 11, kind: input, shape index: {}]   ;;  %s6269_s12 = inlined_call_operand.hbm [shape: f32[2,16,32], index: 12, kind: output, shape index: {}]  }
   0x1   :  { %6286 = sst [smem:[#allocation17_spill]] %s6267_s10 }
   0x2   :  { %6287 = sst [smem:[#allocation18_spill]] %s6268_s11 }
   0x3   :  { %6288 = sst [smem:[#allocation19_spill]] %s6269_s12 }
   0x4   :  { %17 = vsyncpa [#allocation3], 0 }
   0x5   :  { %19 = vsyncpa [#allocation3 + $0x1], 0  ;;  %s5382_s21 = smov 0   ;;  %s5384_s22 = smov 0  }
   0x6   :  { %s5386_s23 = smov 0   ;;  %s5388_s24 = smov 0  }
   0x7   :  { %s5390_s25 = smov 0   ;;  %s5392_s26 = smov 0  }
   0x8   :  { %s5394_s27 = smov 0   ;;  %s5396_s28 = smov 0  }
   0x9 LB: > { %6289 = sst [smem:[#allocation5_spill]] %s5280_s21  ;;  %s4218_s29 = sadd.s32 4294967295, %s5308_s28   ;;  %s5308_s28 = sphi %s5396_s28, %s25_s28   ;;  %s5304_s27 = sphi %s5394_s27, %s6320_s27   ;;  %s5300_s26 = sphi %s5392_s26, %s6319_s26   ;;  %s5296_s25 = sphi %s5390_s25, %s6318_s25   ;;  %s5292_s24 = sphi %s5388_s24, %s6317_s24   ;;  %s5288_s23 = sphi %s5386_s23, %s6316_s23   ;;  %s5284_s22 = sphi %s5384_s22, %s6315_s22   ;;  %s5280_s21 = sphi %s5382_s21, %s6314_s21  }
   0xa   : > { %6290 = sst [smem:[#allocation6_spill]] %s5284_s22  ;;  %s4219_s30 = sadd.s32 4294967294, %s5308_s28  }
   0xb   : > { %6291 = sst [smem:[#allocation7_spill]] %s5288_s23  ;;  %s34_s13 = sadd.s32 1, %s5300_s26 }
   0xc   : > { %6292 = sst [smem:[#allocation8_spill]] %s5296_s25  ;;  %p35_p0 = scmp.ge.s32.totalorder %s34_s13, 4 }
   0xd   : > { %6293 = sst [smem:[#allocation9_spill]] %s5300_s26  ;;  %s37_s14 = sadd.s32 1, %s5304_s27 }
   0xe   : > { %6294 = sst [smem:[#allocation10_spill]] %s5304_s27  ;;  %p323_p1 = scmp.ne.s32.totalorder %s5288_s23, %s5284_s22 }
   0xf   : > { %6295 = sst [smem:[#allocation11_spill]] %s5308_s28  ;;  %p324_p2 = scmp.eq.s32.totalorder %s4218_s29, 7 }
  0x10   : > { %s6322_s13 = smov (%p35_p0, %s34_s13), 0  ;;  %s6324_s14 = smov (!%p35_p0, %s37_s14), %s5304_s27 }
  0x11   : > { %6296 = sst [smem:[#allocation12_spill]] %s6322_s13  ;;  %p5431_p3 = por %p324_p2, %p323_p1 }
  0x12   : > { %p329_p4 = scmp.ne.s32.totalorder %s5284_s22, %s5280_s21  ;;  %p39_p5 = scmp.ge.s32.totalorder %s6324_s14, 2 }
  0x13   : > { %s6297_s15 = scalar_select %p5431_p3, 1, 0 }
  0x14   : > { %p330_p6 = scmp.eq.s32.totalorder %s4219_s30, 7  ;;  %p4222_p7 = scmp.ge.s32.totalorder %s5308_s28, 1 }
  0x15   : > { %6298 = sst [smem:[#allocation13_spill]] %s6297_s15  ;;  %p403_p8 = scmp.lt.s32.totalorder %s5308_s28, 9 }
  0x16   : > { %s6326_s14 = smov (%p39_p5, %s6324_s14), 0  ;;  %p5441_p9 = por %p330_p6, %p329_p4 }
  0x17   : > { %6299 = sst [smem:[#allocation14_spill]] %s6326_s14  ;;  %p404_p10 = pnand %p4222_p7, %p403_p8 }
  0x18   : > { %s6300_s16 = scalar_select %p5441_p9, 1, 0 }
  0x19   : > { %s310_s17 = ssub.s32 %s5304_s27, %s6326_s14  ;;  %s313_s18 = sadd.s32 1, %s5288_s23 }
  0x1a   : > { %6301 = sst [smem:[#allocation15_spill]] %s6300_s16  ;;  %p311_p11 = scmp.eq.s32.totalorder %s310_s17, 0 }
  0x1b   : > { %407 = sbr.rel (%p404_p10) target bundleno = 2808 (0xaf8), region = 68  ;;  %s6271_s20 = sand.u32 (!%p404_p10), 1, %s5284_s22  }
  0x1c   : > { %s5449_s19 = scalar_select %p311_p11, %s5288_s23, %s313_s18  }
  0x1d   : > { %p459_p12 = scmp.lt.s32.totalorder (!%p404_p10), %s5296_s25, 1  ;;  %s5455_s29 = sshll.u32 (!%p404_p10), %s6271_s20, 4 }
  0x1e   : > { %6302 = sst [smem:[#allocation16_spill]] %s5449_s19  ;;  %p466_p13 = scmp.lt.s32.totalorder (!%p404_p10), %s5292_s24, 3 }
  0x1f   : > { %s4231_s30 = sshll.u32 (!%p404_p10), %s5292_s24, 4  ;;  %p4246_p0 = scmp.ne.s32.totalorder (!%p404_p10), %s5292_s24, 0 }
  0x20   : > { %v5310_v0 = vmov 0.0   ;;  %vm5311_vm0 = vmmov 0   ;;  %s460_s17 = scalar_select %p459_p12, %s5296_s25, 1  ;;  %v5133_v4 = vld [vmem:[%s6259_s2] sm:$0xff]   ;;  %vm492_vm1 = vcmask 130048   ;;  %v5134_v5 = vld [vmem:[%s6262_s5 + $0x8] sm:$0xff]  }
  0x21   : > { %4618 = vmatprep.subr.bf16.mxu0 %v5310_v0  ;;  %4620 = vmatprep.mubr.msk.bf16.mxu0 %vm5311_vm0, %v5310_v0  ;;  %s467_s18 = scalar_select %p466_p13, %s5292_s24, 3  ;;  %v5135_v11 = vld [vmem:[%s6262_s5] sm:$0xff]   ;;  %v5136_v12 = vld [vmem:[%s6262_s5 + $0x10] sm:$0xff]  }
  0x22   : > { %4624 = vmatprep.subr.bf16.mxu1 %v5310_v0  ;;  %4626 = vmatprep.mubr.msk.bf16.mxu1 %vm5311_vm0, %v5310_v0  ;;  %s4464_s14 = sshll.u32 %s460_s17, 6  ;;  %s4227_s13 = sshll.u32 %s460_s17, 3  ;;  %v4245_v29 = vld [vmem:[%s6263_s6] ss:$0 sm:$0xff] }
  0x23   : > { %s463_s26 = scalar_lea.vmem %s6257_s0, %s4464_s14  ;;  %s4226_s19 = sshll.u32 %s467_s18, 1 }
  0x24   : > { %s470_s23 = sadd.s32 %s4227_s13, %s4226_s19  ;;  %s4465_s16 = sshll.u32 %s460_s17, 4 }
  0x25   : > { %s4228_s21 = sshll.u32 %s470_s23, 2  ;;  %s5473_s15 = scalar_lea.vmem %s6261_s4, %s4465_s16 }
  0x26   : > { %s5478_s25 = scalar_lea.vmem %s6258_s1, %s4228_s21  ;;  %s483_s10 = scalar_lea.vmem %s463_s26, %s4231_s30 }
  0x27   : > { %v484_v1 = vld [vmem:[%s483_s10] sm:$0xff]  ;;  %v485_v2 = vld [vmem:[%s483_s10 + $0x8] sm:$0xff]  ;;  %s5510_s13 = scalar_lea.vmem [#allocation2], %s5455_s29 }
  0x28   : > { %v486_v3 = vpack.c.bf16 %v485_v2, %v484_v1 }
  0x2a   : > { %4619 = vmatpush3.bf16.msra.mxu0 %v486_v3 }
  0x2b   : > { %4630 = vmatprep.subr.bf16.mxu0 %v5310_v0 }
  0x2d   : > { %4621 = vmatmul.mubr.msk.bf16.vlgmr.msra.gmra.mxu0 %vm492_vm1, %v5133_v4 }
  0x2e   : > { %4632 = vmatprep.mubr.msk.bf16.mxu0 %vm5311_vm0, %v5310_v0  ;;  %4631 = vmatpush3.bf16.msra.mxu0 %v5134_v5 }
  0x2f   : > { %4642 = vmatprep.subr.bf16.mxu0 %v5310_v0 }
  0xed   : > { %v530_v6 = vpop.f32.mrf.mxu0 }
  0xef   : > { %v4622_v7 = vpop.f32.mrf.mxu0 }
  0xf1   : > { %v533_v8 = vpop.f32.mrf.mxu0 }
  0xf2   : > { %v537_v9 = vpack.c.bf16 %v533_v8, %v530_v6 }
  0xf3   : > { %v4623_v10 = vpop.f32.mrf.mxu0 }
  0xf4   : > { %4625 = vmatpush3.bf16.msra.mxu1 %v537_v9  ;;  %4633 = vmatmul.mubr.msk.bf16.vlgmr.msra.gmra.mxu0 %vm492_vm1, %v537_v9 }
  0xf5   : > { %4636 = vmatprep.subr.bf16.mxu1 %v5310_v0  ;;  %4644 = vmatprep.mubr.msk.bf16.mxu0 %vm5311_vm0, %v5310_v0 }
  0xf6   : > { %4643 = vmatpush3.bf16.msra.mxu0 %v5136_v12 }
  0xf7   : > { %4627 = vmatmul.mubr.msk.bf16.vlgmr.msra.gmra.mxu1 %vm492_vm1, %v5133_v4 }
  0xf8   : > { %4637 = vmatpush3.bf16.msra.mxu1 %v5135_v11  ;;  %4638 = vmatprep.mubr.msk.bf16.mxu1 %vm5311_vm0, %v5310_v0 }
  0xff   : > { %4639 = vmatmul.mubr.msk.bf16.vlgmr.msra.gmra.mxu1 %vm492_vm1, %v486_v3 }
 0x1b4   : > { %v627_v13 = vpop.f32.mrf.mxu0 }
 0x1b6   : > { %v4634_v14 = vpop.f32.mrf.mxu0 }
 0x1b7   : > { %v572_v15 = vpop.f32.mrf.mxu1 }
 0x1b8   : > { %v630_v16 = vpop.f32.mrf.mxu0 }
 0x1b9   : > { %v4628_v17 = vpop.f32.mrf.mxu1 }
 0x1ba   : > { %v4635_v18 = vpop.f32.mrf.mxu0 }
 0x1bb   : > { %v575_v19 = vpop.f32.mrf.mxu1 }
 0x1bc   : > { %v687_v20 = vpack.c.bf16 %v575_v19, %v572_v15 }
 0x1bd   : > { %v4629_v21 = vpop.f32.mrf.mxu1 }
 0x1be   : > { %4645 = vmatmul.mubr.msk.bf16.vlgmr.msra.gmra.mxu0 %vm492_vm1, %v687_v20 }
 0x1bf   : > { %v677_v22 = vpop.f32.mrf.mxu1 }
 0x1c0   : > { %v678_v23 = vadd.f32 %v677_v22, %v627_v13 }
 0x1c1   : > { %v4640_v24 = vpop.f32.mrf.mxu1 }
 0x1c3   : > { %v680_v25 = vpop.f32.mrf.mxu1 }
 0x1c4   : > { %v681_v26 = vadd.f32 %v680_v25, %v630_v16 }
 0x1c5   : > { %v4641_v27 = vpop.f32.mrf.mxu1 }
 0x27e   : > { %v731_v28 = vpop.f32.mrf.mxu0 }
 0x27f   : > { %v738_v30 = vadd.f32 %v731_v28, %v678_v23 }
 0x280   : > { %v4646_v31 = vpop.f32.mrf.mxu0 }
 0x281   : > { %v747_v32 = vadd.f32 %v4245_v29, %v738_v30  ;;  %752 = sbr.rel (%p4246_p0) target bundleno = 648 (0x288), region = 72 }
 0x282   : > { %v734_v33 = vpop.f32.mrf.mxu0 }
 0x283   : > { %v739_v34 = vadd.f32 %v734_v33, %v681_v26 }
 0x284   : > { %v4647_v35 = vpop.f32.mrf.mxu0 }
 0x285   : > { %v748_v36 = vadd.f32 %v4245_v29, %v739_v34 }
 0x286   : > { %v753_v37 = vld [vmem:[%s5473_s15] sm:$0xff]  ;;  %vm755_vm2 = vcmask 261120   ;;  %v754_v38 = vld [vmem:[%s5473_s15 + $0x8] sm:$0xff] }
 0x287   : > { %756 = vst.msk [vmem:[%s5510_s13] sm:$0xff] %vm755_vm2, %v753_v37  ;;  %757 = vst.msk [vmem:[%s5510_s13 + $0x8] sm:$0xff] %vm755_vm2, %v754_v38 }
 0x288 PF: > { %4648 = vmatprep.subr.bf16.mxu1 %v5310_v0  ;;  %4650 = vmatprep.mubr.msk.bf16.mxu1 %vm5311_vm0, %v5310_v0  ;;  %v5312_v39 = vmov 1065369472   ;;  %v5521_v40 = vld [vmem:[%s5478_s25] sm:$0xff]   ;;  %vm887_vm3 = vcmask 1043456   ;;  %v761_v44 = vld [vmem:[%s6260_s3 + $0x8] sm:$0xff]  ;;  %vm883_vm4 = vcmask 64512   ;;  %v5580_v55 = vpack.c.bf16 %v748_v36, %v747_v32 }
 0x289   : > { %4649 = vmatpush3.bf16.msra.mxu1 %v5312_v39  ;;  %v881_v41 = vld [vmem:[%s6265_s8] sm:$0xf]  ;;  %4654 = vmatprep.subr.bf16.mxu0 %v5310_v0  ;;  %v4255_v45 = vld [vmem:[%s6265_s8 + $0x4] sm:$0xf]  ;;  %v4261_v46 = vld [vmem:[%s6265_s8 + $0x8] sm:$0xf] }
 0x28a   : > { %4660 = vmatprep.subr.bf16.mxu1 %v5310_v0  ;;  %v889_v42 = vsel %vm887_vm3, %v881_v41, 0  ;;  %4655 = vmatpush3.bf16.msra.mxu0 %v5312_v39  ;;  %v760_v43 = vld [vmem:[%s6260_s3] sm:$0xff]  ;;  %v988_v48 = vsel %vm887_vm3, %v4255_v45, 0  ;;  %v1084_v49 = vsel %vm887_vm3, %v4261_v46, 0  ;;  %v5140_v50 = vld [vmem:[%s6266_s9 + $0x8] sm:$0xff]   ;;  %vm1191_vm5 = vcmask 261120  }
 0x28b   : > { %816 = vxpose.xlu0.c.b16.start.end [1/1] (short) (narrow) %v5521_v40, 16  ;;  %4656 = vmatprep.mubr.msk.bf16.mxu0 %vm5311_vm0, %v5310_v0  ;;  %v5550_v47 = vpack.c.bf16 %v761_v44, %v760_v43  ;;  %v5142_v51 = vld [vmem:[%s6266_s9] sm:$0xff]   ;;  %v5313_v56 = vmov 0   ;;  %v5143_v59 = vld [vmem:[%s6264_s7 + $0x8] sm:$0xff]   ;;  %v5144_v60 = vld [vmem:[%s6264_s7 + $0x10] sm:$0xff]   ;;  %s6303_s11 = sld [smem:[#allocation17_spill]] }
 0x28c   : > { %4651 = vmatmul.mubr.msk.bf16.vlgmr.msra.gmra.mxu1 %vm492_vm1, %v5521_v40  ;;  %4666 = vmatprep.subr.bf16.mxu0 %v5310_v0  ;;  %v5141_v57 = vld [vmem:[%s6264_s7] sm:$0xff]   ;;  %v5145_v61 = vld [vmem:[%s6266_s9 + $0x18] sm:$0xff]   ;;  %v5146_v62 = vld [vmem:[%s6266_s9 + $0x10] sm:$0xff]   ;;  %s6304_s23 = sld [smem:[#allocation18_spill]]  ;;  %s4110_s20 = sshll.u32 %s5510_s13, 4  ;;  %s6200_s20 = int_to_ptr.vmem [resolvable:$true] %s4110_s20 }
 0x28d   : > { %4661 = vmatpush3.bf16.msra.mxu1 %v889_v42  ;;  %4662 = vmatprep.mubr.msk.bf16.mxu1 %vm5311_vm0, %v5310_v0  ;;  %v4280_v12 = vld [vmem:[%s6265_s8 + $0xc] sm:$0xf]  ;;  %v5147_v13 = vld [vmem:[%s6264_s7 + $0x18] sm:$0xff]   ;;  %s6306_s24 = sld [smem:[#allocation8_spill]]  ;;  %s5216_s12 = scalar_lea.vmem %s6200_s20, 256 }
 0x28e   : > { %4672 = vmatprep.subr.bf16.mxu1 %v5310_v0  ;;  %v758_v52 = vld [vmem:[%s5510_s13] sm:$0xff]  ;;  %v759_v53 = vld [vmem:[%s5510_s13 + $0x8] sm:$0xff]  ;;  %5138 = vset.pattern.permute.xlu1 %v5313_v56  ;;  %v1448_v15 = vsel %vm887_vm3, %v4280_v12, 0  ;;  %s6307_s15 = sld [smem:[#allocation6_spill]]  ;;  %p5217_p1 = scmp.ne.s32.totalorder %s6200_s20, %s5216_s12 }
 0x28f   : > { %v5577_v54 = vpack.c.bf16 %v759_v53, %v758_v52  ;;  %s6309_s17 = sld [smem:[#allocation19_spill]]  ;;  %s5314_s10 = smov [#allocation2]  }
 0x290   : > { %p5218_p2 = pnand %p5217_p1, %p5431_p3  ;;  %s5220_s21 = sshll.u32 %s5314_s10, 4  ;;  %s5221_s21 = int_to_ptr.vmem [resolvable:$false] %s5220_s21 }
 0x291   : > { %s5222_s22 = scalar_lea.vmem %s5221_s21, 512  ;;  %p5223_p5 = scmp.lt.s32.totalorder %s6200_s20, %s5221_s21 }
 0x292   : > { %s6305_s16 = smov %s6304_s23  ;;  %p5219_p4 = pneg %p5218_p2 }
 0x293   : > { %s4466_s19 = sshll.u32 %s6306_s24, 8  ;;  %p5224_p6 = scmp.lt.s32.totalorder %s5222_s22, %s5216_s12 }
 0x294   : > { %4663 = vmatmul.mubr.msk.bf16.vlgmr.msra.gmra.mxu1 %vm883_vm4, %v5550_v47  ;;  %5137 = vset.pattern.permute.xlu0 %v5313_v56  ;;  %s6310_s27 = sand.u32 1, %s6307_s15  }
 0x295   : > { %4673 = vmatpush3.bf16.msra.mxu1 %v988_v48  ;;  %4674 = vmatprep.mubr.msk.bf16.mxu1 %vm5311_vm0, %v5310_v0  ;;  %s6198_s18 = scalar_lea.hbm %s6309_s17, %s4466_s19  ;;  %s6206_s14 = scalar_lea.sflag [#allocation3], %s6310_s27 }
 0x296   : > { %4684 = vmatprep.subr.bf16.mxu1 %v5310_v0  ;;  %p5225_p7 = por %p5224_p6, %p5223_p5 }
 0x298   : > { %p5226_p8 = pnand %p5225_p7, %p5219_p4 }
 0x29c   : > { %4675 = vmatmul.mubr.msk.bf16.vlgmr.msra.gmra.mxu1 %vm883_vm4, %v5550_v47 }
 0x29d   : > { %4685 = vmatpush3.bf16.msra.mxu1 %v1084_v49  ;;  %4686 = vmatprep.mubr.msk.bf16.mxu1 %vm5311_vm0, %v5310_v0 }
 0x29e   : > { %4696 = vmatprep.subr.bf16.mxu1 %v5310_v0 }
 0x2a4   : > { %4687 = vmatmul.mubr.msk.bf16.vlgmr.msra.gmra.mxu1 %vm883_vm4, %v5550_v47 }
 0x2a5   : > { %4697 = vmatpush3.bf16.msra.mxu1 %v5140_v50  ;;  %4700 = vmatprep.mubr.msk.bf16.mxu1 %vm5311_vm0, %v5310_v0 }
 0x2a6   : > { %4698 = vmatprep.subr.bf16.mxu1 %v5310_v0 }
 0x2a9   : > { %4699 = vmatpush3.bf16.msra.mxu1 %v5142_v51 }
 0x2aa   : > { %4712 = vmatprep.subr.bf16.mxu1 %v5310_v0 }
 0x2ac   : > { %4701 = vmatmul.mubr.msk.bf16.vlgmr.msra.gmra.mxu1 %vm1191_vm5, %v5577_v54 }
 0x2ad   : > { %4713 = vmatpush3.bf16.msra.mxu1 %v5580_v55  ;;  %4714 = vmatprep.mubr.msk.bf16.mxu1 %vm5311_vm0, %v5310_v0 }
 0x2ae   : > { %4724 = vmatprep.subr.bf16.mxu1 %v5310_v0 }
 0x2b4   : > { %4715 = vmatmul.mubr.msk.bf16.vlgmr.msra.gmra.mxu1 %vm492_vm1, %v5521_v40 }
 0x2b5   : > { %4725 = vmatpush3.bf16.msra.mxu1 %v5577_v54  ;;  %4726 = vmatprep.mubr.msk.bf16.mxu1 %vm5311_vm0, %v5310_v0 }
 0x2b6   : > { %4736 = vmatprep.subr.bf16.mxu1 %v5310_v0 }
 0x2bc   : > { %4727 = vmatmul.mubr.msk.bf16.vlgmr.msra.gmra.mxu1 %vm492_vm1, %v5521_v40 }
 0x2bd   : > { %4738 = vmatprep.mubr.msk.bf16.mxu1 %vm5311_vm0, %v5310_v0  ;;  %4737 = vmatpush3.bf16.msra.mxu1 %v5147_v13 }
 0x2be   : > { %4748 = vmatprep.subr.bf16.mxu1 %v5310_v0 }
 0x2ed   : > { %v5601_v58 = vpop.trf.xlu0 }
 0x2ee   : > { %4657 = vmatmul.mubr.msk.bf16.vlgmr.msra.gmra.mxu0 %vm492_vm1, %v5601_v58 }
 0x2ef   : > { %4667 = vmatpush3.bf16.msra.mxu0 %v5141_v57  ;;  %4668 = vmatprep.mubr.msk.bf16.mxu0 %vm5311_vm0, %v5310_v0 }
 0x2f0   : > { %4678 = vmatprep.subr.bf16.mxu0 %v5310_v0 }
 0x2f6   : > { %4669 = vmatmul.mubr.msk.bf16.vlgmr.msra.gmra.mxu0 %vm492_vm1, %v5580_v55 }
 0x2f7   : > { %4679 = vmatpush3.bf16.msra.mxu0 %v5143_v59  ;;  %4680 = vmatprep.mubr.msk.bf16.mxu0 %vm5311_vm0, %v5310_v0 }
 0x2f8   : > { %4690 = vmatprep.subr.bf16.mxu0 %v5310_v0 }
 0x2fe   : > { %4681 = vmatmul.mubr.msk.bf16.vlgmr.msra.gmra.mxu0 %vm492_vm1, %v5580_v55 }
 0x2ff   : > { %4691 = vmatpush3.bf16.msra.mxu0 %v5144_v60  ;;  %4692 = vmatprep.mubr.msk.bf16.mxu0 %vm5311_vm0, %v5310_v0 }
 0x300   : > { %4704 = vmatprep.subr.bf16.mxu0 %v5310_v0 }
 0x306   : > { %4693 = vmatmul.mubr.msk.bf16.vlgmr.msra.gmra.mxu0 %vm492_vm1, %v5580_v55 }
 0x307   : > { %4705 = vmatpush3.bf16.msra.mxu0 %v5145_v61  ;;  %4708 = vmatprep.mubr.msk.bf16.mxu0 %vm5311_vm0, %v5310_v0 }
 0x308   : > { %4706 = vmatprep.subr.bf16.mxu0 %v5310_v0 }
 0x30b   : > { %4707 = vmatpush3.bf16.msra.mxu0 %v5146_v62 }
 0x30c   : > { %4718 = vmatprep.subr.bf16.mxu0 %v5310_v0 }
 0x30e   : > { %4709 = vmatmul.mubr.msk.bf16.vlgmr.msra.gmra.mxu0 %vm1191_vm5, %v5577_v54 }
 0x30f   : > { %4719 = vmatpush3.bf16.msra.mxu0 %v5550_v47  ;;  %4720 = vmatprep.mubr.msk.bf16.mxu0 %vm5311_vm0, %v5310_v0 }
 0x310   : > { %4730 = vmatprep.subr.bf16.mxu0 %v5310_v0 }
 0x316   : > { %4721 = vmatmul.mubr.msk.bf16.vlgmr.msra.gmra.mxu0 %vm492_vm1, %v5521_v40 }
 0x317   : > { %4732 = vmatprep.mubr.msk.bf16.mxu0 %vm5311_vm0, %v5310_v0  ;;  %4731 = vmatpush3.bf16.msra.mxu0 %v1448_v15 }
 0x318   : > { %4742 = vmatprep.subr.bf16.mxu0 %v5310_v0 }
 0x34c   : > { %v806_v63 = vpop.f32.mrf.mxu1 }
 0x34d   : > { %v807_v1 = vadd.f32 1e-06, %v806_v63 }
 0x34e   : > { %v4652_v2 = vpop.f32.mrf.mxu1 }
 0x34f   : > { %5185 = vrcp.f32 %v807_v1 }
 0x350   : > { %v809_v3 = vpop.f32.mrf.mxu1 }
 0x351   : > { %v810_v4 = vadd.f32 1e-06, %v809_v3 }
 0x352   : > { %v4653_v5 = vpop.f32.mrf.mxu1 }
 0x353   : > { %5187 = vrcp.f32 %v810_v4 }
 0x354   : > { %v5646_v6 = vpop.f32.mrf.mxu1 }
 0x356   : > { %v4664_v7 = vpop.f32.mrf.mxu1 }
 0x358   : > { %v5648_v8 = vpop.f32.mrf.mxu1 }
 0x35a   : > { %v4665_v9 = vpop.f32.mrf.mxu1 }
 0x35c   : > { %v5186_v10 = vpop.eup %5185  ;;  %v1024_v11 = vpop.f32.mrf.mxu1 }
 0x35d   : > { %1341 = vperm.xlu0 %5137, %v5186_v10  }
 0x35e   : > { %v4676_v14 = vpop.f32.mrf.mxu1 }
 0x360   : > { %v5188_v16 = vpop.eup %5187  ;;  %v1027_v17 = vpop.f32.mrf.mxu1 }
 0x361   : > { %1346 = vperm.xlu1 %5138, %v5188_v16  }
 0x362   : > { %v4677_v18 = vpop.f32.mrf.mxu1 }
 0x363   : > { %v5148_v18 = vld [vmem:[%s6264_s7 + $0x20] sm:$0xff]  }
 0x364   : > { %v5659_v19 = vpop.f32.mrf.mxu1 }
 0x366   : > { %v4688_v20 = vpop.f32.mrf.mxu1 }
 0x368   : > { %v5661_v21 = vpop.f32.mrf.mxu1 }
 0x36a   : > { %v4689_v22 = vpop.f32.mrf.mxu1 }
 0x36c   : > { %v5663_v23 = vpop.f32.mrf.mxu1 }
 0x36e   : > { %v4702_v24 = vpop.f32.mrf.mxu1 }
 0x370   : > { %v5665_v25 = vpop.f32.mrf.mxu1 }
 0x372   : > { %v4703_v26 = vpop.f32.mrf.mxu1 }
 0x373   : > { %v4292_v26 = vld [vmem:[%s6265_s8 + $0x14] sm:$0xf] }
 0x374   : > { %v1332_v27 = vpop.f32.mrf.mxu1 }
 0x376   : > { %v4716_v28 = vpop.f32.mrf.mxu1 }
 0x377   : > { %v1643_v28 = vsel %vm887_vm3, %v4292_v26, 0 }
 0x378   : > { %v1335_v29 = vpop.f32.mrf.mxu1 }
 0x37a   : > { %v4717_v30 = vpop.f32.mrf.mxu1 }
 0x37b   : > { %v5151_v30 = vld [vmem:[%s6266_s9 + $0x38] sm:$0xff]  }
 0x37c   : > { %v5667_v31 = vpop.f32.mrf.mxu1 }
 0x37e   : > { %v4728_v32 = vpop.f32.mrf.mxu1 }
 0x37f   : > { %v5152_v32 = vld [vmem:[%s6266_s9 + $0x20] sm:$0xff]  }
 0x380   : > { %v5669_v33 = vpop.f32.mrf.mxu1 }
 0x382   : > { %v4729_v34 = vpop.f32.mrf.mxu1 }
 0x383   : > { %v5153_v34 = vld [vmem:[%s6266_s9 + $0x30] sm:$0xff]  }
 0x3ae   : > { %v869_v35 = vpop.f32.mrf.mxu0 }
 0x3af   : > { %v870_v36 = vadd.f32 1e-06, %v869_v35 }
 0x3b0   : > { %v4658_v37 = vpop.f32.mrf.mxu0 }
 0x3b1   : > { %5189 = vrcp.f32 %v870_v36 }
 0x3b2   : > { %v872_v38 = vpop.f32.mrf.mxu0 }
 0x3b3   : > { %v873_v39 = vadd.f32 1e-06, %v872_v38 }
 0x3b4   : > { %v4659_v41 = vpop.f32.mrf.mxu0 }
 0x3b5   : > { %5191 = vrcp.f32 %v873_v39 }
 0x3b6   : > { %v5671_v42 = vpop.f32.mrf.mxu0 }
 0x3b8   : > { %v4670_v43 = vpop.f32.mrf.mxu0 }
 0x3ba   : > { %v5673_v44 = vpop.f32.mrf.mxu0 }
 0x3bc   : > { %v4671_v45 = vpop.f32.mrf.mxu0 }
 0x3be   : > { %v5190_v46 = vpop.eup %5189  ;;  %v1071_v48 = vpop.f32.mrf.mxu0 }
 0x3bf   : > { %2461 = vperm.xlu1 %5138, %v5190_v46   ;;  %v1072_v60 = vadd.f32 %v1071_v48, %v1024_v11  ;;  %v4286_v11 = vld [vmem:[%s6265_s8 + $0x10] sm:$0xf] }
 0x3c0   : > { %v4682_v49 = vpop.f32.mrf.mxu0  ;;  %v1547_v24 = vsel %vm887_vm3, %v4286_v11, 0 }
 0x3c2   : > { %v5192_v50 = vpop.eup %5191  ;;  %v1074_v51 = vpop.f32.mrf.mxu0 }
 0x3c3   : > { %2466 = vperm.xlu1 %5138, %v5192_v50   ;;  %v1075_v1 = vadd.f32 %v1074_v51, %v1027_v17 }
 0x3c4   : > { %v4683_v52 = vpop.f32.mrf.mxu0 }
 0x3c6   : > { %v5675_v53 = vpop.f32.mrf.mxu0 }
 0x3c8   : > { %v4694_v56 = vpop.f32.mrf.mxu0 }
 0x3ca   : > { %v5677_v57 = vpop.f32.mrf.mxu0 }
 0x3cc   : > { %v4695_v59 = vpop.f32.mrf.mxu0 }
 0x3ce   : > { %v1287_v61 = vpop.f32.mrf.mxu0 }
 0x3cf   : > { %v5679_v62 = vadd.f32 %v1287_v61, %v1072_v60 }
 0x3d0   : > { %v4710_v63 = vpop.f32.mrf.mxu0 }
 0x3d2   : > { %v1290_v2 = vpop.f32.mrf.mxu0 }
 0x3d3   : > { %v5681_v3 = vadd.f32 %v1290_v2, %v1075_v1 }
 0x3d4   : > { %v4711_v4 = vpop.f32.mrf.mxu0 }
 0x3d6   : > { %v1385_v5 = vpop.f32.mrf.mxu0 }
 0x3d8   : > { %v4722_v7 = vpop.f32.mrf.mxu0  ;;  %v5683_v9 = vpop.permute.xlu0 %1341 }
 0x3d9   : > { %v1392_v14 = vmul.f32 %v1385_v5, %v5683_v9  ;;  %v1349_v16 = vmul.f32 %v5683_v9, %v1332_v27  ;;  %v5149_v27 = vld [vmem:[%s6264_s7 + $0x28] sm:$0xff]   ;;  %v1435_v36 = vmul.f32 %v5667_v31, %v5683_v9  ;;  %v4315_v31 = vld [vmem:[%s6265_s8 + $0x18] sm:$0xf] }
 0x3da   : > { %v1388_v10 = vpop.f32.mrf.mxu0  ;;  %v2003_v38 = vsel %vm887_vm3, %v4315_v31, 0 }
 0x3dc   : > { %v5685_v12 = vpop.permute.xlu1 %1346  ;;  %v4723_v13 = vpop.f32.mrf.mxu0 }
 0x3dd   : > { %v1393_v15 = vmul.f32 %v1388_v10, %v5685_v12  ;;  %v1350_v17 = vmul.f32 %v5685_v12, %v1335_v29  ;;  %v5150_v29 = vld [vmem:[%s6266_s9 + $0x28] sm:$0xff]   ;;  %v1436_v35 = vmul.f32 %v5669_v33, %v5685_v12  ;;  %v5154_v33 = vld [vmem:[%s6264_s7 + $0x30] sm:$0xff]   ;;  %v1168_v13 = vadd.f32 %v5675_v53, %v5659_v19 }
 0x3df   : > { %v1443_v20 = vpack.c.bf16 %v1393_v15, %v1392_v14  ;;  %v1440_v22 = vpack.c.bf16 %v1350_v17, %v1349_v16  ;;  %v1738_v37 = vpack.c.bf16 %v1436_v35, %v1435_v36 }
 0x3e1   : > { %4733 = vmatmul.mubr.msk.bf16.vlgmr.msra.gmra.mxu0 %vm883_vm4, %v1443_v20  ;;  %4739 = vmatmul.mubr.msk.bf16.vlgmr.msra.gmra.mxu1 %vm492_vm1, %v1440_v22 }
 0x3e2   : > { %4743 = vmatpush3.bf16.msra.mxu0 %v1547_v24  ;;  %4749 = vmatpush3.bf16.msra.mxu1 %v5148_v18 }
 0x3e3   : > { %4744 = vmatprep.mubr.msk.bf16.mxu0 %vm5311_vm0, %v5310_v0  ;;  %4750 = vmatprep.mubr.msk.bf16.mxu1 %vm5311_vm0, %v5310_v0 }
 0x3e4   : > { %4754 = vmatprep.subr.bf16.mxu0 %v5310_v0  ;;  %4760 = vmatprep.subr.bf16.mxu1 %v5310_v0 }
 0x3e9   : > { %4745 = vmatmul.mubr.msk.bf16.vlgmr.msra.gmra.mxu0 %vm883_vm4, %v1443_v20  ;;  %4751 = vmatmul.mubr.msk.bf16.vlgmr.msra.gmra.mxu1 %vm492_vm1, %v1440_v22 }
 0x3ea   : > { %4755 = vmatpush3.bf16.msra.mxu0 %v1643_v28  ;;  %4761 = vmatpush3.bf16.msra.mxu1 %v5149_v27 }
 0x3eb   : > { %4756 = vmatprep.mubr.msk.bf16.mxu0 %vm5311_vm0, %v5310_v0  ;;  %4762 = vmatprep.mubr.msk.bf16.mxu1 %vm5311_vm0, %v5310_v0 }
 0x3ec   : > { %4766 = vmatprep.subr.bf16.mxu0 %v5310_v0  ;;  %4774 = vmatprep.subr.bf16.mxu1 %v5310_v0 }
 0x3f1   : > { %4757 = vmatmul.mubr.msk.bf16.vlgmr.msra.gmra.mxu0 %vm883_vm4, %v1443_v20  ;;  %4763 = vmatmul.mubr.msk.bf16.vlgmr.msra.gmra.mxu1 %vm492_vm1, %v1440_v22 }
 0x3f2   : > { %4767 = vmatpush3.bf16.msra.mxu0 %v5150_v29  ;;  %4775 = vmatpush3.bf16.msra.mxu1 %v5151_v30  ;;  %v979_v30 = vadd.f32 %v5673_v44, %v5648_v8 }
 0x3f3   : > { %4768 = vmatprep.subr.bf16.mxu0 %v5310_v0  ;;  %4776 = vmatprep.subr.bf16.mxu1 %v5310_v0 }
 0x3f4   : > { %4770 = vmatprep.mubr.msk.bf16.mxu0 %vm5311_vm0, %v5310_v0  ;;  %4778 = vmatprep.mubr.msk.bf16.mxu1 %vm5311_vm0, %v5310_v0 }
 0x3f6   : > { %4769 = vmatpush3.bf16.msra.mxu0 %v5152_v32  ;;  %4777 = vmatpush3.bf16.msra.mxu1 %v5153_v34 }
 0x3f7   : > { %4782 = vmatprep.subr.bf16.mxu0 %v5310_v0  ;;  %4788 = vmatprep.subr.bf16.mxu1 %v5310_v0 }
 0x3f9   : > { %4771 = vmatmul.mubr.msk.bf16.vlgmr.msra.gmra.mxu0 %vm1191_vm5, %v1738_v37  ;;  %4779 = vmatmul.mubr.msk.bf16.vlgmr.msra.gmra.mxu1 %vm1191_vm5, %v1738_v37 }
 0x3fa   : > { %4783 = vmatpush3.bf16.msra.mxu0 %v1440_v22  ;;  %4789 = vmatpush3.bf16.msra.mxu1 %v1443_v20  ;;  %v976_v20 = vadd.f32 %v5671_v42, %v5646_v6  ;;  %v1171_v22 = vadd.f32 %v5677_v57, %v5661_v21 }
 0x3fb   : > { %4784 = vmatprep.mubr.msk.bf16.mxu0 %vm5311_vm0, %v5310_v0  ;;  %4790 = vmatprep.mubr.msk.bf16.mxu1 %vm5311_vm0, %v5310_v0 }
 0x3fc   : > { %4794 = vmatprep.subr.bf16.mxu0 %v5310_v0  ;;  %4800 = vmatprep.subr.bf16.mxu1 %v5310_v0  ;;  %v1294_v53 = vadd.f32 %v5663_v23, %v976_v20 }
 0x401   : > { %4785 = vmatmul.mubr.msk.bf16.vlgmr.msra.gmra.mxu0 %vm492_vm1, %v5521_v40  ;;  %4791 = vmatmul.mubr.msk.bf16.vlgmr.msra.gmra.mxu1 %vm492_vm1, %v5521_v40 }
 0x402   : > { %4795 = vmatpush3.bf16.msra.mxu0 %v1738_v37  ;;  %4796 = vmatprep.mubr.msk.bf16.mxu0 %vm5311_vm0, %v5310_v0  ;;  %v1295_v37 = vadd.f32 %v5665_v25, %v979_v30 }
 0x403   : > { %4806 = vmatprep.subr.bf16.mxu0 %v5310_v0  ;;  %4802 = vmatprep.mubr.msk.bf16.mxu1 %vm5311_vm0, %v5310_v0 }
 0x404   : > { %4801 = vmatpush3.bf16.msra.mxu1 %v2003_v38 }
 0x405   : > { %4812 = vmatprep.subr.bf16.mxu1 %v5310_v0 }
 0x409   : > { %4797 = vmatmul.mubr.msk.bf16.vlgmr.msra.gmra.mxu0 %vm492_vm1, %v5521_v40 }
 0x40a   : > { %4808 = vmatprep.mubr.msk.bf16.mxu0 %vm5311_vm0, %v5310_v0  ;;  %4807 = vmatpush3.bf16.msra.mxu0 %v5154_v33 }
 0x40b   : > { %4818 = vmatprep.subr.bf16.mxu0 %v5310_v0 }
 0x4a1   : > { %v1484_v40 = vpop.f32.mrf.mxu0  ;;  %v1534_v39 = vpop.f32.mrf.mxu1 }
 0x4a2   : > { %v1535_v41 = vadd.f32 %v1534_v39, %v1484_v40 }
 0x4a3   : > { %v4734_v43 = vpop.f32.mrf.mxu0  ;;  %v4740_v45 = vpop.f32.mrf.mxu1 }
 0x4a5   : > { %v1487_v46 = vpop.f32.mrf.mxu0  ;;  %v1537_v48 = vpop.f32.mrf.mxu1 }
 0x4a6   : > { %v1538_v49 = vadd.f32 %v1537_v48, %v1487_v46  ;;  %v4321_v46 = vld [vmem:[%s6265_s8 + $0x1c] sm:$0xf] }
 0x4a7   : > { %v4735_v50 = vpop.f32.mrf.mxu0  ;;  %v4741_v51 = vpop.f32.mrf.mxu1 }
 0x4a9   : > { %v1583_v52 = vpop.f32.mrf.mxu0  ;;  %v1630_v56 = vpop.f32.mrf.mxu1 }
 0x4aa   : > { %v1631_v59 = vadd.f32 %v1630_v56, %v1583_v52  ;;  %v5155_v52 = vld [vmem:[%s6264_s7 + $0x38] sm:$0xff]  }
 0x4ab   : > { %v4746_v60 = vpop.f32.mrf.mxu0  ;;  %v4752_v61 = vpop.f32.mrf.mxu1 }
 0x4ac   : > { %v2102_v60 = vsel %vm887_vm3, %v4321_v46, 0 }
 0x4ad   : > { %v1586_v63 = vpop.f32.mrf.mxu0  ;;  %v1633_v1 = vpop.f32.mrf.mxu1 }
 0x4ae   : > { %v1634_v2 = vadd.f32 %v1633_v1, %v1586_v63 }
 0x4af   : > { %v4747_v4 = vpop.f32.mrf.mxu0  ;;  %v4753_v5 = vpop.f32.mrf.mxu1 }
 0x4b0   : > { %v5156_v4 = vld [vmem:[%s6264_s7 + $0x40] sm:$0xff]  }
 0x4b1   : > { %v1679_v7 = vpop.f32.mrf.mxu0  ;;  %v1726_v10 = vpop.f32.mrf.mxu1 }
 0x4b2   : > { %v1727_v11 = vadd.f32 %v1726_v10, %v1679_v7  ;;  %v5157_v10 = vld [vmem:[%s6266_s9 + $0x48] sm:$0xff]  }
 0x4b3   : > { %v4758_v14 = vpop.f32.mrf.mxu0  ;;  %v4764_v15 = vpop.f32.mrf.mxu1 }
 0x4b4   : > { %v5779_v16 = vadd.f32 %v1727_v11, %v1168_v13  ;;  %v5158_v13 = vld [vmem:[%s6266_s9 + $0x58] sm:$0xff]   ;;  %v5159_v11 = vld [vmem:[%s6266_s9 + $0x40] sm:$0xff]   ;;  %v5160_v14 = vld [vmem:[%s6266_s9 + $0x50] sm:$0xff]  }
 0x4b5   : > { %v1682_v17 = vpop.f32.mrf.mxu0  ;;  %v1729_v18 = vpop.f32.mrf.mxu1 }
 0x4b6   : > { %v1730_v24 = vadd.f32 %v1729_v18, %v1682_v17 }
 0x4b7   : > { %v4759_v26 = vpop.f32.mrf.mxu0  ;;  %v4765_v27 = vpop.f32.mrf.mxu1 }
 0x4b8   : > { %v5785_v28 = vadd.f32 %v1730_v24, %v1171_v22 }
 0x4b9   : > { %v1788_v29 = vpop.f32.mrf.mxu0  ;;  %v1846_v19 = vpop.f32.mrf.mxu1 }
 0x4ba   : > { %v1853_v32 = vadd.f32 %v1788_v29, %v1535_v41  ;;  %v1857_v34 = vadd.f32 %v1846_v19, %v1631_v59 }
 0x4bb   : > { %v4772_v35 = vpop.f32.mrf.mxu0  ;;  %v4780_v36 = vpop.f32.mrf.mxu1 }
 0x4bc   : > { %v5790_v6 = vadd.f32 %v1853_v32, %v1294_v53  ;;  %v5793_v21 = vadd.f32 %v1857_v34, %v5679_v62 }
 0x4bd   : > { %v1791_v42 = vpop.f32.mrf.mxu0  ;;  %v1849_v57 = vpop.f32.mrf.mxu1 }
 0x4be   : > { %v1854_v31 = vadd.f32 %v1791_v42, %v1538_v49  ;;  %v1858_v33 = vadd.f32 %v1849_v57, %v1634_v2  ;;  %v4327_v2 = vld [vmem:[%s6265_s8 + $0x20] sm:$0xf] }
 0x4bf   : > { %v4773_v38 = vpop.f32.mrf.mxu0  ;;  %v4781_v23 = vpop.f32.mrf.mxu1  ;;  %v2198_v7 = vsel %vm887_vm3, %v4327_v2, 0 }
 0x4c0   : > { %v5796_v40 = vadd.f32 %v1854_v31, %v1295_v37  ;;  %v5799_v8 = vadd.f32 %v1858_v33, %v5681_v3 }
 0x4c1   : > { %v1897_v44 = vpop.f32.mrf.mxu0  ;;  %v1940_v39 = vpop.f32.mrf.mxu1 }
 0x4c2   : > { %v1904_v25 = vmul.f32 %v1897_v44, %v5683_v9  ;;  %v1947_v48 = vmul.f32 %v1940_v39, %v5683_v9 }
 0x4c3   : > { %v4786_v41 = vpop.f32.mrf.mxu0  ;;  %v4792_v43 = vpop.f32.mrf.mxu1 }
 0x4c5   : > { %v1900_v45 = vpop.f32.mrf.mxu0  ;;  %v1943_v62 = vpop.f32.mrf.mxu1 }
 0x4c6   : > { %v1905_v49 = vmul.f32 %v1900_v45, %v5685_v12  ;;  %v1948_v50 = vmul.f32 %v1943_v62, %v5685_v12 }
 0x4c7   : > { %v4787_v3 = vpop.f32.mrf.mxu0  ;;  %v4793_v51 = vpop.f32.mrf.mxu1 }
 0x4c8   : > { %v1995_v56 = vpack.c.bf16 %v1905_v49, %v1904_v25  ;;  %v1998_v59 = vpack.c.bf16 %v1948_v50, %v1947_v48 }
 0x4c9   : > { %v1983_v61 = vpop.f32.mrf.mxu0 }
 0x4ca   : > { %4803 = vmatmul.mubr.msk.bf16.vlgmr.msra.gmra.mxu1 %vm883_vm4, %v1998_v59  ;;  %4809 = vmatmul.mubr.msk.bf16.vlgmr.msra.gmra.mxu0 %vm492_vm1, %v1995_v56  ;;  %v1990_v17 = vmul.f32 %v1983_v61, %v5683_v9 }
 0x4cb   : > { %v4798_v63 = vpop.f32.mrf.mxu0  ;;  %4813 = vmatpush3.bf16.msra.mxu1 %v2102_v60  ;;  %4819 = vmatpush3.bf16.msra.mxu0 %v5155_v52 }
 0x4cc   : > { %4814 = vmatprep.mubr.msk.bf16.mxu1 %vm5311_vm0, %v5310_v0  ;;  %4820 = vmatprep.mubr.msk.bf16.mxu0 %vm5311_vm0, %v5310_v0 }
 0x4cd   : > { %v1986_v1 = vpop.f32.mrf.mxu0  ;;  %4824 = vmatprep.subr.bf16.mxu1 %v5310_v0  ;;  %4830 = vmatprep.subr.bf16.mxu0 %v5310_v0 }
 0x4ce   : > { %v1991_v15 = vmul.f32 %v1986_v1, %v5685_v12 }
 0x4cf   : > { %v4799_v5 = vpop.f32.mrf.mxu0 }
 0x4d0   : > { %v2293_v18 = vpack.c.bf16 %v1991_v15, %v1990_v17 }
 0x4d2   : > { %4815 = vmatmul.mubr.msk.bf16.vlgmr.msra.gmra.mxu1 %vm883_vm4, %v1998_v59  ;;  %4821 = vmatmul.mubr.msk.bf16.vlgmr.msra.gmra.mxu0 %vm492_vm1, %v1995_v56 }
 0x4d3   : > { %4825 = vmatpush3.bf16.msra.mxu1 %v2198_v7  ;;  %4831 = vmatpush3.bf16.msra.mxu0 %v5156_v4  ;;  %v5904_v4 = vpop.permute.xlu1 %2461 }
 0x4d4   : > { %4826 = vmatprep.mubr.msk.bf16.mxu1 %vm5311_vm0, %v5310_v0  ;;  %4832 = vmatprep.mubr.msk.bf16.mxu0 %vm5311_vm0, %v5310_v0 }
 0x4d5   : > { %4836 = vmatprep.subr.bf16.mxu1 %v5310_v0  ;;  %4844 = vmatprep.subr.bf16.mxu0 %v5310_v0 }
 0x4da   : > { %4827 = vmatmul.mubr.msk.bf16.vlgmr.msra.gmra.mxu1 %vm883_vm4, %v1998_v59  ;;  %4833 = vmatmul.mubr.msk.bf16.vlgmr.msra.gmra.mxu0 %vm492_vm1, %v1995_v56 }
 0x4db   : > { %4837 = vmatpush3.bf16.msra.mxu1 %v5157_v10  ;;  %4845 = vmatpush3.bf16.msra.mxu0 %v5158_v13 }
 0x4dc   : > { %4838 = vmatprep.subr.bf16.mxu1 %v5310_v0  ;;  %4846 = vmatprep.subr.bf16.mxu0 %v5310_v0 }
 0x4dd   : > { %4840 = vmatprep.mubr.msk.bf16.mxu1 %vm5311_vm0, %v5310_v0  ;;  %4848 = vmatprep.mubr.msk.bf16.mxu0 %vm5311_vm0, %v5310_v0 }
 0x4df   : > { %4839 = vmatpush3.bf16.msra.mxu1 %v5159_v11  ;;  %4847 = vmatpush3.bf16.msra.mxu0 %v5160_v14 }
 0x4e0   : > { %4852 = vmatprep.subr.bf16.mxu1 %v5310_v0  ;;  %4858 = vmatprep.subr.bf16.mxu0 %v5310_v0 }
 0x4e2   : > { %4841 = vmatmul.mubr.msk.bf16.vlgmr.msra.gmra.mxu1 %vm1191_vm5, %v2293_v18  ;;  %4849 = vmatmul.mubr.msk.bf16.vlgmr.msra.gmra.mxu0 %vm1191_vm5, %v2293_v18 }
 0x4e3   : > { %4853 = vmatpush3.bf16.msra.mxu1 %v5580_v55  ;;  %4859 = vmatpush3.bf16.msra.mxu0 %v5550_v47  ;;  %v4350_v47 = vld [vmem:[%s6265_s8 + $0x24] sm:$0xf] }
 0x4e4   : > { %4854 = vmatprep.mubr.msk.bf16.mxu1 %vm5311_vm0, %v5310_v0  ;;  %4860 = vmatprep.mubr.msk.bf16.mxu0 %vm5311_vm0, %v5310_v0  ;;  %v2568_v55 = vsel %vm887_vm3, %v4350_v47, 0 }
 0x4e5   : > { %4864 = vmatprep.subr.bf16.mxu1 %v5310_v0  ;;  %4870 = vmatprep.subr.bf16.mxu0 %v5310_v0 }
 0x4ea   : > { %4855 = vmatmul.mubr.msk.bf16.vlgmr.msra.gmra.mxu1 %vm492_vm1, %v5601_v58  ;;  %4861 = vmatmul.mubr.msk.bf16.vlgmr.msra.gmra.mxu0 %vm492_vm1, %v5601_v58 }
 0x4eb   : > { %4865 = vmatpush3.bf16.msra.mxu1 %v5577_v54  ;;  %4866 = vmatprep.mubr.msk.bf16.mxu1 %vm5311_vm0, %v5310_v0  ;;  %v5161_v54 = vld [vmem:[%s6264_s7 + $0x48] sm:$0xff]  }
 0x4ec   : > { %4876 = vmatprep.subr.bf16.mxu1 %v5310_v0  ;;  %4872 = vmatprep.mubr.msk.bf16.mxu0 %vm5311_vm0, %v5310_v0 }
 0x4ed   : > { %4871 = vmatpush3.bf16.msra.mxu0 %v2568_v55 }
 0x4ee   : > { %4882 = vmatprep.subr.bf16.mxu0 %v5310_v0 }
 0x4f2   : > { %4867 = vmatmul.mubr.msk.bf16.vlgmr.msra.gmra.mxu1 %vm492_vm1, %v5601_v58 }
 0x4f3   : > { %4878 = vmatprep.mubr.msk.bf16.mxu1 %vm5311_vm0, %v5310_v0  ;;  %4877 = vmatpush3.bf16.msra.mxu1 %v5161_v54  ;;  %v4356_v54 = vld [vmem:[%s6265_s8 + $0x28] sm:$0xf] }
 0x4f4   : > { %4888 = vmatprep.subr.bf16.mxu1 %v5310_v0 }
 0x58a   : > { %v2039_v20 = vpop.f32.mrf.mxu1  ;;  %v2089_v22 = vpop.f32.mrf.mxu0 }
 0x58b   : > { %v2090_v24 = vadd.f32 %v2089_v22, %v2039_v20 }
 0x58c   : > { %v4804_v26 = vpop.f32.mrf.mxu1  ;;  %v4810_v27 = vpop.f32.mrf.mxu0 }
 0x58d   : > { %v5162_v26 = vld [vmem:[%s6264_s7 + $0x50] sm:$0xff]  }
 0x58e   : > { %v2042_v29 = vpop.f32.mrf.mxu1  ;;  %v2092_v19 = vpop.f32.mrf.mxu0 }
 0x58f   : > { %v2093_v53 = vadd.f32 %v2092_v19, %v2042_v29  ;;  %v2667_v19 = vsel %vm887_vm3, %v4356_v54, 0 }
 0x590   : > { %v4805_v30 = vpop.f32.mrf.mxu1  ;;  %v4811_v32 = vpop.f32.mrf.mxu0 }
 0x592   : > { %v2138_v34 = vpop.f32.mrf.mxu1  ;;  %v2185_v35 = vpop.f32.mrf.mxu0 }
 0x593   : > { %v2186_v36 = vadd.f32 %v2185_v35, %v2138_v34  ;;  %v4362_v34 = vld [vmem:[%s6265_s8 + $0x2c] sm:$0xf] }
 0x594   : > { %v4816_v42 = vpop.f32.mrf.mxu1  ;;  %v4822_v57 = vpop.f32.mrf.mxu0 }
 0x595   : > { %v2763_v42 = vsel %vm887_vm3, %v4362_v34, 0  ;;  %v5164_v57 = vld [vmem:[%s6266_s9 + $0x68] sm:$0xff]  }
 0x596   : > { %v2141_v37 = vpop.f32.mrf.mxu1  ;;  %v2188_v31 = vpop.f32.mrf.mxu0 }
 0x597   : > { %v2189_v33 = vadd.f32 %v2188_v31, %v2141_v37  ;;  %v5165_v37 = vld [vmem:[%s6266_s9 + $0x78] sm:$0xff]   ;;  %v5166_v31 = vld [vmem:[%s6266_s9 + $0x60] sm:$0xff]  }
 0x598   : > { %v4817_v38 = vpop.f32.mrf.mxu1  ;;  %v4823_v23 = vpop.f32.mrf.mxu0 }
 0x59a   : > { %v2234_v44 = vpop.f32.mrf.mxu1  ;;  %v2281_v39 = vpop.f32.mrf.mxu0 }
 0x59b   : > { %v2282_v41 = vadd.f32 %v2281_v39, %v2234_v44  ;;  %v4385_v39 = vld [vmem:[%s6265_s8 + $0x30] sm:$0xf] }
 0x59c   : > { %v4828_v43 = vpop.f32.mrf.mxu1  ;;  %v4834_v45 = vpop.f32.mrf.mxu0 }
 0x59d   : > { %v5893_v62 = vadd.f32 %v2282_v41, %v5779_v16  ;;  %v5168_v41 = vld [vmem:[%s6264_s7 + $0x60] sm:$0xff]   ;;  %v3123_v43 = vsel %vm887_vm3, %v4385_v39, 0 }
 0x59e   : > { %v2237_v46 = vpop.f32.mrf.mxu1  ;;  %v2284_v25 = vpop.f32.mrf.mxu0 }
 0x59f   : > { %v2285_v48 = vadd.f32 %v2284_v25, %v2237_v46 }
 0x5a0   : > { %v4829_v49 = vpop.f32.mrf.mxu1  ;;  %v4835_v50 = vpop.f32.mrf.mxu0 }
 0x5a1   : > { %v5896_v3 = vadd.f32 %v2285_v48, %v5785_v28 }
 0x5a2   : > { %v2343_v51 = vpop.f32.mrf.mxu1  ;;  %v2401_v52 = vpop.f32.mrf.mxu0 }
 0x5a3   : > { %v2408_v56 = vadd.f32 %v2343_v51, %v2090_v24  ;;  %v2412_v59 = vadd.f32 %v2401_v52, %v2186_v36  ;;  %v5163_v36 = vld [vmem:[%s6264_s7 + $0x58] sm:$0xff]  }
 0x5a4   : > { %v4842_v60 = vpop.f32.mrf.mxu1  ;;  %v4850_v61 = vpop.f32.mrf.mxu0 }
 0x5a5   : > { %v5899_v63 = vadd.f32 %v2408_v56, %v5790_v6  ;;  %v5902_v16 = vadd.f32 %v2412_v59, %v5793_v21  ;;  %v5912_v21 = vpop.permute.xlu1 %2466 }
 0x5a6   : > { %v2346_v1 = vpop.f32.mrf.mxu1  ;;  %v2404_v2 = vpop.f32.mrf.mxu0 }
 0x5a7   : > { %v2409_v5 = vadd.f32 %v2346_v1, %v2093_v53  ;;  %v2413_v7 = vadd.f32 %v2404_v2, %v2189_v33  ;;  %v5167_v33 = vld [vmem:[%s6266_s9 + $0x70] sm:$0xff]  }
 0x5a8   : > { %v4843_v28 = vpop.f32.mrf.mxu1  ;;  %v4851_v10 = vpop.f32.mrf.mxu0 }
 0x5a9   : > { %v5907_v13 = vadd.f32 %v2409_v5, %v5796_v40  ;;  %v5910_v11 = vadd.f32 %v2413_v7, %v5799_v8 }
 0x5aa   : > { %v2452_v14 = vpop.f32.mrf.mxu1  ;;  %v2505_v6 = vpop.f32.mrf.mxu0 }
 0x5ab   : > { %v2469_v55 = vmul.f32 %v5904_v4, %v2452_v14  ;;  %v2512_v40 = vmul.f32 %v2505_v6, %v5904_v4 }
 0x5ac   : > { %v4856_v15 = vpop.f32.mrf.mxu1  ;;  %v4862_v17 = vpop.f32.mrf.mxu0 }
 0x5ae   : > { %v2455_v18 = vpop.f32.mrf.mxu1  ;;  %v2508_v47 = vpop.f32.mrf.mxu0 }
 0x5af   : > { %v2470_v20 = vmul.f32 %v5912_v21, %v2455_v18  ;;  %v2513_v8 = vmul.f32 %v2508_v47, %v5912_v21 }
 0x5b0   : > { %v4857_v22 = vpop.f32.mrf.mxu1  ;;  %v4863_v24 = vpop.f32.mrf.mxu0 }
 0x5b1   : > { %v2560_v27 = vpack.c.bf16 %v2470_v20, %v2469_v55  ;;  %v2563_v29 = vpack.c.bf16 %v2513_v8, %v2512_v40 }
 0x5b2   : > { %v2548_v53 = vpop.f32.mrf.mxu1 }
 0x5b3   : > { %4873 = vmatmul.mubr.msk.bf16.vlgmr.msra.gmra.mxu0 %vm883_vm4, %v2563_v29  ;;  %4879 = vmatmul.mubr.msk.bf16.vlgmr.msra.gmra.mxu1 %vm492_vm1, %v2560_v27  ;;  %v2555_v23 = vmul.f32 %v2548_v53, %v5904_v4 }
 0x5b4   : > { %v4868_v30 = vpop.f32.mrf.mxu1  ;;  %4883 = vmatpush3.bf16.msra.mxu0 %v2667_v19  ;;  %4889 = vmatpush3.bf16.msra.mxu1 %v5162_v26 }
 0x5b5   : > { %4884 = vmatprep.mubr.msk.bf16.mxu0 %vm5311_vm0, %v5310_v0  ;;  %4890 = vmatprep.mubr.msk.bf16.mxu1 %vm5311_vm0, %v5310_v0 }
 0x5b6   : > { %v2551_v32 = vpop.f32.mrf.mxu1  ;;  %4894 = vmatprep.subr.bf16.mxu0 %v5310_v0  ;;  %4900 = vmatprep.subr.bf16.mxu1 %v5310_v0 }
 0x5b7   : > { %v2556_v38 = vmul.f32 %v2551_v32, %v5912_v21 }
 0x5b8   : > { %v4869_v35 = vpop.f32.mrf.mxu1 }
 0x5b9   : > { %v2858_v44 = vpack.c.bf16 %v2556_v38, %v2555_v23 }
 0x5bb   : > { %4885 = vmatmul.mubr.msk.bf16.vlgmr.msra.gmra.mxu0 %vm883_vm4, %v2563_v29  ;;  %4891 = vmatmul.mubr.msk.bf16.vlgmr.msra.gmra.mxu1 %vm492_vm1, %v2560_v27 }
 0x5bc   : > { %4895 = vmatpush3.bf16.msra.mxu0 %v2763_v42  ;;  %4901 = vmatpush3.bf16.msra.mxu1 %v5163_v36 }
 0x5bd   : > { %4896 = vmatprep.mubr.msk.bf16.mxu0 %vm5311_vm0, %v5310_v0  ;;  %4902 = vmatprep.mubr.msk.bf16.mxu1 %vm5311_vm0, %v5310_v0 }
 0x5be   : > { %4906 = vmatprep.subr.bf16.mxu0 %v5310_v0  ;;  %4914 = vmatprep.subr.bf16.mxu1 %v5310_v0 }
 0x5c3   : > { %4897 = vmatmul.mubr.msk.bf16.vlgmr.msra.gmra.mxu0 %vm883_vm4, %v2563_v29  ;;  %4903 = vmatmul.mubr.msk.bf16.vlgmr.msra.gmra.mxu1 %vm492_vm1, %v2560_v27 }
 0x5c4   : > { %4907 = vmatpush3.bf16.msra.mxu0 %v5164_v57  ;;  %4915 = vmatpush3.bf16.msra.mxu1 %v5165_v37 }
 0x5c5   : > { %4908 = vmatprep.subr.bf16.mxu0 %v5310_v0  ;;  %4916 = vmatprep.subr.bf16.mxu1 %v5310_v0 }
 0x5c6   : > { %4910 = vmatprep.mubr.msk.bf16.mxu0 %vm5311_vm0, %v5310_v0  ;;  %4918 = vmatprep.mubr.msk.bf16.mxu1 %vm5311_vm0, %v5310_v0 }
 0x5c8   : > { %4909 = vmatpush3.bf16.msra.mxu0 %v5166_v31  ;;  %4917 = vmatpush3.bf16.msra.mxu1 %v5167_v33 }
 0x5c9   : > { %4922 = vmatprep.subr.bf16.mxu0 %v5310_v0  ;;  %4928 = vmatprep.subr.bf16.mxu1 %v5310_v0 }
 0x5cb   : > { %4911 = vmatmul.mubr.msk.bf16.vlgmr.msra.gmra.mxu0 %vm1191_vm5, %v2858_v44  ;;  %4919 = vmatmul.mubr.msk.bf16.vlgmr.msra.gmra.mxu1 %vm1191_vm5, %v2858_v44 }
 0x5cc   : > { %4923 = vmatpush3.bf16.msra.mxu0 %v2560_v27  ;;  %4929 = vmatpush3.bf16.msra.mxu1 %v2563_v29 }
 0x5cd   : > { %4924 = vmatprep.mubr.msk.bf16.mxu0 %vm5311_vm0, %v5310_v0  ;;  %4930 = vmatprep.mubr.msk.bf16.mxu1 %vm5311_vm0, %v5310_v0 }
 0x5ce   : > { %4934 = vmatprep.subr.bf16.mxu0 %v5310_v0  ;;  %4940 = vmatprep.subr.bf16.mxu1 %v5310_v0 }
 0x5d3   : > { %4925 = vmatmul.mubr.msk.bf16.vlgmr.msra.gmra.mxu0 %vm492_vm1, %v5601_v58  ;;  %4931 = vmatmul.mubr.msk.bf16.vlgmr.msra.gmra.mxu1 %vm492_vm1, %v5601_v58 }
 0x5d4   : > { %4935 = vmatpush3.bf16.msra.mxu0 %v2858_v44  ;;  %4936 = vmatprep.mubr.msk.bf16.mxu0 %vm5311_vm0, %v5310_v0 }
 0x5d5   : > { %4946 = vmatprep.subr.bf16.mxu0 %v5310_v0  ;;  %4942 = vmatprep.mubr.msk.bf16.mxu1 %vm5311_vm0, %v5310_v0 }
 0x5d6   : > { %4941 = vmatpush3.bf16.msra.mxu1 %v3123_v43 }
 0x5d7   : > { %4952 = vmatprep.subr.bf16.mxu1 %v5310_v0 }
 0x5db   : > { %4937 = vmatmul.mubr.msk.bf16.vlgmr.msra.gmra.mxu0 %vm492_vm1, %v5601_v58 }
 0x5dc   : > { %4948 = vmatprep.mubr.msk.bf16.mxu0 %vm5311_vm0, %v5310_v0  ;;  %4947 = vmatpush3.bf16.msra.mxu0 %v5168_v41 }
 0x5dd   : > { %4958 = vmatprep.subr.bf16.mxu0 %v5310_v0 }
 0x673   : > { %v2604_v45 = vpop.f32.mrf.mxu0  ;;  %v2654_v46 = vpop.f32.mrf.mxu1 }
 0x674   : > { %v2655_v25 = vadd.f32 %v2654_v46, %v2604_v45 }
 0x675   : > { %v4874_v48 = vpop.f32.mrf.mxu0  ;;  %v4880_v49 = vpop.f32.mrf.mxu1 }
 0x676   : > { %v5169_v48 = vld [vmem:[%s6264_s7 + $0x68] sm:$0xff]  }
 0x677   : > { %v2607_v50 = vpop.f32.mrf.mxu0  ;;  %v2657_v51 = vpop.f32.mrf.mxu1 }
 0x678   : > { %v2658_v52 = vadd.f32 %v2657_v51, %v2607_v50 }
 0x679   : > { %v4875_v56 = vpop.f32.mrf.mxu0  ;;  %v4881_v59 = vpop.f32.mrf.mxu1 }
 0x67b   : > { %v2703_v60 = vpop.f32.mrf.mxu0  ;;  %v2750_v61 = vpop.f32.mrf.mxu1 }
 0x67c   : > { %v2751_v1 = vadd.f32 %v2750_v61, %v2703_v60  ;;  %v4397_v60 = vld [vmem:[%s6265_s8 + $0x38] sm:$0xf] }
 0x67d   : > { %v4886_v2 = vpop.f32.mrf.mxu0  ;;  %v4892_v5 = vpop.f32.mrf.mxu1 }
 0x67e   : > { %v3318_v2 = vsel %vm887_vm3, %v4397_v60, 0  ;;  %v5171_v5 = vld [vmem:[%s6266_s9 + $0x88] sm:$0xff]  }
 0x67f   : > { %v2706_v7 = vpop.f32.mrf.mxu0  ;;  %v2753_v28 = vpop.f32.mrf.mxu1 }
 0x680   : > { %v2754_v10 = vadd.f32 %v2753_v28, %v2706_v7  ;;  %v5172_v7 = vld [vmem:[%s6266_s9 + $0x98] sm:$0xff]   ;;  %v5173_v28 = vld [vmem:[%s6266_s9 + $0x80] sm:$0xff]  }
 0x681   : > { %v4887_v14 = vpop.f32.mrf.mxu0  ;;  %v4893_v6 = vpop.f32.mrf.mxu1 }
 0x683   : > { %v2799_v15 = vpop.f32.mrf.mxu0  ;;  %v2846_v17 = vpop.f32.mrf.mxu1 }
 0x684   : > { %v2847_v18 = vadd.f32 %v2846_v17, %v2799_v15  ;;  %v5175_v17 = vld [vmem:[%s6303_s11 + $0x8] sm:$0xff]  }
 0x685   : > { %v4898_v47 = vpop.f32.mrf.mxu0  ;;  %v4904_v54 = vpop.f32.mrf.mxu1 }
 0x686   : > { %v6003_v55 = vadd.f32 %v2847_v18, %v5893_v62  ;;  %v5176_v18 = vld [vmem:[%s6303_s11] sm:$0xff]  }
 0x687   : > { %v2802_v40 = vpop.f32.mrf.mxu0  ;;  %v2849_v20 = vpop.f32.mrf.mxu1 }
 0x688   : > { %v2850_v8 = vadd.f32 %v2849_v20, %v2802_v40 }
 0x689   : > { %v4899_v22 = vpop.f32.mrf.mxu0  ;;  %v4905_v24 = vpop.f32.mrf.mxu1 }
 0x68a   : > { %v6006_v26 = vadd.f32 %v2850_v8, %v5896_v3 }
 0x68b   : > { %v2908_v27 = vpop.f32.mrf.mxu0  ;;  %v2966_v29 = vpop.f32.mrf.mxu1 }
 0x68c   : > { %v2973_v19 = vadd.f32 %v2908_v27, %v2655_v25  ;;  %v2977_v53 = vadd.f32 %v2966_v29, %v2751_v1  ;;  %v5170_v1 = vld [vmem:[%s6264_s7 + $0x70] sm:$0xff]  }
 0x68d   : > { %v4912_v30 = vpop.f32.mrf.mxu0  ;;  %v4920_v32 = vpop.f32.mrf.mxu1 }
 0x68e   : > { %v6009_v34 = vadd.f32 %v2973_v19, %v5899_v63  ;;  %v6012_v62 = vadd.f32 %v2977_v53, %v5902_v16  ;;  %v4391_v16 = vld [vmem:[%s6265_s8 + $0x34] sm:$0xf] }
 0x68f   : > { %v2911_v35 = vpop.f32.mrf.mxu0  ;;  %v2969_v36 = vpop.f32.mrf.mxu1  ;;  %v3222_v51 = vsel %vm887_vm3, %v4391_v16, 0 }
 0x690   : > { %v2974_v42 = vadd.f32 %v2911_v35, %v2658_v52  ;;  %v2978_v57 = vadd.f32 %v2969_v36, %v2754_v10  ;;  %v5174_v10 = vld [vmem:[%s6266_s9 + $0x90] sm:$0xff]  }
 0x691   : > { %v4913_v37 = vpop.f32.mrf.mxu0  ;;  %v4921_v31 = vpop.f32.mrf.mxu1 }
 0x692   : > { %v6015_v3 = vadd.f32 %v2974_v42, %v5907_v13  ;;  %v6018_v33 = vadd.f32 %v2978_v57, %v5910_v11 }
 0x693   : > { %v3017_v38 = vpop.f32.mrf.mxu0  ;;  %v3060_v23 = vpop.f32.mrf.mxu1 }
 0x694   : > { %v3024_v43 = vmul.f32 %v3017_v38, %v5904_v4  ;;  %v3067_v45 = vmul.f32 %v3060_v23, %v5904_v4 }
 0x695   : > { %v4926_v44 = vpop.f32.mrf.mxu0  ;;  %v4932_v63 = vpop.f32.mrf.mxu1 }
 0x697   : > { %v3020_v39 = vpop.f32.mrf.mxu0  ;;  %v3063_v41 = vpop.f32.mrf.mxu1 }
 0x698   : > { %v3025_v13 = vmul.f32 %v3020_v39, %v5912_v21  ;;  %v3068_v46 = vmul.f32 %v3063_v41, %v5912_v21 }
 0x699   : > { %v4927_v11 = vpop.f32.mrf.mxu0  ;;  %v4933_v25 = vpop.f32.mrf.mxu1 }
 0x69a   : > { %v3115_v49 = vpack.c.bf16 %v3025_v13, %v3024_v43  ;;  %v3118_v50 = vpack.c.bf16 %v3068_v46, %v3067_v45 }
 0x69b   : > { %v3103_v52 = vpop.f32.mrf.mxu0 }
 0x69c   : > { %4943 = vmatmul.mubr.msk.bf16.vlgmr.msra.gmra.mxu1 %vm883_vm4, %v3118_v50  ;;  %4949 = vmatmul.mubr.msk.bf16.vlgmr.msra.gmra.mxu0 %vm492_vm1, %v3115_v49  ;;  %v3110_v6 = vmul.f32 %v3103_v52, %v5904_v4 }
 0x69d   : > { %v4938_v56 = vpop.f32.mrf.mxu0  ;;  %4953 = vmatpush3.bf16.msra.mxu1 %v3222_v51  ;;  %4959 = vmatpush3.bf16.msra.mxu0 %v5169_v48  ;;  %v4419_v51 = vld [vmem:[%s6304_s23 + $0x1] ss:$0 sm:$0xff] }
 0x69e   : > { %4954 = vmatprep.mubr.msk.bf16.mxu1 %vm5311_vm0, %v5310_v0  ;;  %4960 = vmatprep.mubr.msk.bf16.mxu0 %vm5311_vm0, %v5310_v0 }
 0x69f   : > { %v3106_v59 = vpop.f32.mrf.mxu0  ;;  %4964 = vmatprep.subr.bf16.mxu1 %v5310_v0  ;;  %4970 = vmatprep.subr.bf16.mxu0 %v5310_v0 }
 0x6a0   : > { %v3111_v14 = vmul.f32 %v3106_v59, %v5912_v21 }
 0x6a1   : > { %v4939_v61 = vpop.f32.mrf.mxu0 }
 0x6a2   : > { %v3413_v15 = vpack.c.bf16 %v3111_v14, %v3110_v6 }
 0x6a4   : > { %4955 = vmatmul.mubr.msk.bf16.vlgmr.msra.gmra.mxu1 %vm883_vm4, %v3118_v50  ;;  %4961 = vmatmul.mubr.msk.bf16.vlgmr.msra.gmra.mxu0 %vm492_vm1, %v3115_v49 }
 0x6a5   : > { %4965 = vmatpush3.bf16.msra.mxu1 %v3318_v2  ;;  %4971 = vmatpush3.bf16.msra.mxu0 %v5170_v1 }
 0x6a6   : > { %4966 = vmatprep.mubr.msk.bf16.mxu1 %vm5311_vm0, %v5310_v0  ;;  %4972 = vmatprep.mubr.msk.bf16.mxu0 %vm5311_vm0, %v5310_v0 }
 0x6a7   : > { %4976 = vmatprep.subr.bf16.mxu1 %v5310_v0  ;;  %4984 = vmatprep.subr.bf16.mxu0 %v5310_v0 }
 0x6ac   : > { %4967 = vmatmul.mubr.msk.bf16.vlgmr.msra.gmra.mxu1 %vm883_vm4, %v3118_v50  ;;  %4973 = vmatmul.mubr.msk.bf16.vlgmr.msra.gmra.mxu0 %vm492_vm1, %v3115_v49 }
 0x6ad   : > { %4977 = vmatpush3.bf16.msra.mxu1 %v5171_v5  ;;  %4985 = vmatpush3.bf16.msra.mxu0 %v5172_v7 }
 0x6ae   : > { %4978 = vmatprep.subr.bf16.mxu1 %v5310_v0  ;;  %4986 = vmatprep.subr.bf16.mxu0 %v5310_v0 }
 0x6af   : > { %4980 = vmatprep.mubr.msk.bf16.mxu1 %vm5311_vm0, %v5310_v0  ;;  %4988 = vmatprep.mubr.msk.bf16.mxu0 %vm5311_vm0, %v5310_v0 }
 0x6b1   : > { %4979 = vmatpush3.bf16.msra.mxu1 %v5173_v28  ;;  %4987 = vmatpush3.bf16.msra.mxu0 %v5174_v10 }
 0x6b2   : > { %4992 = vmatprep.subr.bf16.mxu1 %v5310_v0  ;;  %5000 = vmatprep.subr.bf16.mxu0 %v5310_v0 }
 0x6b4   : > { %4981 = vmatmul.mubr.msk.bf16.vlgmr.msra.gmra.mxu1 %vm1191_vm5, %v3413_v15  ;;  %4989 = vmatmul.mubr.msk.bf16.vlgmr.msra.gmra.mxu0 %vm1191_vm5, %v3413_v15 }
 0x6b5   : > { %4996 = vmatprep.mubr.msk.bf16.mxu1 %vm5311_vm0, %v5310_v0  ;;  %5002 = vmatprep.mubr.msk.bf16.mxu0 %vm5311_vm0, %v5310_v0 }
 0x6b6   : > { %4993 = vmatpush3.bf16.msra.mxu1 %v5175_v17 }
 0x6b7   : > { %4994 = vmatprep.subr.bf16.mxu1 %v5310_v0 }
 0x6ba   : > { %4995 = vmatpush3.bf16.msra.mxu1 %v5176_v18 }
 0x6bb   : > { %5006 = vmatprep.subr.bf16.mxu1 %v5310_v0 }
 0x75c   : > { %v3159_v47 = vpop.f32.mrf.mxu1  ;;  %v3209_v54 = vpop.f32.mrf.mxu0 }
 0x75d   : > { %v3210_v40 = vadd.f32 %v3209_v54, %v3159_v47 }
 0x75e   : > { %v4944_v20 = vpop.f32.mrf.mxu1  ;;  %v4950_v8 = vpop.f32.mrf.mxu0 }
 0x75f   : > { %v6106_v20 = vld [vmem:[%s5510_s13] sm:$0xff]  ;;  %v6110_v8 = vld [vmem:[%s5510_s13 + $0x8] sm:$0xff] }
 0x760   : > { %v3162_v22 = vpop.f32.mrf.mxu1  ;;  %v3212_v24 = vpop.f32.mrf.mxu0 }
 0x761   : > { %v3213_v27 = vadd.f32 %v3212_v24, %v3162_v22  ;;  %v5215_v24 = vld [vmem:[%s5478_s25] sm:$0xff]  }
 0x762   : > { %v4945_v29 = vpop.f32.mrf.mxu1  ;;  %v4951_v19 = vpop.f32.mrf.mxu0 }
 0x763   : > { %v5178_v29 = vld [vmem:[%s6303_s11 + $0x10] sm:$0xff]  }
 0x764   : > { %v3258_v53 = vpop.f32.mrf.mxu1  ;;  %v3305_v30 = vpop.f32.mrf.mxu0 }
 0x765   : > { %v3306_v46 = vadd.f32 %v3305_v30, %v3258_v53 }
 0x766   : > { %v4956_v32 = vpop.f32.mrf.mxu1  ;;  %v4962_v35 = vpop.f32.mrf.mxu0 }
 0x768   : > { %v3261_v36 = vpop.f32.mrf.mxu1  ;;  %v3308_v42 = vpop.f32.mrf.mxu0 }
 0x769   : > { %v3309_v59 = vadd.f32 %v3308_v42, %v3261_v36 }
 0x76a   : > { %v4957_v57 = vpop.f32.mrf.mxu1  ;;  %v4963_v37 = vpop.f32.mrf.mxu0 }
 0x76c   : > { %v3354_v31 = vpop.f32.mrf.mxu1  ;;  %v3401_v38 = vpop.f32.mrf.mxu0 }
 0x76d   : > { %v3402_v23 = vadd.f32 %v3401_v38, %v3354_v31 }
 0x76e   : > { %v4968_v44 = vpop.f32.mrf.mxu1  ;;  %v4974_v63 = vpop.f32.mrf.mxu0 }
 0x76f   : > { %v3536_v39 = vadd.f32 %v3402_v23, %v6003_v55  ;;  %v5179_v63 = vld [vmem:[%s6303_s11 + $0x28] sm:$0xff]  }
 0x770   : > { %v3357_v41 = vpop.f32.mrf.mxu1  ;;  %v3404_v16 = vpop.f32.mrf.mxu0 }
 0x771   : > { %v3405_v43 = vadd.f32 %v3404_v16, %v3357_v41 }
 0x772   : > { %v4969_v45 = vpop.f32.mrf.mxu1  ;;  %v4975_v13 = vpop.f32.mrf.mxu0 }
 0x773   : > { %v3537_v11 = vadd.f32 %v3405_v43, %v6006_v26 }
 0x774   : > { %v3463_v25 = vpop.f32.mrf.mxu1  ;;  %v3521_v48 = vpop.f32.mrf.mxu0 }
 0x775   : > { %v3528_v49 = vadd.f32 %v3463_v25, %v3210_v40  ;;  %v3532_v50 = vadd.f32 %v3521_v48, %v3306_v46 }
 0x776   : > { %v4982_v52 = vpop.f32.mrf.mxu1  ;;  %v4990_v56 = vpop.f32.mrf.mxu0 }
 0x777   : > { %v6098_v55 = vadd.f32 %v3528_v49, %v6009_v34  ;;  %v3534_v60 = vadd.f32 %v3532_v50, %v6012_v62  ;;  %v5181_v52 = vld [vmem:[%s6303_s11 + $0x38] sm:$0xff]  }
 0x778   : > { %v3466_v61 = vpop.f32.mrf.mxu1  ;;  %v3524_v1 = vpop.f32.mrf.mxu0 }
 0x779   : > { %v3567_v2 = vadd.f32 %v4419_v51, %v3534_v60  ;;  %v3529_v26 = vadd.f32 %v3466_v61, %v3213_v27  ;;  %v3533_v5 = vadd.f32 %v3524_v1, %v3309_v59  ;;  %v5177_v27 = vld [vmem:[%s6303_s11 + $0x18] sm:$0xff]   ;;  %v5182_v61 = vld [vmem:[%s6303_s11 + $0x30] sm:$0xff]  }
 0x77a   : > { %v4983_v7 = vpop.f32.mrf.mxu1  ;;  %v4991_v28 = vpop.f32.mrf.mxu0 }
 0x77b   : > { %v4420_v10 = vmul.f32 -1.442695, %v3567_v2  ;;  %v6102_v14 = vadd.f32 %v3529_v26, %v6015_v3  ;;  %v3535_v6 = vadd.f32 %v3533_v5, %v6018_v33  ;;  %v5183_v5 = vld [vmem:[%s6303_s11 + $0x48] sm:$0xff]   ;;  %v5184_v7 = vld [vmem:[%s6303_s11 + $0x40] sm:$0xff]  }
 0x77d   : > { %v3568_v15 = vadd.f32 %v4419_v51, %v3535_v6  ;;  %5193 = vpow2.f32 %v4420_v10 }
 0x77f   : > { %v4421_v34 = vmul.f32 -1.442695, %v3568_v15 }
 0x781   : > { %5195 = vpow2.f32 %v4421_v34 }
 0x78a   : > { %v5194_v62 = vpop.eup %5193 }
 0x78b   : > { %v3575_v17 = vadd.f32 1.0, %v5194_v62 }
 0x78d   : > { %5197 = vrcp.f32 %v3575_v17 }
 0x78e   : > { %v5196_v18 = vpop.eup %5195 }
 0x78f   : > { %v3576_v47 = vadd.f32 1.0, %v5196_v18 }
 0x791   : > { %5199 = vrcp.f32 %v3576_v47 }
 0x79a   : > { %v5198_v54 = vpop.eup %5197 }
 0x79b   : > { %v3581_v3 = vmul.f32 %v6106_v20, %v5198_v54 }
 0x79e   : > { %v5200_v40 = vpop.eup %5199 }
 0x79f   : > { %v3582_v33 = vmul.f32 %v6110_v8, %v5200_v40 }
 0x7a1   : > { %v3587_v22 = vpack.c.bf16 %v3582_v33, %v3581_v3 }
 0x7a3   : > { %4997 = vmatmul.mubr.msk.bf16.vlgmr.msra.gmra.mxu1 %vm1191_vm5, %v3587_v22  ;;  %5001 = vmatpush3.bf16.msra.mxu0 %v3587_v22 }
 0x7a4   : > { %5010 = vmatprep.mubr.msk.bf16.mxu1 %vm5311_vm0, %v5310_v0  ;;  %5014 = vmatprep.subr.bf16.mxu0 %v5310_v0 }
 0x7a5   : > { %5007 = vmatpush3.bf16.msra.mxu1 %v5177_v27 }
 0x7a6   : > { %5003 = vmatmul.mubr.msk.bf16.vlgmr.msra.gmra.mxu0 %vm492_vm1, %v5215_v24  ;;  %5008 = vmatprep.subr.bf16.mxu1 %v5310_v0 }
 0x7a7   : > { %5016 = vmatprep.mubr.msk.bf16.mxu0 %vm5311_vm0, %v5310_v0 }
 0x7a9   : > { %5009 = vmatpush3.bf16.msra.mxu1 %v5178_v29 }
 0x7aa   : > { %5020 = vmatprep.subr.bf16.mxu1 %v5310_v0 }
 0x863   : > { %v3637_v19 = vpop.f32.mrf.mxu1 }
 0x864   : > { %v3644_v53 = vadd.f32 %v3637_v19, %v3536_v39  ;;  %v5180_v39 = vld [vmem:[%s6303_s11 + $0x20] sm:$0xff]  }
 0x865   : > { %v4998_v30 = vpop.f32.mrf.mxu1  ;;  %v4415_v19 = vld [vmem:[%s6305_s16] ss:$0 sm:$0xff] }
 0x866   : > { %v3680_v32 = vpop.f32.mrf.mxu0  ;;  %v3546_v30 = vadd.f32 %v4415_v19, %v6102_v14 }
 0x867   : > { %v3640_v35 = vpop.f32.mrf.mxu1  ;;  %v3687_v31 = vmul.f32 %v3680_v32, %v5683_v9 }
 0x868   : > { %v3645_v36 = vadd.f32 %v3640_v35, %v3537_v11  ;;  %v5004_v42 = vpop.f32.mrf.mxu0  ;;  %v4417_v35 = vmul.f32 -1.442695, %v3546_v30 }
 0x869   : > { %v4999_v57 = vpop.f32.mrf.mxu1 }
 0x86a   : > { %v3683_v37 = vpop.f32.mrf.mxu0 }
 0x86b   : > { %v3688_v38 = vmul.f32 %v3683_v37, %v5685_v12  ;;  %v4458_v37 = vld [vmem:[%s6305_s16 + $0x2] ss:$0 sm:$0xff] }
 0x86c   : > { %v5005_v23 = vpop.f32.mrf.mxu0 }
 0x86d   : > { %v3694_v44 = vpack.c.bf16 %v3688_v38, %v3687_v31 }
 0x86f   : > { %5011 = vmatmul.mubr.msk.bf16.vlgmr.msra.gmra.mxu1 %vm1191_vm5, %v3694_v44  ;;  %5015 = vmatpush3.bf16.msra.mxu0 %v3694_v44 }
 0x870   : > { %5028 = vmatprep.subr.bf16.mxu0 %v5310_v0  ;;  %5024 = vmatprep.mubr.msk.bf16.mxu1 %vm5311_vm0, %v5310_v0 }
 0x871   : > { %5021 = vmatpush3.bf16.msra.mxu1 %v5179_v63 }
 0x872   : > { %5017 = vmatmul.mubr.msk.bf16.vlgmr.msra.gmra.mxu0 %vm492_vm1, %v5215_v24  ;;  %5022 = vmatprep.subr.bf16.mxu1 %v5310_v0 }
 0x873   : > { %5029 = vmatpush3.bf16.msra.mxu0 %v3587_v22  ;;  %5030 = vmatprep.mubr.msk.bf16.mxu0 %vm5311_vm0, %v5310_v0 }
 0x874   : > { %5042 = vmatprep.subr.bf16.mxu0 %v5310_v0 }
 0x875   : > { %5023 = vmatpush3.bf16.msra.mxu1 %v5180_v39 }
 0x876   : > { %5034 = vmatprep.subr.bf16.mxu1 %v5310_v0 }
 0x87a   : > { %5031 = vmatmul.mubr.msk.bf16.vlgmr.msra.gmra.mxu0 %vm492_vm1, %v5601_v58 }
 0x87b   : > { %5044 = vmatprep.mubr.msk.bf16.mxu0 %vm5311_vm0, %v5310_v0 }
 0x92f   : > { %v3744_v41 = vpop.f32.mrf.mxu1 }
 0x930   : > { %v3751_v16 = vadd.f32 %v3744_v41, %v3644_v53  ;;  %v3545_v53 = vadd.f32 %v4415_v19, %v6098_v55 }
 0x931   : > { %v5012_v43 = vpop.f32.mrf.mxu1 }
 0x932   : > { %v3787_v45 = vpop.f32.mrf.mxu0  ;;  %v4416_v32 = vmul.f32 -1.442695, %v3545_v53 }
 0x933   : > { %v3747_v13 = vpop.f32.mrf.mxu1  ;;  %v3794_v49 = vmul.f32 %v3787_v45, %v5683_v9 }
 0x934   : > { %v3752_v46 = vadd.f32 %v3747_v13, %v3645_v36  ;;  %v5018_v11 = vpop.f32.mrf.mxu0  ;;  %5201 = vpow2.f32 %v4416_v32 }
 0x935   : > { %v5013_v25 = vpop.f32.mrf.mxu1  ;;  %5203 = vpow2.f32 %v4417_v35 }
 0x936   : > { %v3790_v48 = vpop.f32.mrf.mxu0 }
 0x937   : > { %v3795_v50 = vmul.f32 %v3790_v48, %v5685_v12 }
 0x938   : > { %v5019_v51 = vpop.f32.mrf.mxu0 }
 0x939   : > { %v3801_v56 = vpack.c.bf16 %v3795_v50, %v3794_v49 }
 0x93a   : > { %v3894_v59 = vpop.f32.mrf.mxu0 }
 0x93b   : > { %5025 = vmatmul.mubr.msk.bf16.vlgmr.msra.gmra.mxu1 %vm1191_vm5, %v3801_v56  ;;  %v3901_v12 = vmul.f32 %v3894_v59, %v5904_v4 }
 0x93c   : > { %v5032_v60 = vpop.f32.mrf.mxu0  ;;  %5035 = vmatpush3.bf16.msra.mxu1 %v5181_v52  ;;  %5038 = vmatprep.mubr.msk.bf16.mxu1 %vm5311_vm0, %v5310_v0 }
 0x93d   : > { %5036 = vmatprep.subr.bf16.mxu1 %v5310_v0 }
 0x93e   : > { %v3897_v9 = vpop.f32.mrf.mxu0 }
 0x93f   : > { %v3902_v1 = vmul.f32 %v3897_v9, %v5912_v21 }
 0x940   : > { %v5033_v2 = vpop.f32.mrf.mxu0  ;;  %5037 = vmatpush3.bf16.msra.mxu1 %v5182_v61 }
 0x941   : > { %v3908_v26 = vpack.c.bf16 %v3902_v1, %v3901_v12  ;;  %5048 = vmatprep.subr.bf16.mxu1 %v5310_v0  ;;  %v5202_v36 = vpop.eup %5201 }
 0x942   : > { %v3553_v42 = vadd.f32 1.0, %v5202_v36 }
 0x943   : > { %5039 = vmatmul.mubr.msk.bf16.vlgmr.msra.gmra.mxu1 %vm1191_vm5, %v3908_v26  ;;  %5043 = vmatpush3.bf16.msra.mxu0 %v3908_v26 }
 0x944   : > { %5052 = vmatprep.mubr.msk.bf16.mxu1 %vm5311_vm0, %v5310_v0  ;;  %5049 = vmatpush3.bf16.msra.mxu1 %v5183_v5  ;;  %5205 = vrcp.f32 %v3553_v42 }
 0x945   : > { %5050 = vmatprep.subr.bf16.mxu1 %v5310_v0 }
 0x946   : > { %5045 = vmatmul.mubr.msk.bf16.vlgmr.msra.gmra.mxu0 %vm492_vm1, %v5601_v58 }
 0x948   : > { %5051 = vmatpush3.bf16.msra.mxu1 %v5184_v7 }
 0x9fb   : > { %v3851_v28 = vpop.f32.mrf.mxu1 }
 0x9fc   : > { %v3858_v10 = vadd.f32 %v3851_v28, %v3751_v16 }
 0x9fd   : > { %v5026_v6 = vpop.f32.mrf.mxu1 }
 0x9ff   : > { %v3854_v15 = vpop.f32.mrf.mxu1 }
 0xa00   : > { %v3859_v34 = vadd.f32 %v3854_v15, %v3752_v46 }
 0xa01   : > { %v5027_v62 = vpop.f32.mrf.mxu1 }
 0xa03   : > { %v3958_v17 = vpop.f32.mrf.mxu1 }
 0xa04   : > { %v3965_v58 = vadd.f32 %v3958_v17, %v3858_v10 }
 0xa05   : > { %v5040_v18 = vpop.f32.mrf.mxu1 }
 0xa06   : > { %v4001_v47 = vpop.f32.mrf.mxu0 }
 0xa07   : > { %v3961_v54 = vpop.f32.mrf.mxu1  ;;  %v4008_v22 = vmul.f32 %v4001_v47, %v5904_v4  ;;  %v5204_v4 = vpop.eup %5203 }
 0xa08   : > { %v3966_v40 = vadd.f32 %v3961_v54, %v3859_v34  ;;  %v5046_v3 = vpop.f32.mrf.mxu0  ;;  %v5206_v39 = vpop.eup %5205 }
 0xa09   : > { %v5041_v33 = vpop.f32.mrf.mxu1  ;;  %v4088_v16 = vsub.f32 1.0, %v5206_v39  ;;  %v4086_v13 = vmul.f32 %v6106_v20, %v5206_v39 }
 0xa0a   : > { %v4004_v0 = vpop.f32.mrf.mxu0 }
 0xa0b   : > { %v4009_v24 = vmul.f32 %v4004_v0, %v5912_v21  ;;  %v3554_v21 = vadd.f32 1.0, %v5204_v4 }
 0xa0c   : > { %v5047_v27 = vpop.f32.mrf.mxu0 }
 0xa0d   : > { %v4015_v29 = vpack.c.bf16 %v4009_v24, %v4008_v22  ;;  %5207 = vrcp.f32 %v3554_v21 }
 0xa0f   : > { %5053 = vmatmul.mubr.msk.bf16.vlgmr.msra.gmra.mxu1 %vm1191_vm5, %v4015_v29 }
 0xa1a   : > { %v5208_v41 = vpop.eup %5207 }
 0xa1b   : > { %v4089_v46 = vsub.f32 1.0, %v5208_v41  ;;  %v4087_v49 = vmul.f32 %v6110_v8, %v5208_v41 }
 0xacf   : > { %v4065_v57 = vpop.f32.mrf.mxu1 }
 0xad0   : > { %v4072_v31 = vadd.f32 %v4065_v57, %v3965_v58 }
 0xad1   : > { %v5054_v38 = vpop.f32.mrf.mxu1 }
 0xad2   : > { %v4082_v23 = vadd.f32 %v4458_v37, %v4072_v31 }
 0xad3   : > { %v4068_v55 = vpop.f32.mrf.mxu1 }
 0xad4   : > { %5209 = vtanh.f32 %v4082_v23  ;;  %v4073_v14 = vadd.f32 %v4068_v55, %v3966_v40 }
 0xad5   : > { %v5055_v44 = vpop.f32.mrf.mxu1 }
 0xad6   : > { %v4083_v63 = vadd.f32 %v4458_v37, %v4073_v14 }
 0xad8   : > { %5211 = vtanh.f32 %v4083_v63 }
 0xae1   : > { %v5210_v43 = vpop.eup %5209 }
 0xae2   : > { %v4090_v45 = vmul.f32 %v5210_v43, %v4088_v16 }
 0xae4   : > { %v4092_v11 = vadd.f32 %v4090_v45, %v4086_v13 }
 0xae5   : > { %v5212_v25 = vpop.eup %5211 }
 0xae6   : > { %v4091_v48 = vmul.f32 %v5212_v25, %v4089_v46  ;;  %4094 = vst.msk [vmem:[%s5510_s13] sm:$0xff] %vm1191_vm5, %v4092_v11 }
 0xae8   : > { %v4093_v20 = vadd.f32 %v4091_v48, %v4087_v49 }
 0xaea   : > { %4095 = vst.msk [vmem:[%s5510_s13 + $0x8] sm:$0xff] %vm1191_vm5, %v4093_v20 }
 0xaeb   : > { %5229 = shalt.err (!%p5226_p8)
}
 0xaec   : > { %s5230_s13 = scalar_lea.hbm %s6198_s18, 256  ;;  %s5234_s28 = scalar_lea.hbm %s6309_s17, 512 }
 0xaed   : > { %p5231_p10 = scmp.ne.s32.totalorder %s6198_s18, %s5230_s13  ;;  %p5235_p13 = scmp.lt.s32.totalorder %s6198_s18, %s6309_s17 }
 0xaee   : > { %p5236_p0 = scmp.lt.s32.totalorder %s5234_s28, %s5230_s13 }
 0xaef   : > { %p5232_p11 = pnand %p5231_p10, %p5431_p3 }
 0xaf0   : > { %p5237_p1 = por %p5236_p0, %p5235_p13 }
 0xaf1   : > { %p5233_p12 = pneg %p5232_p11 }
 0xaf3   : > { %p5238_p2 = pnand %p5237_p1, %p5233_p12 }
 0xaf5   : > { %5241 = shalt.err (!%p5238_p2)
}
 0xaf6   : > { %s5315_s19 = smov 128   ;;  %s5316_s29 = smov 8  }
 0xaf7   : > { %5056 = dma.vmem_to_hbm [thread:$0]  (%p5431_p3), %s6200_s20, 256, %s6198_s18, %s6206_s14, %s5315_s19, %s5315_s19, %s5316_s29  }
 0xaf8 PF: > { %s6311_s30 = sld [smem:[#allocation11_spill]] }
 0xaf9   : > { %s6312_s27 = sld [smem:[#allocation5_spill]] }
 0xafe   : > { %p5062_p4 = scmp.ge.s32.totalorder %s6311_s30, 2 }
 0xaff   : > { %s4125_s10 = sand.u32 1, %s6312_s27  }
 0xb00   : > { %p5059_p5 = pnand %p5062_p4, %p5441_p9  ;;  %s4126_s21 = scalar_lea.sflag [#allocation3], %s4125_s10 }
 0xb02   : > { %p5060_p6 = pneg %p5059_p5 }
 0xb04   : > { %5275 = dma.done.wait (%p5060_p6), %s4126_s21, 256  }
 0xb05   : > { %5277 = vsyncadd (%p5060_p6), %s4126_s21, 4294967040  ;;  %s25_s28 = sadd.s32 1, %s6311_s30   ;;  %s6314_s21 = sld [smem:[#allocation6_spill]] }
 0xb06   : > { %p22_p7 = scmp.ge.s32.totalorder %s25_s28, 10   ;;  %s6315_s22 = sld [smem:[#allocation7_spill]] }
 0xb07   : > { %s6316_s23 = sld [smem:[#allocation16_spill]] }
 0xb08   : > { %s6317_s24 = sld [smem:[#allocation9_spill]]  ;;  %24 = sbr.rel (!%p22_p7) target bundleno = 9 (0x9), region = 159 }
 0xb09   : > { %s6318_s25 = sld [smem:[#allocation10_spill]] }
 0xb0a   : > { %s6319_s26 = sld [smem:[#allocation12_spill]] }
 0xb0b   : > { %s6320_s27 = sld [smem:[#allocation14_spill]] }
 0xb0d   :  { %4131 = vsyncpa [#allocation3], 1 }
 0xb0e   :  { %4133 = vsyncpa [#allocation3 + $0x1], 1 }

</bundles_post_ra>
